<compile_context>
chip_gen: v6e
topology: v6e:2x2x1
jax: 0.10.0
libtpu: 0.0.40
codegen_flags: <defaults>
</compile_context>

<pallas_src>
import functools

import jax
import jax.numpy as jnp
import numpy as np
from jax import lax
from jax.experimental import pallas as pl
from jax.experimental.pallas import tpu as pltpu


def _round_up(x, m):
    return (x + m - 1) // m * m


def _full_spec(shape):
    # Whole-array block, no grid -> index_map takes no args.
    return pl.BlockSpec(shape, lambda: (0,) * len(shape))


# ---------------------------------------------------------------------------
# The fused kernel
# ---------------------------------------------------------------------------
def _fused_encoder_kernel(cols1_ref, w1_ref, b1_ref,
                          g2_ref, w2_ref, b2_ref,
                          g3_ref, w3_ref, b3_ref,
                          sel_ref, wfc1_ref, bfc1_ref,
                          wmu_ref, bmu_ref, wls_ref, bls_ref,
                          eps_ref, z_ref, kl_ref, *, batch, latent):
    f32, bf16 = jnp.float32, jnp.bfloat16

    # ---- conv1 + bias + ReLU + maxpool(2,2) --------------------------------
    # Both branches fused on the channel axis (shared im2col cols, weights
    # concatenated to 32 output channels).  Pool = running max over the 4
    # pool-window slots of the im2col rows (bias/ReLU commute with max).
    w1 = w1_ref[...]
    acc1 = jnp.dot(cols1_ref[0], w1, preferred_element_type=f32)
    for s in range(1, 4):
        acc1 = jnp.maximum(
            acc1, jnp.dot(cols1_ref[s], w1, preferred_element_type=f32))
    h = jnp.maximum(acc1 + b1_ref[...], 0.0).astype(bf16)        # (B*64, 32)

    # ---- conv2 / conv3: in-VMEM im2col-as-matmul + pool --------------------
    def conv_relu_pool(x, g_ref, w_ref, b_ref):
        # x:     (Nin, Cin) bf16 activations, rows = (b, y, x).
        # g_ref: (9, 4*Npool, Nin) one-hot gather matrices (im2col rows,
        #        pool-slot major); spatial gather + zero padding run as exact
        #        bf16 one-hot matmuls on the MXU.
        # w_ref: (9, Cin, Cout) block-diagonal (branch-fused) weights.
        # b_ref: (1, Cout) f32.
        n_pool = g_ref.shape[1] // 4
        acc = None
        for k in range(9):
            cols_k = jnp.dot(g_ref[k], x, preferred_element_type=f32).astype(bf16)
            term = jnp.dot(cols_k, w_ref[k], preferred_element_type=f32)
            acc = term if acc is None else acc + term
        m = jnp.maximum(jnp.maximum(acc[0:n_pool], acc[n_pool:2 * n_pool]),
                        jnp.maximum(acc[2 * n_pool:3 * n_pool],
                                    acc[3 * n_pool:4 * n_pool]))
        return jnp.maximum(m + b_ref[...], 0.0).astype(bf16)

    h = conv_relu_pool(h, g2_ref, w2_ref, b2_ref)                # (B*16, 64)
    h = conv_relu_pool(h, g3_ref, w3_ref, b3_ref)                # (B*4, 128)

    # ---- flatten (NCHW order folded into fc1 weights) + fc1 + ReLU ---------
    hf = None
    for p in range(4):                      # p = spatial position of 2x2 grid
        rows = jnp.dot(sel_ref[p], h, preferred_element_type=f32).astype(bf16)
        t = jnp.dot(rows, wfc1_ref[p], preferred_element_type=f32)
        hf = t if hf is None else hf + t
    hf = jnp.maximum(hf + bfc1_ref[...], 0.0).astype(bf16)       # (Bp, 2*H)
    # TODO(synk): nn.Dropout(0.25) is identity in inference mode; omitted.

    # ---- fc2 heads, reparameterization, KL (f32 epilogue) ------------------
    mu = jnp.dot(hf, wmu_ref[...], preferred_element_type=f32) + bmu_ref[...]
    logsig = jnp.dot(hf, wls_ref[...], preferred_element_type=f32) + bls_ref[...]
    sigma = jnp.exp(logsig)                                      # sigma = exp(cnn2(x))
    z_ref[...] = mu + sigma * eps_ref[...]
    row = lax.broadcasted_iota(jnp.int32, mu.shape, 0)
    col = lax.broadcasted_iota(jnp.int32, mu.shape, 1)
    mask = (row < batch) & (col < latent)
    kl = jnp.where(mask, sigma * sigma + mu * mu - logsig - 0.5, 0.0)
    kl_ref[0, 0] = jnp.sum(kl)


# ---------------------------------------------------------------------------
# Glue: im2col for conv1 only (pool-window-major row ordering, K unpadded)
# ---------------------------------------------------------------------------
def _im2col_pooled(x, k, stride, pad):
    # x: (NB, H, W, C) NHWC -> cols: (4, NB*OHp*OWp, C*k*k)
    # Row order (pool_slot, nb, ohp, owp); column order (Cin, kh, kw) matches
    # the PyTorch weight flatten w.reshape(Cout, Cin*k*k).
    if pad:
        x = jnp.pad(x, ((0, 0), (pad, pad), (pad, pad), (0, 0)))
    NB, H, W, C = x.shape
    OH = (H - k) // stride + 1
    OW = (W - k) // stride + 1
    OHp, OWp = OH // 2, OW // 2          # MaxPool2d(2,2) floor behavior
    patches = []
    for ki in range(k):
        for kj in range(k):
            patches.append(
                x[:, ki: ki + (2 * OHp - 1) * stride + 1: stride,
                     kj: kj + (2 * OWp - 1) * stride + 1: stride, :])
    p = jnp.stack(patches, axis=3)                       # (NB, 2OHp, 2OWp, k*k, C)
    p = jnp.transpose(p, (0, 1, 2, 4, 3))                # (NB, 2OHp, 2OWp, C, k*k)
    p = p.reshape(NB, OHp, 2, OWp, 2, C * k * k)
    p = jnp.transpose(p, (2, 4, 0, 1, 3, 5))             # (py, px, NB, OHp, OWp, CK)
    return p.reshape(4, NB * OHp * OWp, C * k * k), OHp, OWp


# ---------------------------------------------------------------------------
# One-time packing: gather matrices + branch-fused weights
# ---------------------------------------------------------------------------
def _gather_matrix(batch, s_in, pooled):
    # One-hot matrices that turn "gather im2col rows for a 3x3, pad=1, stride=1
    # conv followed by 2x2 max-pool" into 9 matmuls.  Shape (9, 4*Npool, Nin).
    n_pool = batch * pooled * pooled
    n_in = batch * s_in * s_in
    g = np.zeros((9, 4 * n_pool, n_in), np.float32)
    for ki in range(3):
        for kj in range(3):
            k = ki * 3 + kj
            for dy in range(2):
                for dx in range(2):
                    s = dy * 2 + dx
                    for b in range(batch):
                        for py in range(pooled):
                            for px in range(pooled):
                                r = (s * n_pool + b * pooled * pooled
                                     + py * pooled + px)
                                y = 2 * py + dy + ki - 1
                                x = 2 * px + dx + kj - 1
                                if 0 <= y < s_in and 0 <= x < s_in:
                                    g[k, r, b * s_in * s_in + y * s_in + x] = 1.0
    return g


def pack_params(params, batch):
    """One-time preprocessing: branch-fused (block-diagonal) weights plus the
    constant gather/selection matrices.  `batch` is baked into the gathers."""
    p1, p2 = params["cnn1"], params["cnn2"]
    f32, bf16 = jnp.float32, jnp.bfloat16
    latent = int(p1["fc2_b"].shape[0])
    hidden = int(p1["fc1_b"].shape[0])
    assert latent <= 128 and hidden <= 128
    bp = _round_up(batch, 8)                 # padded batch rows for the head

    # conv1: shared input, so simply concatenate output channels -> (9, 32).
    w1 = jnp.concatenate([p1["conv1_w"].astype(f32).reshape(16, 9).T,
                          p2["conv1_w"].astype(f32).reshape(16, 9).T],
                         axis=1).astype(bf16)
    b1 = jnp.concatenate([p1["conv1_b"], p2["conv1_b"]]).reshape(1, 32).astype(f32)

    def conv_w_fused(name, cin, cout):
        w = jnp.zeros((9, 2 * cin, 2 * cout), f32)
        for bi, pp in enumerate((p1, p2)):
            wk = jnp.transpose(pp[name].astype(f32).reshape(cout, cin, 9),
                               (2, 1, 0))                    # (9, cin, cout)
            w = w.at[:, bi * cin:(bi + 1) * cin,
                     bi * cout:(bi + 1) * cout].set(wk)
        return w.astype(bf16)

    w2 = conv_w_fused("conv2_w", 16, 32)                     # (9, 32, 64)
    b2 = jnp.concatenate([p1["conv2_b"], p2["conv2_b"]]).reshape(1, 64).astype(f32)
    w3 = conv_w_fused("conv3_w", 32, 64)                     # (9, 64, 128)
    b3 = jnp.concatenate([p1["conv3_b"], p2["conv3_b"]]).reshape(1, 128).astype(f32)

    # fc1: the PyTorch flatten index is c*4 + h*2 + w, so build one block-
    # diagonal (128, 2*hidden) weight per spatial position p = h*2 + w.
    wfc1 = jnp.zeros((4, 128, 2 * hidden), f32)
    for bi, pp in enumerate((p1, p2)):
        wb = pp["fc1_w"].astype(f32).reshape(64, 4, hidden)  # [c, p, j]
        wb = jnp.transpose(wb, (1, 0, 2))                    # (4, 64, hidden)
        wfc1 = wfc1.at[:, bi * 64:(bi + 1) * 64,
                       bi * hidden:(bi + 1) * hidden].set(wb)
    wfc1 = wfc1.astype(bf16)
    bfc1 = jnp.concatenate([p1["fc1_b"], p2["fc1_b"]]).reshape(1, 2 * hidden).astype(f32)

    # fc2 heads: mu reads branch-0 hidden units, logsigma reads branch-1.
    wmu = jnp.zeros((2 * hidden, 128), f32).at[:hidden, :latent].set(
        p1["fc2_w"].astype(f32)).astype(bf16)
    wls = jnp.zeros((2 * hidden, 128), f32).at[hidden:, :latent].set(
        p2["fc2_w"].astype(f32)).astype(bf16)
    bmu = jnp.zeros((1, 128), f32).at[0, :latent].set(p1["fc2_b"].astype(f32))
    bls = jnp.zeros((1, 128), f32).at[0, :latent].set(p2["fc2_b"].astype(f32))

    # Gather matrices for conv2 (8x8 -> pooled 4x4) and conv3 (4x4 -> 2x2).
    g2 = jnp.asarray(_gather_matrix(batch, 8, 4), dtype=bf16)   # (9, 128, 128)
    g3 = jnp.asarray(_gather_matrix(batch, 4, 2), dtype=bf16)   # (9, 32, 32)

    # Row selector for the flatten: sel[p, b, b*4 + p] = 1 (padded batch rows).
    sel = np.zeros((4, bp, 4 * batch), np.float32)
    for p in range(4):
        for b in range(batch):
            sel[p, b, b * 4 + p] = 1.0
    sel = jnp.asarray(sel, dtype=bf16)

    return dict(w1=w1, b1=b1, g2=g2, w2=w2, b2=b2, g3=g3, w3=w3, b3=b3,
                sel=sel, wfc1=wfc1, bfc1=bfc1,
                wmu=wmu, bmu=bmu, wls=wls, bls=bls)


# ---------------------------------------------------------------------------
# Forward pass (one pallas_call)
# ---------------------------------------------------------------------------
def variational_encoder_forward(packed, x_nchw, eps):
    # x_nchw: (B, 1, 36, 36) like the PyTorch module; eps ~ N(0,1): (B, latent).
    B = x_nchw.shape[0]
    latent = eps.shape[1]
    bp = packed["sel"].shape[1]
    assert packed["g2"].shape[2] == B * 64, "packed params built for another batch"

    x = jnp.transpose(x_nchw, (0, 2, 3, 1)).astype(jnp.float32)   # NCHW -> NHWC
    cols1, _, _ = _im2col_pooled(x, 3, 2, 0)                      # (4, B*64, 9)
    cols1 = cols1.astype(jnp.bfloat16)                            # K=9, unpadded

    eps_p = jnp.pad(eps.astype(jnp.float32), ((0, bp - B), (0, 128 - latent)))

    operands = (cols1, packed["w1"], packed["b1"],
                packed["g2"], packed["w2"], packed["b2"],
                packed["g3"], packed["w3"], packed["b3"],
                packed["sel"], packed["wfc1"], packed["bfc1"],
                packed["wmu"], packed["bmu"], packed["wls"], packed["bls"],
                eps_p)

    kernel = functools.partial(_fused_encoder_kernel, batch=B, latent=latent)
    z_p, kl = pl.pallas_call(
        kernel,
        out_shape=(jax.ShapeDtypeStruct((bp, 128), jnp.float32),
                   jax.ShapeDtypeStruct((1, 1), jnp.float32)),
        in_specs=[_full_spec(op.shape) for op in operands],
        out_specs=(_full_spec((bp, 128)),
                   pl.BlockSpec(memory_space=pltpu.MemorySpace.SMEM)),
    )(*operands)
    return z_p[:B, :latent], kl


# ---------------------------------------------------------------------------
# Parameter init (matches the PyTorch module's shapes)
# ---------------------------------------------------------------------------
def init_cencoder_params(key, latent_dims):
    keys = jax.random.split(key, 10)

    def w(k, shape, fan_in):
        return jax.random.normal(k, shape, jnp.float32) / jnp.sqrt(float(fan_in))

    p = {}
    p["conv1_w"] = w(keys[0], (16, 1, 3, 3), 1 * 9)
    p["conv1_b"] = w(keys[1], (16,), 1 * 9)
    p["conv2_w"] = w(keys[2], (32, 16, 3, 3), 16 * 9)
    p["conv2_b"] = w(keys[3], (32,), 16 * 9)
    p["conv3_w"] = w(keys[4], (64, 32, 3, 3), 32 * 9)
    p["conv3_b"] = w(keys[5], (64,), 32 * 9)
    # FC weights stored pre-transposed as (in, out).
    p["fc1_w"] = w(keys[6], (64 * 2 * 2, 100), 64 * 2 * 2)
    p["fc1_b"] = w(keys[7], (100,), 64 * 2 * 2)
    p["fc2_w"] = w(keys[8], (100, latent_dims), 100)
    p["fc2_b"] = w(keys[9], (latent_dims,), 100)
    return p


if __name__ == "__main__":
    latent_dims = 8
    key = jax.random.PRNGKey(0)
    k_x, k_eps, k_p1, k_p2 = jax.random.split(key, 4)

    # Spatial 36: conv1(s2, no pad) -> 17, pool -> 8, conv2(pad1) -> 8, pool -> 4,
    # conv3(pad1) -> 4, pool -> 2  ==> 64*2*2 flatten, as fc1 expects.
    x = jax.random.normal(k_x, (2, 1, 36, 36), jnp.float32)        # NCHW input
    eps = jax.random.normal(k_eps, (2, latent_dims), jnp.float32)  # N.sample(mu.shape)

    params = {
        "cnn1": init_cencoder_params(k_p1, latent_dims),
        "cnn2": init_cencoder_params(k_p2, latent_dims),
    }
    packed = pack_params(params, batch=x.shape[0])   # one-time weight/gather packing

    fwd = jax.jit(variational_encoder_forward)
    z, kl = fwd(packed, x, eps)
    jax.block_until_ready((z, kl))
    assert z.shape == (2, latent_dims)
    assert kl.shape == (1, 1)
    print("KERNEL_OK")
</pallas_src>

<mosaic_0001>
module attributes {stable_mosaic.version = 11 : i64} {
  func.func @_fused_encoder_kernel(%arg0: memref<4x128x9xbf16, #tpu.memory_space<vmem>>, %arg1: memref<9x32xbf16, #tpu.memory_space<vmem>>, %arg2: memref<1x32xf32, #tpu.memory_space<vmem>>, %arg3: memref<9x128x128xbf16, #tpu.memory_space<vmem>>, %arg4: memref<9x32x64xbf16, #tpu.memory_space<vmem>>, %arg5: memref<1x64xf32, #tpu.memory_space<vmem>>, %arg6: memref<9x32x32xbf16, #tpu.memory_space<vmem>>, %arg7: memref<9x64x128xbf16, #tpu.memory_space<vmem>>, %arg8: memref<1x128xf32, #tpu.memory_space<vmem>>, %arg9: memref<4x8x8xbf16, #tpu.memory_space<vmem>>, %arg10: memref<4x128x200xbf16, #tpu.memory_space<vmem>>, %arg11: memref<1x200xf32, #tpu.memory_space<vmem>>, %arg12: memref<200x128xbf16, #tpu.memory_space<vmem>>, %arg13: memref<1x128xf32, #tpu.memory_space<vmem>>, %arg14: memref<200x128xbf16, #tpu.memory_space<vmem>>, %arg15: memref<1x128xf32, #tpu.memory_space<vmem>>, %arg16: memref<8x128xf32, #tpu.memory_space<vmem>>, %arg17: memref<8x128xf32, #tpu.memory_space<vmem>>, %arg18: memref<1x1xf32, #tpu.memory_space<smem>>) attributes {dimension_semantics = [], scalar_prefetch = 0 : i64, scratch_operands = 0 : i64, tpu.core_type = #tpu.core_type<tc>} {
    %c0 = arith.constant 0 : index
    %c0_0 = arith.constant 0 : index
    %0 = vector.load %arg1[%c0, %c0_0] : memref<9x32xbf16, #tpu.memory_space<vmem>>, vector<9x32xbf16>
    %c0_1 = arith.constant 0 : index
    %c0_2 = arith.constant 0 : index
    %c0_3 = arith.constant 0 : index
    %1 = vector.load %arg0[%c0_1, %c0_2, %c0_3] : memref<4x128x9xbf16, #tpu.memory_space<vmem>>, vector<1x128x9xbf16>
    %2 = vector.shape_cast %1 : vector<1x128x9xbf16> to vector<128x9xbf16>
    %cst = arith.constant dense<0.000000e+00> : vector<128x32xf32>
    %3 = tpu.matmul %2, %0, %cst {dimension_numbers = #tpu.dot_dimension_numbers<[1], [0], [0], [1], [0, 0, 1, 1], [], []>} : vector<128x9xbf16>, vector<9x32xbf16>, vector<128x32xf32> -> vector<128x32xf32>
    %c1 = arith.constant 1 : index
    %c0_4 = arith.constant 0 : index
    %c0_5 = arith.constant 0 : index
    %4 = vector.load %arg0[%c1, %c0_4, %c0_5] : memref<4x128x9xbf16, #tpu.memory_space<vmem>>, vector<1x128x9xbf16>
    %5 = vector.shape_cast %4 : vector<1x128x9xbf16> to vector<128x9xbf16>
    %cst_6 = arith.constant dense<0.000000e+00> : vector<128x32xf32>
    %6 = tpu.matmul %5, %0, %cst_6 {dimension_numbers = #tpu.dot_dimension_numbers<[1], [0], [0], [1], [0, 0, 1, 1], [], []>} : vector<128x9xbf16>, vector<9x32xbf16>, vector<128x32xf32> -> vector<128x32xf32>
    %7 = arith.maximumf %3, %6 : vector<128x32xf32>
    %c2 = arith.constant 2 : index
    %c0_7 = arith.constant 0 : index
    %c0_8 = arith.constant 0 : index
    %8 = vector.load %arg0[%c2, %c0_7, %c0_8] : memref<4x128x9xbf16, #tpu.memory_space<vmem>>, vector<1x128x9xbf16>
    %9 = vector.shape_cast %8 : vector<1x128x9xbf16> to vector<128x9xbf16>
    %cst_9 = arith.constant dense<0.000000e+00> : vector<128x32xf32>
    %10 = tpu.matmul %9, %0, %cst_9 {dimension_numbers = #tpu.dot_dimension_numbers<[1], [0], [0], [1], [0, 0, 1, 1], [], []>} : vector<128x9xbf16>, vector<9x32xbf16>, vector<128x32xf32> -> vector<128x32xf32>
    %11 = arith.maximumf %7, %10 : vector<128x32xf32>
    %c3 = arith.constant 3 : index
    %c0_10 = arith.constant 0 : index
    %c0_11 = arith.constant 0 : index
    %12 = vector.load %arg0[%c3, %c0_10, %c0_11] : memref<4x128x9xbf16, #tpu.memory_space<vmem>>, vector<1x128x9xbf16>
    %13 = vector.shape_cast %12 : vector<1x128x9xbf16> to vector<128x9xbf16>
    %cst_12 = arith.constant dense<0.000000e+00> : vector<128x32xf32>
    %14 = tpu.matmul %13, %0, %cst_12 {dimension_numbers = #tpu.dot_dimension_numbers<[1], [0], [0], [1], [0, 0, 1, 1], [], []>} : vector<128x9xbf16>, vector<9x32xbf16>, vector<128x32xf32> -> vector<128x32xf32>
    %15 = arith.maximumf %11, %14 : vector<128x32xf32>
    %c0_13 = arith.constant 0 : index
    %c0_14 = arith.constant 0 : index
    %16 = vector.load %arg2[%c0_13, %c0_14] : memref<1x32xf32, #tpu.memory_space<vmem>>, vector<1x32xf32>
    %17 = vector.broadcast %16 : vector<1x32xf32> to vector<128x32xf32>
    %18 = arith.addf %15, %17 : vector<128x32xf32>
    %cst_15 = arith.constant 0.000000e+00 : f32
    %19 = vector.broadcast %cst_15 : f32 to vector<128x32xf32>
    %20 = arith.maximumf %18, %19 : vector<128x32xf32>
    %21 = arith.truncf %20 : vector<128x32xf32> to vector<128x32xbf16>
    %c0_16 = arith.constant 0 : index
    %c0_17 = arith.constant 0 : index
    %c0_18 = arith.constant 0 : index
    %22 = vector.load %arg3[%c0_16, %c0_17, %c0_18] : memref<9x128x128xbf16, #tpu.memory_space<vmem>>, vector<1x128x128xbf16>
    %23 = vector.shape_cast %22 : vector<1x128x128xbf16> to vector<128x128xbf16>
    %cst_19 = arith.constant dense<0.000000e+00> : vector<128x32xf32>
    %24 = tpu.matmul %23, %21, %cst_19 {dimension_numbers = #tpu.dot_dimension_numbers<[1], [0], [0], [1], [0, 0, 1, 1], [], []>} : vector<128x128xbf16>, vector<128x32xbf16>, vector<128x32xf32> -> vector<128x32xf32>
    %25 = arith.truncf %24 : vector<128x32xf32> to vector<128x32xbf16>
    %c0_20 = arith.constant 0 : index
    %c0_21 = arith.constant 0 : index
    %c0_22 = arith.constant 0 : index
    %26 = vector.load %arg4[%c0_20, %c0_21, %c0_22] : memref<9x32x64xbf16, #tpu.memory_space<vmem>>, vector<1x32x64xbf16>
    %27 = vector.shape_cast %26 : vector<1x32x64xbf16> to vector<32x64xbf16>
    %cst_23 = arith.constant dense<0.000000e+00> : vector<128x64xf32>
    %28 = tpu.matmul %25, %27, %cst_23 {dimension_numbers = #tpu.dot_dimension_numbers<[1], [0], [0], [1], [0, 0, 1, 1], [], []>} : vector<128x32xbf16>, vector<32x64xbf16>, vector<128x64xf32> -> vector<128x64xf32>
    %c1_24 = arith.constant 1 : index
    %c0_25 = arith.constant 0 : index
    %c0_26 = arith.constant 0 : index
    %29 = vector.load %arg3[%c1_24, %c0_25, %c0_26] : memref<9x128x128xbf16, #tpu.memory_space<vmem>>, vector<1x128x128xbf16>
    %30 = vector.shape_cast %29 : vector<1x128x128xbf16> to vector<128x128xbf16>
    %cst_27 = arith.constant dense<0.000000e+00> : vector<128x32xf32>
    %31 = tpu.matmul %30, %21, %cst_27 {dimension_numbers = #tpu.dot_dimension_numbers<[1], [0], [0], [1], [0, 0, 1, 1], [], []>} : vector<128x128xbf16>, vector<128x32xbf16>, vector<128x32xf32> -> vector<128x32xf32>
    %32 = arith.truncf %31 : vector<128x32xf32> to vector<128x32xbf16>
    %c1_28 = arith.constant 1 : index
    %c0_29 = arith.constant 0 : index
    %c0_30 = arith.constant 0 : index
    %33 = vector.load %arg4[%c1_28, %c0_29, %c0_30] : memref<9x32x64xbf16, #tpu.memory_space<vmem>>, vector<1x32x64xbf16>
    %34 = vector.shape_cast %33 : vector<1x32x64xbf16> to vector<32x64xbf16>
    %cst_31 = arith.constant dense<0.000000e+00> : vector<128x64xf32>
    %35 = tpu.matmul %32, %34, %cst_31 {dimension_numbers = #tpu.dot_dimension_numbers<[1], [0], [0], [1], [0, 0, 1, 1], [], []>} : vector<128x32xbf16>, vector<32x64xbf16>, vector<128x64xf32> -> vector<128x64xf32>
    %36 = arith.addf %28, %35 : vector<128x64xf32>
    %c2_32 = arith.constant 2 : index
    %c0_33 = arith.constant 0 : index
    %c0_34 = arith.constant 0 : index
    %37 = vector.load %arg3[%c2_32, %c0_33, %c0_34] : memref<9x128x128xbf16, #tpu.memory_space<vmem>>, vector<1x128x128xbf16>
    %38 = vector.shape_cast %37 : vector<1x128x128xbf16> to vector<128x128xbf16>
    %cst_35 = arith.constant dense<0.000000e+00> : vector<128x32xf32>
    %39 = tpu.matmul %38, %21, %cst_35 {dimension_numbers = #tpu.dot_dimension_numbers<[1], [0], [0], [1], [0, 0, 1, 1], [], []>} : vector<128x128xbf16>, vector<128x32xbf16>, vector<128x32xf32> -> vector<128x32xf32>
    %40 = arith.truncf %39 : vector<128x32xf32> to vector<128x32xbf16>
    %c2_36 = arith.constant 2 : index
    %c0_37 = arith.constant 0 : index
    %c0_38 = arith.constant 0 : index
    %41 = vector.load %arg4[%c2_36, %c0_37, %c0_38] : memref<9x32x64xbf16, #tpu.memory_space<vmem>>, vector<1x32x64xbf16>
    %42 = vector.shape_cast %41 : vector<1x32x64xbf16> to vector<32x64xbf16>
    %cst_39 = arith.constant dense<0.000000e+00> : vector<128x64xf32>
    %43 = tpu.matmul %40, %42, %cst_39 {dimension_numbers = #tpu.dot_dimension_numbers<[1], [0], [0], [1], [0, 0, 1, 1], [], []>} : vector<128x32xbf16>, vector<32x64xbf16>, vector<128x64xf32> -> vector<128x64xf32>
    %44 = arith.addf %36, %43 : vector<128x64xf32>
    %c3_40 = arith.constant 3 : index
    %c0_41 = arith.constant 0 : index
    %c0_42 = arith.constant 0 : index
    %45 = vector.load %arg3[%c3_40, %c0_41, %c0_42] : memref<9x128x128xbf16, #tpu.memory_space<vmem>>, vector<1x128x128xbf16>
    %46 = vector.shape_cast %45 : vector<1x128x128xbf16> to vector<128x128xbf16>
    %cst_43 = arith.constant dense<0.000000e+00> : vector<128x32xf32>
    %47 = tpu.matmul %46, %21, %cst_43 {dimension_numbers = #tpu.dot_dimension_numbers<[1], [0], [0], [1], [0, 0, 1, 1], [], []>} : vector<128x128xbf16>, vector<128x32xbf16>, vector<128x32xf32> -> vector<128x32xf32>
    %48 = arith.truncf %47 : vector<128x32xf32> to vector<128x32xbf16>
    %c3_44 = arith.constant 3 : index
    %c0_45 = arith.constant 0 : index
    %c0_46 = arith.constant 0 : index
    %49 = vector.load %arg4[%c3_44, %c0_45, %c0_46] : memref<9x32x64xbf16, #tpu.memory_space<vmem>>, vector<1x32x64xbf16>
    %50 = vector.shape_cast %49 : vector<1x32x64xbf16> to vector<32x64xbf16>
    %cst_47 = arith.constant dense<0.000000e+00> : vector<128x64xf32>
    %51 = tpu.matmul %48, %50, %cst_47 {dimension_numbers = #tpu.dot_dimension_numbers<[1], [0], [0], [1], [0, 0, 1, 1], [], []>} : vector<128x32xbf16>, vector<32x64xbf16>, vector<128x64xf32> -> vector<128x64xf32>
    %52 = arith.addf %44, %51 : vector<128x64xf32>
    %c4 = arith.constant 4 : index
    %c0_48 = arith.constant 0 : index
    %c0_49 = arith.constant 0 : index
    %53 = vector.load %arg3[%c4, %c0_48, %c0_49] : memref<9x128x128xbf16, #tpu.memory_space<vmem>>, vector<1x128x128xbf16>
    %54 = vector.shape_cast %53 : vector<1x128x128xbf16> to vector<128x128xbf16>
    %cst_50 = arith.constant dense<0.000000e+00> : vector<128x32xf32>
    %55 = tpu.matmul %54, %21, %cst_50 {dimension_numbers = #tpu.dot_dimension_numbers<[1], [0], [0], [1], [0, 0, 1, 1], [], []>} : vector<128x128xbf16>, vector<128x32xbf16>, vector<128x32xf32> -> vector<128x32xf32>
    %56 = arith.truncf %55 : vector<128x32xf32> to vector<128x32xbf16>
    %c4_51 = arith.constant 4 : index
    %c0_52 = arith.constant 0 : index
    %c0_53 = arith.constant 0 : index
    %57 = vector.load %arg4[%c4_51, %c0_52, %c0_53] : memref<9x32x64xbf16, #tpu.memory_space<vmem>>, vector<1x32x64xbf16>
    %58 = vector.shape_cast %57 : vector<1x32x64xbf16> to vector<32x64xbf16>
    %cst_54 = arith.constant dense<0.000000e+00> : vector<128x64xf32>
    %59 = tpu.matmul %56, %58, %cst_54 {dimension_numbers = #tpu.dot_dimension_numbers<[1], [0], [0], [1], [0, 0, 1, 1], [], []>} : vector<128x32xbf16>, vector<32x64xbf16>, vector<128x64xf32> -> vector<128x64xf32>
    %60 = arith.addf %52, %59 : vector<128x64xf32>
    %c5 = arith.constant 5 : index
    %c0_55 = arith.constant 0 : index
    %c0_56 = arith.constant 0 : index
    %61 = vector.load %arg3[%c5, %c0_55, %c0_56] : memref<9x128x128xbf16, #tpu.memory_space<vmem>>, vector<1x128x128xbf16>
    %62 = vector.shape_cast %61 : vector<1x128x128xbf16> to vector<128x128xbf16>
    %cst_57 = arith.constant dense<0.000000e+00> : vector<128x32xf32>
    %63 = tpu.matmul %62, %21, %cst_57 {dimension_numbers = #tpu.dot_dimension_numbers<[1], [0], [0], [1], [0, 0, 1, 1], [], []>} : vector<128x128xbf16>, vector<128x32xbf16>, vector<128x32xf32> -> vector<128x32xf32>
    %64 = arith.truncf %63 : vector<128x32xf32> to vector<128x32xbf16>
    %c5_58 = arith.constant 5 : index
    %c0_59 = arith.constant 0 : index
    %c0_60 = arith.constant 0 : index
    %65 = vector.load %arg4[%c5_58, %c0_59, %c0_60] : memref<9x32x64xbf16, #tpu.memory_space<vmem>>, vector<1x32x64xbf16>
    %66 = vector.shape_cast %65 : vector<1x32x64xbf16> to vector<32x64xbf16>
    %cst_61 = arith.constant dense<0.000000e+00> : vector<128x64xf32>
    %67 = tpu.matmul %64, %66, %cst_61 {dimension_numbers = #tpu.dot_dimension_numbers<[1], [0], [0], [1], [0, 0, 1, 1], [], []>} : vector<128x32xbf16>, vector<32x64xbf16>, vector<128x64xf32> -> vector<128x64xf32>
    %68 = arith.addf %60, %67 : vector<128x64xf32>
    %c6 = arith.constant 6 : index
    %c0_62 = arith.constant 0 : index
    %c0_63 = arith.constant 0 : index
    %69 = vector.load %arg3[%c6, %c0_62, %c0_63] : memref<9x128x128xbf16, #tpu.memory_space<vmem>>, vector<1x128x128xbf16>
    %70 = vector.shape_cast %69 : vector<1x128x128xbf16> to vector<128x128xbf16>
    %cst_64 = arith.constant dense<0.000000e+00> : vector<128x32xf32>
    %71 = tpu.matmul %70, %21, %cst_64 {dimension_numbers = #tpu.dot_dimension_numbers<[1], [0], [0], [1], [0, 0, 1, 1], [], []>} : vector<128x128xbf16>, vector<128x32xbf16>, vector<128x32xf32> -> vector<128x32xf32>
    %72 = arith.truncf %71 : vector<128x32xf32> to vector<128x32xbf16>
    %c6_65 = arith.constant 6 : index
    %c0_66 = arith.constant 0 : index
    %c0_67 = arith.constant 0 : index
    %73 = vector.load %arg4[%c6_65, %c0_66, %c0_67] : memref<9x32x64xbf16, #tpu.memory_space<vmem>>, vector<1x32x64xbf16>
    %74 = vector.shape_cast %73 : vector<1x32x64xbf16> to vector<32x64xbf16>
    %cst_68 = arith.constant dense<0.000000e+00> : vector<128x64xf32>
    %75 = tpu.matmul %72, %74, %cst_68 {dimension_numbers = #tpu.dot_dimension_numbers<[1], [0], [0], [1], [0, 0, 1, 1], [], []>} : vector<128x32xbf16>, vector<32x64xbf16>, vector<128x64xf32> -> vector<128x64xf32>
    %76 = arith.addf %68, %75 : vector<128x64xf32>
    %c7 = arith.constant 7 : index
    %c0_69 = arith.constant 0 : index
    %c0_70 = arith.constant 0 : index
    %77 = vector.load %arg3[%c7, %c0_69, %c0_70] : memref<9x128x128xbf16, #tpu.memory_space<vmem>>, vector<1x128x128xbf16>
    %78 = vector.shape_cast %77 : vector<1x128x128xbf16> to vector<128x128xbf16>
    %cst_71 = arith.constant dense<0.000000e+00> : vector<128x32xf32>
    %79 = tpu.matmul %78, %21, %cst_71 {dimension_numbers = #tpu.dot_dimension_numbers<[1], [0], [0], [1], [0, 0, 1, 1], [], []>} : vector<128x128xbf16>, vector<128x32xbf16>, vector<128x32xf32> -> vector<128x32xf32>
    %80 = arith.truncf %79 : vector<128x32xf32> to vector<128x32xbf16>
    %c7_72 = arith.constant 7 : index
    %c0_73 = arith.constant 0 : index
    %c0_74 = arith.constant 0 : index
    %81 = vector.load %arg4[%c7_72, %c0_73, %c0_74] : memref<9x32x64xbf16, #tpu.memory_space<vmem>>, vector<1x32x64xbf16>
    %82 = vector.shape_cast %81 : vector<1x32x64xbf16> to vector<32x64xbf16>
    %cst_75 = arith.constant dense<0.000000e+00> : vector<128x64xf32>
    %83 = tpu.matmul %80, %82, %cst_75 {dimension_numbers = #tpu.dot_dimension_numbers<[1], [0], [0], [1], [0, 0, 1, 1], [], []>} : vector<128x32xbf16>, vector<32x64xbf16>, vector<128x64xf32> -> vector<128x64xf32>
    %84 = arith.addf %76, %83 : vector<128x64xf32>
    %c8 = arith.constant 8 : index
    %c0_76 = arith.constant 0 : index
    %c0_77 = arith.constant 0 : index
    %85 = vector.load %arg3[%c8, %c0_76, %c0_77] : memref<9x128x128xbf16, #tpu.memory_space<vmem>>, vector<1x128x128xbf16>
    %86 = vector.shape_cast %85 : vector<1x128x128xbf16> to vector<128x128xbf16>
    %cst_78 = arith.constant dense<0.000000e+00> : vector<128x32xf32>
    %87 = tpu.matmul %86, %21, %cst_78 {dimension_numbers = #tpu.dot_dimension_numbers<[1], [0], [0], [1], [0, 0, 1, 1], [], []>} : vector<128x128xbf16>, vector<128x32xbf16>, vector<128x32xf32> -> vector<128x32xf32>
    %88 = arith.truncf %87 : vector<128x32xf32> to vector<128x32xbf16>
    %c8_79 = arith.constant 8 : index
    %c0_80 = arith.constant 0 : index
    %c0_81 = arith.constant 0 : index
    %89 = vector.load %arg4[%c8_79, %c0_80, %c0_81] : memref<9x32x64xbf16, #tpu.memory_space<vmem>>, vector<1x32x64xbf16>
    %90 = vector.shape_cast %89 : vector<1x32x64xbf16> to vector<32x64xbf16>
    %cst_82 = arith.constant dense<0.000000e+00> : vector<128x64xf32>
    %91 = tpu.matmul %88, %90, %cst_82 {dimension_numbers = #tpu.dot_dimension_numbers<[1], [0], [0], [1], [0, 0, 1, 1], [], []>} : vector<128x32xbf16>, vector<32x64xbf16>, vector<128x64xf32> -> vector<128x64xf32>
    %92 = arith.addf %84, %91 : vector<128x64xf32>
    %93 = vector.extract_strided_slice %92 {offsets = [0, 0], sizes = [32, 64], strides = [1, 1]} : vector<128x64xf32> to vector<32x64xf32>
    %94 = vector.extract_strided_slice %92 {offsets = [32, 0], sizes = [32, 64], strides = [1, 1]} : vector<128x64xf32> to vector<32x64xf32>
    %95 = arith.maximumf %93, %94 : vector<32x64xf32>
    %96 = vector.extract_strided_slice %92 {offsets = [64, 0], sizes = [32, 64], strides = [1, 1]} : vector<128x64xf32> to vector<32x64xf32>
    %97 = vector.extract_strided_slice %92 {offsets = [96, 0], sizes = [32, 64], strides = [1, 1]} : vector<128x64xf32> to vector<32x64xf32>
    %98 = arith.maximumf %96, %97 : vector<32x64xf32>
    %99 = arith.maximumf %95, %98 : vector<32x64xf32>
    %c0_83 = arith.constant 0 : index
    %c0_84 = arith.constant 0 : index
    %100 = vector.load %arg5[%c0_83, %c0_84] : memref<1x64xf32, #tpu.memory_space<vmem>>, vector<1x64xf32>
    %101 = vector.broadcast %100 : vector<1x64xf32> to vector<32x64xf32>
    %102 = arith.addf %99, %101 : vector<32x64xf32>
    %cst_85 = arith.constant 0.000000e+00 : f32
    %103 = vector.broadcast %cst_85 : f32 to vector<32x64xf32>
    %104 = arith.maximumf %102, %103 : vector<32x64xf32>
    %105 = arith.truncf %104 : vector<32x64xf32> to vector<32x64xbf16>
    %c0_86 = arith.constant 0 : index
    %c0_87 = arith.constant 0 : index
    %c0_88 = arith.constant 0 : index
    %106 = vector.load %arg6[%c0_86, %c0_87, %c0_88] : memref<9x32x32xbf16, #tpu.memory_space<vmem>>, vector<1x32x32xbf16>
    %107 = vector.shape_cast %106 : vector<1x32x32xbf16> to vector<32x32xbf16>
    %cst_89 = arith.constant dense<0.000000e+00> : vector<32x64xf32>
    %108 = tpu.matmul %107, %105, %cst_89 {dimension_numbers = #tpu.dot_dimension_numbers<[1], [0], [0], [1], [0, 0, 1, 1], [], []>} : vector<32x32xbf16>, vector<32x64xbf16>, vector<32x64xf32> -> vector<32x64xf32>
    %109 = arith.truncf %108 : vector<32x64xf32> to vector<32x64xbf16>
    %c0_90 = arith.constant 0 : index
    %c0_91 = arith.constant 0 : index
    %c0_92 = arith.constant 0 : index
    %110 = vector.load %arg7[%c0_90, %c0_91, %c0_92] : memref<9x64x128xbf16, #tpu.memory_space<vmem>>, vector<1x64x128xbf16>
    %111 = vector.shape_cast %110 : vector<1x64x128xbf16> to vector<64x128xbf16>
    %cst_93 = arith.constant dense<0.000000e+00> : vector<32x128xf32>
    %112 = tpu.matmul %109, %111, %cst_93 {dimension_numbers = #tpu.dot_dimension_numbers<[1], [0], [0], [1], [0, 0, 1, 1], [], []>} : vector<32x64xbf16>, vector<64x128xbf16>, vector<32x128xf32> -> vector<32x128xf32>
    %c1_94 = arith.constant 1 : index
    %c0_95 = arith.constant 0 : index
    %c0_96 = arith.constant 0 : index
    %113 = vector.load %arg6[%c1_94, %c0_95, %c0_96] : memref<9x32x32xbf16, #tpu.memory_space<vmem>>, vector<1x32x32xbf16>
    %114 = vector.shape_cast %113 : vector<1x32x32xbf16> to vector<32x32xbf16>
    %cst_97 = arith.constant dense<0.000000e+00> : vector<32x64xf32>
    %115 = tpu.matmul %114, %105, %cst_97 {dimension_numbers = #tpu.dot_dimension_numbers<[1], [0], [0], [1], [0, 0, 1, 1], [], []>} : vector<32x32xbf16>, vector<32x64xbf16>, vector<32x64xf32> -> vector<32x64xf32>
    %116 = arith.truncf %115 : vector<32x64xf32> to vector<32x64xbf16>
    %c1_98 = arith.constant 1 : index
    %c0_99 = arith.constant 0 : index
    %c0_100 = arith.constant 0 : index
    %117 = vector.load %arg7[%c1_98, %c0_99, %c0_100] : memref<9x64x128xbf16, #tpu.memory_space<vmem>>, vector<1x64x128xbf16>
    %118 = vector.shape_cast %117 : vector<1x64x128xbf16> to vector<64x128xbf16>
    %cst_101 = arith.constant dense<0.000000e+00> : vector<32x128xf32>
    %119 = tpu.matmul %116, %118, %cst_101 {dimension_numbers = #tpu.dot_dimension_numbers<[1], [0], [0], [1], [0, 0, 1, 1], [], []>} : vector<32x64xbf16>, vector<64x128xbf16>, vector<32x128xf32> -> vector<32x128xf32>
    %120 = arith.addf %112, %119 : vector<32x128xf32>
    %c2_102 = arith.constant 2 : index
    %c0_103 = arith.constant 0 : index
    %c0_104 = arith.constant 0 : index
    %121 = vector.load %arg6[%c2_102, %c0_103, %c0_104] : memref<9x32x32xbf16, #tpu.memory_space<vmem>>, vector<1x32x32xbf16>
    %122 = vector.shape_cast %121 : vector<1x32x32xbf16> to vector<32x32xbf16>
    %cst_105 = arith.constant dense<0.000000e+00> : vector<32x64xf32>
    %123 = tpu.matmul %122, %105, %cst_105 {dimension_numbers = #tpu.dot_dimension_numbers<[1], [0], [0], [1], [0, 0, 1, 1], [], []>} : vector<32x32xbf16>, vector<32x64xbf16>, vector<32x64xf32> -> vector<32x64xf32>
    %124 = arith.truncf %123 : vector<32x64xf32> to vector<32x64xbf16>
    %c2_106 = arith.constant 2 : index
    %c0_107 = arith.constant 0 : index
    %c0_108 = arith.constant 0 : index
    %125 = vector.load %arg7[%c2_106, %c0_107, %c0_108] : memref<9x64x128xbf16, #tpu.memory_space<vmem>>, vector<1x64x128xbf16>
    %126 = vector.shape_cast %125 : vector<1x64x128xbf16> to vector<64x128xbf16>
    %cst_109 = arith.constant dense<0.000000e+00> : vector<32x128xf32>
    %127 = tpu.matmul %124, %126, %cst_109 {dimension_numbers = #tpu.dot_dimension_numbers<[1], [0], [0], [1], [0, 0, 1, 1], [], []>} : vector<32x64xbf16>, vector<64x128xbf16>, vector<32x128xf32> -> vector<32x128xf32>
    %128 = arith.addf %120, %127 : vector<32x128xf32>
    %c3_110 = arith.constant 3 : index
    %c0_111 = arith.constant 0 : index
    %c0_112 = arith.constant 0 : index
    %129 = vector.load %arg6[%c3_110, %c0_111, %c0_112] : memref<9x32x32xbf16, #tpu.memory_space<vmem>>, vector<1x32x32xbf16>
    %130 = vector.shape_cast %129 : vector<1x32x32xbf16> to vector<32x32xbf16>
    %cst_113 = arith.constant dense<0.000000e+00> : vector<32x64xf32>
    %131 = tpu.matmul %130, %105, %cst_113 {dimension_numbers = #tpu.dot_dimension_numbers<[1], [0], [0], [1], [0, 0, 1, 1], [], []>} : vector<32x32xbf16>, vector<32x64xbf16>, vector<32x64xf32> -> vector<32x64xf32>
    %132 = arith.truncf %131 : vector<32x64xf32> to vector<32x64xbf16>
    %c3_114 = arith.constant 3 : index
    %c0_115 = arith.constant 0 : index
    %c0_116 = arith.constant 0 : index
    %133 = vector.load %arg7[%c3_114, %c0_115, %c0_116] : memref<9x64x128xbf16, #tpu.memory_space<vmem>>, vector<1x64x128xbf16>
    %134 = vector.shape_cast %133 : vector<1x64x128xbf16> to vector<64x128xbf16>
    %cst_117 = arith.constant dense<0.000000e+00> : vector<32x128xf32>
    %135 = tpu.matmul %132, %134, %cst_117 {dimension_numbers = #tpu.dot_dimension_numbers<[1], [0], [0], [1], [0, 0, 1, 1], [], []>} : vector<32x64xbf16>, vector<64x128xbf16>, vector<32x128xf32> -> vector<32x128xf32>
    %136 = arith.addf %128, %135 : vector<32x128xf32>
    %c4_118 = arith.constant 4 : index
    %c0_119 = arith.constant 0 : index
    %c0_120 = arith.constant 0 : index
    %137 = vector.load %arg6[%c4_118, %c0_119, %c0_120] : memref<9x32x32xbf16, #tpu.memory_space<vmem>>, vector<1x32x32xbf16>
    %138 = vector.shape_cast %137 : vector<1x32x32xbf16> to vector<32x32xbf16>
    %cst_121 = arith.constant dense<0.000000e+00> : vector<32x64xf32>
    %139 = tpu.matmul %138, %105, %cst_121 {dimension_numbers = #tpu.dot_dimension_numbers<[1], [0], [0], [1], [0, 0, 1, 1], [], []>} : vector<32x32xbf16>, vector<32x64xbf16>, vector<32x64xf32> -> vector<32x64xf32>
    %140 = arith.truncf %139 : vector<32x64xf32> to vector<32x64xbf16>
    %c4_122 = arith.constant 4 : index
    %c0_123 = arith.constant 0 : index
    %c0_124 = arith.constant 0 : index
    %141 = vector.load %arg7[%c4_122, %c0_123, %c0_124] : memref<9x64x128xbf16, #tpu.memory_space<vmem>>, vector<1x64x128xbf16>
    %142 = vector.shape_cast %141 : vector<1x64x128xbf16> to vector<64x128xbf16>
    %cst_125 = arith.constant dense<0.000000e+00> : vector<32x128xf32>
    %143 = tpu.matmul %140, %142, %cst_125 {dimension_numbers = #tpu.dot_dimension_numbers<[1], [0], [0], [1], [0, 0, 1, 1], [], []>} : vector<32x64xbf16>, vector<64x128xbf16>, vector<32x128xf32> -> vector<32x128xf32>
    %144 = arith.addf %136, %143 : vector<32x128xf32>
    %c5_126 = arith.constant 5 : index
    %c0_127 = arith.constant 0 : index
    %c0_128 = arith.constant 0 : index
    %145 = vector.load %arg6[%c5_126, %c0_127, %c0_128] : memref<9x32x32xbf16, #tpu.memory_space<vmem>>, vector<1x32x32xbf16>
    %146 = vector.shape_cast %145 : vector<1x32x32xbf16> to vector<32x32xbf16>
    %cst_129 = arith.constant dense<0.000000e+00> : vector<32x64xf32>
    %147 = tpu.matmul %146, %105, %cst_129 {dimension_numbers = #tpu.dot_dimension_numbers<[1], [0], [0], [1], [0, 0, 1, 1], [], []>} : vector<32x32xbf16>, vector<32x64xbf16>, vector<32x64xf32> -> vector<32x64xf32>
    %148 = arith.truncf %147 : vector<32x64xf32> to vector<32x64xbf16>
    %c5_130 = arith.constant 5 : index
    %c0_131 = arith.constant 0 : index
    %c0_132 = arith.constant 0 : index
    %149 = vector.load %arg7[%c5_130, %c0_131, %c0_132] : memref<9x64x128xbf16, #tpu.memory_space<vmem>>, vector<1x64x128xbf16>
    %150 = vector.shape_cast %149 : vector<1x64x128xbf16> to vector<64x128xbf16>
    %cst_133 = arith.constant dense<0.000000e+00> : vector<32x128xf32>
    %151 = tpu.matmul %148, %150, %cst_133 {dimension_numbers = #tpu.dot_dimension_numbers<[1], [0], [0], [1], [0, 0, 1, 1], [], []>} : vector<32x64xbf16>, vector<64x128xbf16>, vector<32x128xf32> -> vector<32x128xf32>
    %152 = arith.addf %144, %151 : vector<32x128xf32>
    %c6_134 = arith.constant 6 : index
    %c0_135 = arith.constant 0 : index
    %c0_136 = arith.constant 0 : index
    %153 = vector.load %arg6[%c6_134, %c0_135, %c0_136] : memref<9x32x32xbf16, #tpu.memory_space<vmem>>, vector<1x32x32xbf16>
    %154 = vector.shape_cast %153 : vector<1x32x32xbf16> to vector<32x32xbf16>
    %cst_137 = arith.constant dense<0.000000e+00> : vector<32x64xf32>
    %155 = tpu.matmul %154, %105, %cst_137 {dimension_numbers = #tpu.dot_dimension_numbers<[1], [0], [0], [1], [0, 0, 1, 1], [], []>} : vector<32x32xbf16>, vector<32x64xbf16>, vector<32x64xf32> -> vector<32x64xf32>
    %156 = arith.truncf %155 : vector<32x64xf32> to vector<32x64xbf16>
    %c6_138 = arith.constant 6 : index
    %c0_139 = arith.constant 0 : index
    %c0_140 = arith.constant 0 : index
    %157 = vector.load %arg7[%c6_138, %c0_139, %c0_140] : memref<9x64x128xbf16, #tpu.memory_space<vmem>>, vector<1x64x128xbf16>
    %158 = vector.shape_cast %157 : vector<1x64x128xbf16> to vector<64x128xbf16>
    %cst_141 = arith.constant dense<0.000000e+00> : vector<32x128xf32>
    %159 = tpu.matmul %156, %158, %cst_141 {dimension_numbers = #tpu.dot_dimension_numbers<[1], [0], [0], [1], [0, 0, 1, 1], [], []>} : vector<32x64xbf16>, vector<64x128xbf16>, vector<32x128xf32> -> vector<32x128xf32>
    %160 = arith.addf %152, %159 : vector<32x128xf32>
    %c7_142 = arith.constant 7 : index
    %c0_143 = arith.constant 0 : index
    %c0_144 = arith.constant 0 : index
    %161 = vector.load %arg6[%c7_142, %c0_143, %c0_144] : memref<9x32x32xbf16, #tpu.memory_space<vmem>>, vector<1x32x32xbf16>
    %162 = vector.shape_cast %161 : vector<1x32x32xbf16> to vector<32x32xbf16>
    %cst_145 = arith.constant dense<0.000000e+00> : vector<32x64xf32>
    %163 = tpu.matmul %162, %105, %cst_145 {dimension_numbers = #tpu.dot_dimension_numbers<[1], [0], [0], [1], [0, 0, 1, 1], [], []>} : vector<32x32xbf16>, vector<32x64xbf16>, vector<32x64xf32> -> vector<32x64xf32>
    %164 = arith.truncf %163 : vector<32x64xf32> to vector<32x64xbf16>
    %c7_146 = arith.constant 7 : index
    %c0_147 = arith.constant 0 : index
    %c0_148 = arith.constant 0 : index
    %165 = vector.load %arg7[%c7_146, %c0_147, %c0_148] : memref<9x64x128xbf16, #tpu.memory_space<vmem>>, vector<1x64x128xbf16>
    %166 = vector.shape_cast %165 : vector<1x64x128xbf16> to vector<64x128xbf16>
    %cst_149 = arith.constant dense<0.000000e+00> : vector<32x128xf32>
    %167 = tpu.matmul %164, %166, %cst_149 {dimension_numbers = #tpu.dot_dimension_numbers<[1], [0], [0], [1], [0, 0, 1, 1], [], []>} : vector<32x64xbf16>, vector<64x128xbf16>, vector<32x128xf32> -> vector<32x128xf32>
    %168 = arith.addf %160, %167 : vector<32x128xf32>
    %c8_150 = arith.constant 8 : index
    %c0_151 = arith.constant 0 : index
    %c0_152 = arith.constant 0 : index
    %169 = vector.load %arg6[%c8_150, %c0_151, %c0_152] : memref<9x32x32xbf16, #tpu.memory_space<vmem>>, vector<1x32x32xbf16>
    %170 = vector.shape_cast %169 : vector<1x32x32xbf16> to vector<32x32xbf16>
    %cst_153 = arith.constant dense<0.000000e+00> : vector<32x64xf32>
    %171 = tpu.matmul %170, %105, %cst_153 {dimension_numbers = #tpu.dot_dimension_numbers<[1], [0], [0], [1], [0, 0, 1, 1], [], []>} : vector<32x32xbf16>, vector<32x64xbf16>, vector<32x64xf32> -> vector<32x64xf32>
    %172 = arith.truncf %171 : vector<32x64xf32> to vector<32x64xbf16>
    %c8_154 = arith.constant 8 : index
    %c0_155 = arith.constant 0 : index
    %c0_156 = arith.constant 0 : index
    %173 = vector.load %arg7[%c8_154, %c0_155, %c0_156] : memref<9x64x128xbf16, #tpu.memory_space<vmem>>, vector<1x64x128xbf16>
    %174 = vector.shape_cast %173 : vector<1x64x128xbf16> to vector<64x128xbf16>
    %cst_157 = arith.constant dense<0.000000e+00> : vector<32x128xf32>
    %175 = tpu.matmul %172, %174, %cst_157 {dimension_numbers = #tpu.dot_dimension_numbers<[1], [0], [0], [1], [0, 0, 1, 1], [], []>} : vector<32x64xbf16>, vector<64x128xbf16>, vector<32x128xf32> -> vector<32x128xf32>
    %176 = arith.addf %168, %175 : vector<32x128xf32>
    %177 = vector.extract_strided_slice %176 {offsets = [0, 0], sizes = [8, 128], strides = [1, 1]} : vector<32x128xf32> to vector<8x128xf32>
    %178 = vector.extract_strided_slice %176 {offsets = [8, 0], sizes = [8, 128], strides = [1, 1]} : vector<32x128xf32> to vector<8x128xf32>
    %179 = arith.maximumf %177, %178 : vector<8x128xf32>
    %180 = vector.extract_strided_slice %176 {offsets = [16, 0], sizes = [8, 128], strides = [1, 1]} : vector<32x128xf32> to vector<8x128xf32>
    %181 = vector.extract_strided_slice %176 {offsets = [24, 0], sizes = [8, 128], strides = [1, 1]} : vector<32x128xf32> to vector<8x128xf32>
    %182 = arith.maximumf %180, %181 : vector<8x128xf32>
    %183 = arith.maximumf %179, %182 : vector<8x128xf32>
    %c0_158 = arith.constant 0 : index
    %c0_159 = arith.constant 0 : index
    %184 = vector.load %arg8[%c0_158, %c0_159] : memref<1x128xf32, #tpu.memory_space<vmem>>, vector<1x128xf32>
    %185 = vector.broadcast %184 : vector<1x128xf32> to vector<8x128xf32>
    %186 = arith.addf %183, %185 : vector<8x128xf32>
    %cst_160 = arith.constant 0.000000e+00 : f32
    %187 = vector.broadcast %cst_160 : f32 to vector<8x128xf32>
    %188 = arith.maximumf %186, %187 : vector<8x128xf32>
    %189 = arith.truncf %188 : vector<8x128xf32> to vector<8x128xbf16>
    %c0_161 = arith.constant 0 : index
    %c0_162 = arith.constant 0 : index
    %c0_163 = arith.constant 0 : index
    %190 = vector.load %arg9[%c0_161, %c0_162, %c0_163] : memref<4x8x8xbf16, #tpu.memory_space<vmem>>, vector<1x8x8xbf16>
    %191 = vector.shape_cast %190 : vector<1x8x8xbf16> to vector<8x8xbf16>
    %cst_164 = arith.constant dense<0.000000e+00> : vector<8x128xf32>
    %192 = tpu.matmul %191, %189, %cst_164 {dimension_numbers = #tpu.dot_dimension_numbers<[1], [0], [0], [1], [0, 0, 1, 1], [], []>} : vector<8x8xbf16>, vector<8x128xbf16>, vector<8x128xf32> -> vector<8x128xf32>
    %193 = arith.truncf %192 : vector<8x128xf32> to vector<8x128xbf16>
    %c0_165 = arith.constant 0 : index
    %c0_166 = arith.constant 0 : index
    %c0_167 = arith.constant 0 : index
    %194 = vector.load %arg10[%c0_165, %c0_166, %c0_167] : memref<4x128x200xbf16, #tpu.memory_space<vmem>>, vector<1x128x200xbf16>
    %195 = vector.shape_cast %194 : vector<1x128x200xbf16> to vector<128x200xbf16>
    %cst_168 = arith.constant dense<0.000000e+00> : vector<8x200xf32>
    %196 = tpu.matmul %193, %195, %cst_168 {dimension_numbers = #tpu.dot_dimension_numbers<[1], [0], [0], [1], [0, 0, 1, 1], [], []>} : vector<8x128xbf16>, vector<128x200xbf16>, vector<8x200xf32> -> vector<8x200xf32>
    %c1_169 = arith.constant 1 : index
    %c0_170 = arith.constant 0 : index
    %c0_171 = arith.constant 0 : index
    %197 = vector.load %arg9[%c1_169, %c0_170, %c0_171] : memref<4x8x8xbf16, #tpu.memory_space<vmem>>, vector<1x8x8xbf16>
    %198 = vector.shape_cast %197 : vector<1x8x8xbf16> to vector<8x8xbf16>
    %cst_172 = arith.constant dense<0.000000e+00> : vector<8x128xf32>
    %199 = tpu.matmul %198, %189, %cst_172 {dimension_numbers = #tpu.dot_dimension_numbers<[1], [0], [0], [1], [0, 0, 1, 1], [], []>} : vector<8x8xbf16>, vector<8x128xbf16>, vector<8x128xf32> -> vector<8x128xf32>
    %200 = arith.truncf %199 : vector<8x128xf32> to vector<8x128xbf16>
    %c1_173 = arith.constant 1 : index
    %c0_174 = arith.constant 0 : index
    %c0_175 = arith.constant 0 : index
    %201 = vector.load %arg10[%c1_173, %c0_174, %c0_175] : memref<4x128x200xbf16, #tpu.memory_space<vmem>>, vector<1x128x200xbf16>
    %202 = vector.shape_cast %201 : vector<1x128x200xbf16> to vector<128x200xbf16>
    %cst_176 = arith.constant dense<0.000000e+00> : vector<8x200xf32>
    %203 = tpu.matmul %200, %202, %cst_176 {dimension_numbers = #tpu.dot_dimension_numbers<[1], [0], [0], [1], [0, 0, 1, 1], [], []>} : vector<8x128xbf16>, vector<128x200xbf16>, vector<8x200xf32> -> vector<8x200xf32>
    %204 = arith.addf %196, %203 : vector<8x200xf32>
    %c2_177 = arith.constant 2 : index
    %c0_178 = arith.constant 0 : index
    %c0_179 = arith.constant 0 : index
    %205 = vector.load %arg9[%c2_177, %c0_178, %c0_179] : memref<4x8x8xbf16, #tpu.memory_space<vmem>>, vector<1x8x8xbf16>
    %206 = vector.shape_cast %205 : vector<1x8x8xbf16> to vector<8x8xbf16>
    %cst_180 = arith.constant dense<0.000000e+00> : vector<8x128xf32>
    %207 = tpu.matmul %206, %189, %cst_180 {dimension_numbers = #tpu.dot_dimension_numbers<[1], [0], [0], [1], [0, 0, 1, 1], [], []>} : vector<8x8xbf16>, vector<8x128xbf16>, vector<8x128xf32> -> vector<8x128xf32>
    %208 = arith.truncf %207 : vector<8x128xf32> to vector<8x128xbf16>
    %c2_181 = arith.constant 2 : index
    %c0_182 = arith.constant 0 : index
    %c0_183 = arith.constant 0 : index
    %209 = vector.load %arg10[%c2_181, %c0_182, %c0_183] : memref<4x128x200xbf16, #tpu.memory_space<vmem>>, vector<1x128x200xbf16>
    %210 = vector.shape_cast %209 : vector<1x128x200xbf16> to vector<128x200xbf16>
    %cst_184 = arith.constant dense<0.000000e+00> : vector<8x200xf32>
    %211 = tpu.matmul %208, %210, %cst_184 {dimension_numbers = #tpu.dot_dimension_numbers<[1], [0], [0], [1], [0, 0, 1, 1], [], []>} : vector<8x128xbf16>, vector<128x200xbf16>, vector<8x200xf32> -> vector<8x200xf32>
    %212 = arith.addf %204, %211 : vector<8x200xf32>
    %c3_185 = arith.constant 3 : index
    %c0_186 = arith.constant 0 : index
    %c0_187 = arith.constant 0 : index
    %213 = vector.load %arg9[%c3_185, %c0_186, %c0_187] : memref<4x8x8xbf16, #tpu.memory_space<vmem>>, vector<1x8x8xbf16>
    %214 = vector.shape_cast %213 : vector<1x8x8xbf16> to vector<8x8xbf16>
    %cst_188 = arith.constant dense<0.000000e+00> : vector<8x128xf32>
    %215 = tpu.matmul %214, %189, %cst_188 {dimension_numbers = #tpu.dot_dimension_numbers<[1], [0], [0], [1], [0, 0, 1, 1], [], []>} : vector<8x8xbf16>, vector<8x128xbf16>, vector<8x128xf32> -> vector<8x128xf32>
    %216 = arith.truncf %215 : vector<8x128xf32> to vector<8x128xbf16>
    %c3_189 = arith.constant 3 : index
    %c0_190 = arith.constant 0 : index
    %c0_191 = arith.constant 0 : index
    %217 = vector.load %arg10[%c3_189, %c0_190, %c0_191] : memref<4x128x200xbf16, #tpu.memory_space<vmem>>, vector<1x128x200xbf16>
    %218 = vector.shape_cast %217 : vector<1x128x200xbf16> to vector<128x200xbf16>
    %cst_192 = arith.constant dense<0.000000e+00> : vector<8x200xf32>
    %219 = tpu.matmul %216, %218, %cst_192 {dimension_numbers = #tpu.dot_dimension_numbers<[1], [0], [0], [1], [0, 0, 1, 1], [], []>} : vector<8x128xbf16>, vector<128x200xbf16>, vector<8x200xf32> -> vector<8x200xf32>
    %220 = arith.addf %212, %219 : vector<8x200xf32>
    %c0_193 = arith.constant 0 : index
    %c0_194 = arith.constant 0 : index
    %221 = vector.load %arg11[%c0_193, %c0_194] : memref<1x200xf32, #tpu.memory_space<vmem>>, vector<1x200xf32>
    %222 = vector.broadcast %221 : vector<1x200xf32> to vector<8x200xf32>
    %223 = arith.addf %220, %222 : vector<8x200xf32>
    %cst_195 = arith.constant 0.000000e+00 : f32
    %224 = vector.broadcast %cst_195 : f32 to vector<8x200xf32>
    %225 = arith.maximumf %223, %224 : vector<8x200xf32>
    %226 = arith.truncf %225 : vector<8x200xf32> to vector<8x200xbf16>
    %c0_196 = arith.constant 0 : index
    %c0_197 = arith.constant 0 : index
    %227 = vector.load %arg12[%c0_196, %c0_197] : memref<200x128xbf16, #tpu.memory_space<vmem>>, vector<200x128xbf16>
    %cst_198 = arith.constant dense<0.000000e+00> : vector<8x128xf32>
    %228 = tpu.matmul %226, %227, %cst_198 {dimension_numbers = #tpu.dot_dimension_numbers<[1], [0], [0], [1], [0, 0, 1, 1], [], []>} : vector<8x200xbf16>, vector<200x128xbf16>, vector<8x128xf32> -> vector<8x128xf32>
    %c0_199 = arith.constant 0 : index
    %c0_200 = arith.constant 0 : index
    %229 = vector.load %arg13[%c0_199, %c0_200] : memref<1x128xf32, #tpu.memory_space<vmem>>, vector<1x128xf32>
    %230 = vector.broadcast %229 : vector<1x128xf32> to vector<8x128xf32>
    %231 = arith.addf %228, %230 : vector<8x128xf32>
    %c0_201 = arith.constant 0 : index
    %c0_202 = arith.constant 0 : index
    %232 = vector.load %arg14[%c0_201, %c0_202] : memref<200x128xbf16, #tpu.memory_space<vmem>>, vector<200x128xbf16>
    %cst_203 = arith.constant dense<0.000000e+00> : vector<8x128xf32>
    %233 = tpu.matmul %226, %232, %cst_203 {dimension_numbers = #tpu.dot_dimension_numbers<[1], [0], [0], [1], [0, 0, 1, 1], [], []>} : vector<8x200xbf16>, vector<200x128xbf16>, vector<8x128xf32> -> vector<8x128xf32>
    %c0_204 = arith.constant 0 : index
    %c0_205 = arith.constant 0 : index
    %234 = vector.load %arg15[%c0_204, %c0_205] : memref<1x128xf32, #tpu.memory_space<vmem>>, vector<1x128xf32>
    %235 = vector.broadcast %234 : vector<1x128xf32> to vector<8x128xf32>
    %236 = arith.addf %233, %235 : vector<8x128xf32>
    %237 = math.exp %236 : vector<8x128xf32>
    %c0_206 = arith.constant 0 : index
    %c0_207 = arith.constant 0 : index
    %238 = vector.load %arg16[%c0_206, %c0_207] : memref<8x128xf32, #tpu.memory_space<vmem>>, vector<8x128xf32>
    %239 = arith.mulf %237, %238 : vector<8x128xf32>
    %240 = arith.addf %231, %239 : vector<8x128xf32>
    %c0_208 = arith.constant 0 : index
    %c0_209 = arith.constant 0 : index
    %241 = vector.load %arg17[%c0_208, %c0_209] : memref<8x128xf32, #tpu.memory_space<vmem>>, vector<8x128xf32>
    tpu.vector_store %arg17[%c0_208, %c0_209], %240 {strides = array<i32>} : memref<8x128xf32, #tpu.memory_space<vmem>>, vector<8x128xf32>,
    %242 = tpu.iota {dimensions = array<i32: 0>} : vector<8x128xi32>
    %243 = tpu.iota {dimensions = array<i32: 1>} : vector<8x128xi32>
    %c2_i32 = arith.constant 2 : i32
    %244 = vector.broadcast %c2_i32 : i32 to vector<8x128xi32>
    %245 = arith.cmpi slt, %242, %244 : vector<8x128xi32>
    %c8_i32 = arith.constant 8 : i32
    %246 = vector.broadcast %c8_i32 : i32 to vector<8x128xi32>
    %247 = arith.cmpi slt, %243, %246 : vector<8x128xi32>
    %248 = arith.andi %245, %247 : vector<8x128xi1>
    %249 = arith.mulf %237, %237 : vector<8x128xf32>
    %250 = arith.mulf %231, %231 : vector<8x128xf32>
    %251 = arith.addf %249, %250 : vector<8x128xf32>
    %252 = arith.subf %251, %236 : vector<8x128xf32>
    %cst_210 = arith.constant 5.000000e-01 : f32
    %253 = vector.broadcast %cst_210 : f32 to vector<8x128xf32>
    %254 = arith.subf %252, %253 : vector<8x128xf32>
    %cst_211 = arith.constant 0.000000e+00 : f32
    %255 = vector.broadcast %cst_211 : f32 to vector<8x128xf32>
    %256 = arith.select %248, %254, %255 : vector<8x128xi1>, vector<8x128xf32>
    %257 = vector.shape_cast %256 : vector<8x128xf32> to vector<1x8x128xf32>
    %cst_212 = arith.constant dense<0.000000e+00> : vector<1xf32>
    %258 = vector.multi_reduction <add>, %257, %cst_212 [1, 2] : vector<1x8x128xf32> to vector<1xf32>
    %259 = vector.shape_cast %258 : vector<1xf32> to vector<1x1x1xf32>
    %260 = vector.extract %259[0, 0, 0] : f32 from vector<1x1x1xf32>
    %c0_213 = arith.constant 0 : index
    %c0_214 = arith.constant 0 : index
    %261 = memref.load %arg18[%c0_213, %c0_214] : memref<1x1xf32, #tpu.memory_space<smem>>
    memref.store %260, %arg18[%c0_213, %c0_214] : memref<1x1xf32, #tpu.memory_space<smem>>
    return
  }
}

</mosaic_0001>

<bundles_post_ra>
// kernel: variational_encoder_forward.1
= control target key start
LH: loop header
LB: loop body
LE: loop exit
PB: predicated region body
PF: predicated region fallthrough
CT: control target
= control target key end

     0   :  { %s10159_s0 = inlined_call_operand.vmem [shape: bf16[4,128,9], index: 0, kind: input, shape index: {}]   ;;  %s10160_s1 = inlined_call_operand.vmem [shape: bf16[9,32], index: 1, kind: input, shape index: {}]   ;;  %s10161_s2 = inlined_call_operand.vmem [shape: f32[1,32], index: 2, kind: input, shape index: {}]   ;;  %s10162_s3 = inlined_call_operand.vmem [shape: bf16[9,128,128], index: 3, kind: input, shape index: {}]   ;;  %s10163_s4 = inlined_call_operand.vmem [shape: bf16[9,32,64], index: 4, kind: input, shape index: {}]   ;;  %s10164_s5 = inlined_call_operand.vmem [shape: f32[1,64], index: 5, kind: input, shape index: {}]   ;;  %s10165_s6 = inlined_call_operand.vmem [shape: bf16[9,32,32], index: 6, kind: input, shape index: {}]   ;;  %s10166_s7 = inlined_call_operand.vmem [shape: bf16[9,64,128], index: 7, kind: input, shape index: {}]   ;;  %s10167_s8 = inlined_call_operand.vmem [shape: f32[1,128], index: 8, kind: input, shape index: {}]   ;;  %s10168_s9 = inlined_call_operand.vmem [shape: bf16[4,8,8], index: 9, kind: input, shape index: {}]   ;;  %s10169_s10 = inlined_call_operand.vmem [shape: bf16[4,128,200], index: 10, kind: input, shape index: {}]   ;;  %s10170_s11 = inlined_call_operand.vmem [shape: f32[1,200], index: 11, kind: input, shape index: {}]   ;;  %s10171_s12 = inlined_call_operand.vmem [shape: bf16[200,128], index: 12, kind: input, shape index: {}]   ;;  %s10172_s13 = inlined_call_operand.vmem [shape: f32[1,128], index: 13, kind: input, shape index: {}]   ;;  %s10173_s14 = inlined_call_operand.vmem [shape: bf16[200,128], index: 14, kind: input, shape index: {}]   ;;  %s10174_s15 = inlined_call_operand.vmem [shape: f32[1,128], index: 15, kind: input, shape index: {}]   ;;  %s10175_s16 = inlined_call_operand.vmem [shape: f32[8,128], index: 16, kind: input, shape index: {}]   ;;  %s10176_s17 = inlined_call_operand.vmem [shape: f32[8,128], index: 17, kind: output, shape index: {0}]   ;;  %s10177_s18 = inlined_call_operand.hbm [shape: f32[1,1], index: 18, kind: output, shape index: {1}]  }
   0x1   :  { %10180 = sst [smem:[#allocation7_spill]] %s10159_s0 }
   0x2   :  { %10181 = sst [smem:[#allocation8_spill]] %s10160_s1 }
   0x3   :  { %10182 = sst [smem:[#allocation9_spill]] %s10161_s2 }
   0x4   :  { %s10183_s29 = sld [smem:[#allocation8_spill]]  ;;  %vm148_vm0 = vcmask 1043456   ;;  %vm149_vm1 = vcmask 1044480   ;;  %v8588_v2 = vmov 65535   ;;  %vm123_vm2 = vcmask 72704  }
   0x5   :  { %s10184_s19 = sld [smem:[#allocation7_spill]]  ;;  %v150_v3 = vsel %vm148_vm0, 4294967295, %v8588_v2 }
   0x6   :  { %v151_v4 = vsel %vm149_vm1, %v150_v3, 0 }
   0xa   :  { %v8277_v0 = vld [vmem:[%s10183_s29] sm:$0x1f]  }
   0xb   :  { %v8278_v1 = vld [vmem:[%s10184_s19] sm:$0xff]   ;;  %v153_v6 = vand.u32 %v8277_v0, %v151_v4  ;;  %v8280_v7 = vld [vmem:[%s10184_s19 + $0x8] sm:$0xff]   ;;  %v8282_v9 = vld [vmem:[%s10184_s19 + $0x10] sm:$0xff]  }
   0xc   :  { %7528 = vmatprep.mubr.msk.bf16.mxu0 %vm123_vm2, %v8278_v1  ;;  %v8279_v5 = vld [vmem:[%s10184_s19 + $0x40] sm:$0xff]   ;;  %v8281_v8 = vld [vmem:[%s10184_s19 + $0x48] sm:$0xff]   ;;  %v8283_v10 = vld [vmem:[%s10184_s19 + $0x50] sm:$0xff]  }
   0xd   :  { %7546 = vmatprep.mubr.msk.bf16.mxu1 %vm123_vm2, %v8279_v5  ;;  %7526 = vmatprep.subr.bf16.mxu0 %v153_v6  ;;  %v8284_v11 = vld [vmem:[%s10184_s19 + $0x18] sm:$0xff]   ;;  %v8286_v13 = vld [vmem:[%s10184_s19 + $0x20] sm:$0xff]   ;;  %v8288_v15 = vld [vmem:[%s10184_s19 + $0x28] sm:$0xff]  }
   0xe   :  { %7544 = vmatprep.subr.bf16.mxu1 %v153_v6  ;;  %7527 = vmatpush3.bf16.msra.mxu0 %v153_v6  ;;  %v8285_v12 = vld [vmem:[%s10184_s19 + $0x58] sm:$0xff]   ;;  %v8287_v14 = vld [vmem:[%s10184_s19 + $0x60] sm:$0xff]   ;;  %v8289_v16 = vld [vmem:[%s10184_s19 + $0x68] sm:$0xff]  }
   0xf   :  { %7545 = vmatpush3.bf16.msra.mxu1 %v153_v6  ;;  %7562 = vmatprep.subr.bf16.mxu0 %v153_v6  ;;  %v8290_v17 = vld [vmem:[%s10184_s19 + $0x30] sm:$0xff]   ;;  %v8292_v19 = vld [vmem:[%s10184_s19 + $0x38] sm:$0xff]   ;;  %v8294_v21 = vld [vmem:[%s10184_s19 + $0x80] sm:$0xff]  }
  0x10   :  { %7580 = vmatprep.subr.bf16.mxu1 %v153_v6  ;;  %v8291_v18 = vld [vmem:[%s10184_s19 + $0x70] sm:$0xff]   ;;  %v8293_v20 = vld [vmem:[%s10184_s19 + $0x78] sm:$0xff]   ;;  %v8295_v22 = vld [vmem:[%s10184_s19 + $0xc0] sm:$0xff]  }
  0x11   :  { %7529 = vmatmul.mubr.msk.bf16.vlgmr.msra.gmra.mxu0 %vm123_vm2, %v8280_v7  ;;  %v8296_v23 = vld [vmem:[%s10184_s19 + $0x88] sm:$0xff]   ;;  %v8298_v25 = vld [vmem:[%s10184_s19 + $0x90] sm:$0xff]   ;;  %v8300_v27 = vld [vmem:[%s10184_s19 + $0x98] sm:$0xff]  }
  0x12   :  { %7547 = vmatmul.mubr.msk.bf16.vlgmr.msra.gmra.mxu1 %vm123_vm2, %v8281_v8  ;;  %7532 = vmatprep.mubr.msk.bf16.mxu0 %vm123_vm2, %v8282_v9  ;;  %v8297_v24 = vld [vmem:[%s10184_s19 + $0xc8] sm:$0xff]   ;;  %v8299_v26 = vld [vmem:[%s10184_s19 + $0xd0] sm:$0xff]   ;;  %v8301_v28 = vld [vmem:[%s10184_s19 + $0xd8] sm:$0xff]  }
  0x13   :  { %7550 = vmatprep.mubr.msk.bf16.mxu1 %vm123_vm2, %v8283_v10  ;;  %7563 = vmatpush3.bf16.msra.mxu0 %v153_v6  ;;  %v8302_v29 = vld [vmem:[%s10184_s19 + $0xa0] sm:$0xff]   ;;  %v8304_v31 = vld [vmem:[%s10184_s19 + $0xa8] sm:$0xff]   ;;  %v8306_v33 = vld [vmem:[%s10184_s19 + $0xb0] sm:$0xff]  }
  0x14   :  { %7581 = vmatpush3.bf16.msra.mxu1 %v153_v6  ;;  %v8303_v30 = vld [vmem:[%s10184_s19 + $0xe0] sm:$0xff]   ;;  %v8305_v32 = vld [vmem:[%s10184_s19 + $0xe8] sm:$0xff]   ;;  %v8307_v34 = vld [vmem:[%s10184_s19 + $0xf0] sm:$0xff]  }
  0x15   :  { %v8308_v35 = vld [vmem:[%s10184_s19 + $0xb8] sm:$0xff]  }
  0x16   :  { %v8309_v36 = vld [vmem:[%s10184_s19 + $0xf8] sm:$0xff]  }
  0x19   :  { %7533 = vmatmul.mubr.msk.bf16.gmra.mxu0 %vm123_vm2, %v8284_v11 }
  0x1a   :  { %7551 = vmatmul.mubr.msk.bf16.gmra.mxu1 %vm123_vm2, %v8285_v12  ;;  %7536 = vmatprep.mubr.msk.bf16.mxu0 %vm123_vm2, %v8286_v13 }
  0x1b   :  { %7554 = vmatprep.mubr.msk.bf16.mxu1 %vm123_vm2, %v8287_v14 }
  0x21   :  { %7537 = vmatmul.mubr.msk.bf16.gmra.mxu0 %vm123_vm2, %v8288_v15 }
  0x22   :  { %7555 = vmatmul.mubr.msk.bf16.gmra.mxu1 %vm123_vm2, %v8289_v16  ;;  %7540 = vmatprep.mubr.msk.bf16.mxu0 %vm123_vm2, %v8290_v17 }
  0x23   :  { %7558 = vmatprep.mubr.msk.bf16.mxu1 %vm123_vm2, %v8291_v18 }
  0x29   :  { %7541 = vmatmul.mubr.msk.bf16.gmra.mxu0 %vm123_vm2, %v8292_v19 }
  0x2a   :  { %7559 = vmatmul.mubr.msk.bf16.gmra.mxu1 %vm123_vm2, %v8293_v20  ;;  %7564 = vmatprep.mubr.msk.bf16.mxu0 %vm123_vm2, %v8294_v21 }
  0x2b   :  { %7582 = vmatprep.mubr.msk.bf16.mxu1 %vm123_vm2, %v8295_v22 }
  0x31   :  { %7565 = vmatmul.mubr.msk.bf16.vlgmr.msra.gmra.mxu0 %vm123_vm2, %v8296_v23 }
  0x32   :  { %7583 = vmatmul.mubr.msk.bf16.vlgmr.msra.gmra.mxu1 %vm123_vm2, %v8297_v24  ;;  %7568 = vmatprep.mubr.msk.bf16.mxu0 %vm123_vm2, %v8298_v25 }
  0x33   :  { %7586 = vmatprep.mubr.msk.bf16.mxu1 %vm123_vm2, %v8299_v26 }
  0x39   :  { %7569 = vmatmul.mubr.msk.bf16.gmra.mxu0 %vm123_vm2, %v8300_v27 }
  0x3a   :  { %7587 = vmatmul.mubr.msk.bf16.gmra.mxu1 %vm123_vm2, %v8301_v28  ;;  %7572 = vmatprep.mubr.msk.bf16.mxu0 %vm123_vm2, %v8302_v29 }
  0x3b   :  { %7590 = vmatprep.mubr.msk.bf16.mxu1 %vm123_vm2, %v8303_v30 }
  0x41   :  { %7573 = vmatmul.mubr.msk.bf16.gmra.mxu0 %vm123_vm2, %v8304_v31 }
  0x42   :  { %7591 = vmatmul.mubr.msk.bf16.gmra.mxu1 %vm123_vm2, %v8305_v32  ;;  %7576 = vmatprep.mubr.msk.bf16.mxu0 %vm123_vm2, %v8306_v33 }
  0x43   :  { %7594 = vmatprep.mubr.msk.bf16.mxu1 %vm123_vm2, %v8307_v34 }
  0x49   :  { %7577 = vmatmul.mubr.msk.bf16.gmra.mxu0 %vm123_vm2, %v8308_v35 }
  0x4a   :  { %7595 = vmatmul.mubr.msk.bf16.gmra.mxu1 %vm123_vm2, %v8309_v36 }
  0x4b   :  { %24 = vsyncpa [#allocation3], 0  ;;  %v8310_v37 = vld [vmem:[%s10162_s3] sm:$0xff]   ;;  %s10186_s29 = sld [smem:[#allocation9_spill]]  ;;  %vm1241_vm3 = vcmask 261120   ;;  %vm3977_vm4 = vcmask 523264  }
  0x4c   :  { %v8311_v38 = vld [vmem:[%s10162_s3 + $0x40] sm:$0xff]   ;;  %7614 = vmatprep.mubr.bf16.mxu0 %v8310_v37  ;;  %vm8590_vm5 = vmmov 0   ;;  %vm5274_vm6 = vcmask 64512   ;;  %vm6140_vm7 = vcmask 588800  }
  0x4d   :  { %7646 = vmatprep.mubr.bf16.mxu1 %v8311_v38 }
  0x51   :  { %v8875_v17 = vld [vmem:[%s10186_s29] ss:$0 sm:$0xff] }
  0xd1   :  { %v7530_v39 = vpop.f32.mrf.mxu0 }
  0xd2   :  { %v7548_v40 = vpop.f32.mrf.mxu1 }
  0xd3   :  { %v432_v41 = vmax.f32 %v7530_v39, %v7548_v40  ;;  %v8826_v42 = vpop.f32.mrf.mxu0 }
  0xd4   :  { %v8828_v43 = vpop.f32.mrf.mxu1 }
  0xd5   :  { %v7531_v45 = vpop.f32.mrf.mxu0 }
  0xd6   :  { %v7549_v46 = vpop.f32.mrf.mxu1 }
  0xd7   :  { %v433_v47 = vmax.f32 %v7531_v45, %v7549_v46  ;;  %v8832_v48 = vpop.f32.mrf.mxu0 }
  0xd8   :  { %v8834_v49 = vpop.f32.mrf.mxu1 }
  0xd9   :  { %v8836_v50 = vpop.f32.mrf.mxu0 }
  0xda   :  { %v8838_v51 = vpop.f32.mrf.mxu1 }
  0xdb   :  { %v8840_v52 = vpop.f32.mrf.mxu0 }
  0xdc   :  { %v8842_v53 = vpop.f32.mrf.mxu1 }
  0xdd   :  { %v8846_v55 = vpop.f32.mrf.mxu0 }
  0xde   :  { %v8848_v56 = vpop.f32.mrf.mxu1 }
  0xdf   :  { %v8850_v57 = vpop.f32.mrf.mxu0 }
  0xe0   :  { %v8852_v58 = vpop.f32.mrf.mxu1 }
  0xe1   :  { %v8854_v59 = vpop.f32.mrf.mxu0 }
  0xe2   :  { %v8856_v60 = vpop.f32.mrf.mxu1 }
  0xe3   :  { %v8858_v61 = vpop.f32.mrf.mxu0 }
  0xe4   :  { %v8860_v62 = vpop.f32.mrf.mxu1 }
  0xe5   :  { %v7539_v63 = vpop.f32.mrf.mxu0 }
  0xe6   :  { %v7557_v0 = vpop.f32.mrf.mxu1 }
  0xe7   :  { %v8862_v1 = vpop.f32.mrf.mxu0 }
  0xe8   :  { %v8864_v2 = vpop.f32.mrf.mxu1 }
  0xe9   :  { %v7542_v3 = vpop.f32.mrf.mxu0 }
  0xea   :  { %v7560_v4 = vpop.f32.mrf.mxu1 }
  0xeb   :  { %v237_v5 = vpop.f32.mrf.mxu0 }
  0xec   :  { %v415_v6 = vpop.f32.mrf.mxu1 }
  0xed   :  { %v7543_v7 = vpop.f32.mrf.mxu0 }
  0xee   :  { %v7561_v8 = vpop.f32.mrf.mxu1 }
  0xef   :  { %v8866_v9 = vpop.f32.mrf.mxu0 }
  0xf0   :  { %v418_v10 = vpop.f32.mrf.mxu1 }
  0xf1   :  { %v7566_v11 = vpop.f32.mrf.mxu0 }
  0xf2   :  { %v7584_v12 = vpop.f32.mrf.mxu1  ;;  %v626_v13 = vmax.f32 %v432_v41, %v7566_v11  ;;  %v444_v11 = vmax.f32 %v7542_v3, %v7560_v4  ;;  %v439_v3 = vmax.f32 %v8862_v1, %v8864_v2 }
  0xf3   :  { %v8868_v14 = vpop.f32.mrf.mxu0 }
  0xf4   :  { %v8870_v15 = vpop.f32.mrf.mxu1  ;;  %v820_v16 = vmax.f32 %v626_v13, %v7584_v12  ;;  %v441_v12 = vmax.f32 %v7539_v63, %v7557_v0  ;;  %v443_v63 = vmax.f32 %v8866_v9, %v418_v10 }
  0xf5   :  { %10185 = vst [vmem:[#allocation5_spill] sm:$0xff] %v8870_v15  ;;  %v7567_v18 = vpop.f32.mrf.mxu0 }
  0xf6   :  { %v7585_v19 = vpop.f32.mrf.mxu1  ;;  %v627_v20 = vmax.f32 %v433_v47, %v7567_v18  ;;  %v843_v23 = vadd.f32 %v8875_v17, %v820_v16  ;;  %v442_v18 = vmax.f32 %v237_v5, %v415_v6  ;;  %v438_v5 = vmax.f32 %v8858_v61, %v8860_v62 }
  0xf7   :  { %v8877_v21 = vpop.f32.mrf.mxu0  ;;  %v436_v61 = vmax.f32 %v8836_v50, %v8838_v51 }
  0xf8   :  { %v8879_v22 = vpop.f32.mrf.mxu1  ;;  %v821_v24 = vmax.f32 %v627_v20, %v7585_v19  ;;  %v859_v30 = vmax.f32 %v843_v23, 0.0  ;;  %v440_v20 = vmax.f32 %v8854_v59, %v8856_v60 }
  0xf9   :  { %v7570_v25 = vpop.f32.mrf.mxu0 }
  0xfa   :  { %v8882_v26 = vpop.f32.mrf.mxu1  ;;  %v844_v27 = vadd.f32 %v8875_v17, %v821_v24 }
  0xfb   :  { %v8885_v28 = vpop.f32.mrf.mxu0 }
  0xfc   :  { %v8887_v29 = vpop.f32.mrf.mxu1  ;;  %v860_v31 = vmax.f32 %v844_v27, 0.0 }
  0xfd   :  { %v7571_v32 = vpop.f32.mrf.mxu0 }
  0xfe   :  { %v8889_v33 = vpop.f32.mrf.mxu1  ;;  %v8891_v34 = vpack.c.bf16 %v860_v31, %v859_v30  ;;  %v445_v30 = vmax.f32 %v7543_v7, %v7561_v8 }
  0xff   :  { %v580_v35 = vpop.f32.mrf.mxu0 }
 0x100   :  { %10187 = vst [vmem:[#allocation6_spill] sm:$0xff] %v8891_v34  ;;  %v8893_v36 = vpop.f32.mrf.mxu1 }
 0x101   :  { %v7574_v37 = vpop.f32.mrf.mxu0 }
 0x102   :  { %v7592_v38 = vpop.f32.mrf.mxu1  ;;  %v634_v54 = vmax.f32 %v440_v20, %v7574_v37  ;;  %v437_v37 = vmax.f32 %v8846_v55, %v8848_v56  ;;  %v630_v55 = vmax.f32 %v436_v61, %v7570_v25  ;;  %v8323_v61 = vld [vmem:[%s10162_s3 + $0x68] sm:$0xff]  }
 0x103   :  { %v593_v39 = vpop.f32.mrf.mxu0 }
 0x104   :  { %v8895_v40 = vpop.f32.mrf.mxu1  ;;  %v632_v1 = vmax.f32 %v438_v5, %v593_v39  ;;  %v631_v62 = vmax.f32 %v437_v37, %v7571_v32  ;;  %v8315_v37 = vld [vmem:[%s10163_s4 + $0x10] sm:$0xff]  }
 0x105   :  { %v7575_v41 = vpop.f32.mrf.mxu0 }
 0x106   :  { %v7593_v45 = vpop.f32.mrf.mxu1  ;;  %v635_v23 = vmax.f32 %v441_v12, %v7575_v41  ;;  %v825_v32 = vmax.f32 %v631_v62, %v8889_v33  ;;  %v8324_v62 = vld [vmem:[%s10162_s3 + $0x30] sm:$0xff]  }
 0x107   :  { %v596_v46 = vpop.f32.mrf.mxu0 }
 0x108   :  { %v790_v47 = vpop.f32.mrf.mxu1  ;;  %v829_v59 = vmax.f32 %v635_v23, %v7593_v45  ;;  %v633_v6 = vmax.f32 %v439_v3, %v596_v46 }
 0x109   :  { %v7578_v13 = vpop.f32.mrf.mxu0 }
 0x10a   :  { %v7596_v16 = vpop.f32.mrf.mxu1  ;;  %v638_v19 = vmax.f32 %v444_v11, %v7578_v13  ;;  %v828_v11 = vmax.f32 %v634_v54, %v7592_v38  ;;  %v852_v10 = vadd.f32 %v8875_v17, %v829_v59  ;;  %v435_v54 = vmax.f32 %v8850_v57, %v8852_v58 }
 0x10b   :  { %v609_v24 = vpop.f32.mrf.mxu0  ;;  %v826_v38 = vmax.f32 %v632_v1, %v8895_v40  ;;  %v824_v57 = vmax.f32 %v630_v55, %v8882_v26  ;;  %v10188_v58 = vmax.f32 %v8840_v52, %v8842_v53  ;;  %v848_v40 = vadd.f32 %v8875_v17, %v825_v32  ;;  %v8319_v1 = vld [vmem:[%s10162_s3 + $0x58] sm:$0xff]  }
 0x10c   :  { %v803_v27 = vpop.f32.mrf.mxu1  ;;  %v832_v31 = vmax.f32 %v638_v19, %v7596_v16  ;;  %v636_v44 = vmax.f32 %v442_v18, %v609_v24  ;;  %v851_v56 = vadd.f32 %v8875_v17, %v828_v11  ;;  %v629_v51 = vmax.f32 %v435_v54, %v580_v35  ;;  %v8317_v11 = vld [vmem:[%s10162_s3 + $0x50] sm:$0xff]  }
 0x10d   :  { %v7579_v34 = vpop.f32.mrf.mxu0  ;;  %v628_v25 = vmax.f32 %v10188_v58, %v8885_v28  ;;  %v849_v35 = vadd.f32 %v8875_v17, %v826_v38  ;;  %v431_v52 = vmax.f32 %v8832_v48, %v8834_v49  ;;  %v847_v53 = vadd.f32 %v8875_v17, %v824_v57 }
 0x10e   :  { %v7597_v15 = vpop.f32.mrf.mxu1  ;;  %v830_v0 = vmax.f32 %v636_v44, %v803_v27  ;;  %v639_v4 = vmax.f32 %v445_v30, %v7579_v34  ;;  %v855_v7 = vadd.f32 %v8875_v17, %v832_v31  ;;  %v827_v34 = vmax.f32 %v633_v6, %v790_v47 }
 0x10f   :  { %v612_v60 = vpop.f32.mrf.mxu0  ;;  %v868_v47 = vmax.f32 %v852_v10, 0.0  ;;  %v867_v33 = vmax.f32 %v851_v56, 0.0  ;;  %v823_v19 = vmax.f32 %v629_v51, %v8893_v36  ;;  %v822_v26 = vmax.f32 %v628_v25, %v8887_v29  ;;  %v8325_v10 = vld [vmem:[%s10162_s3 + $0x70] sm:$0xff]  }
 0x110   :  { %v833_v8 = vmax.f32 %v639_v4, %v7597_v15  ;;  %v637_v41 = vmax.f32 %v443_v63, %v612_v60  ;;  %v806_v12 = vpop.f32.mrf.mxu1  ;;  %v853_v2 = vadd.f32 %v8875_v17, %v830_v0  ;;  %v871_v15 = vmax.f32 %v855_v7, 0.0  ;;  %v10190_v0 = vld [vmem:[#allocation5_spill] sm:$0xff]  ;;  %v10191_v60 = vld [vmem:[#allocation6_spill] sm:$0xff] }
 0x111   :  { %v850_v16 = vadd.f32 %v8875_v17, %v827_v34  ;;  %v8937_v20 = vpack.c.bf16 %v868_v47, %v867_v33  ;;  %v865_v28 = vmax.f32 %v849_v35, 0.0  ;;  %v625_v36 = vmax.f32 %v431_v52, %v8877_v21  ;;  %v8312_v7 = vld [vmem:[%s10162_s3 + $0x8] sm:$0xff]   ;;  %v8326_v34 = vld [vmem:[%s10162_s3 + $0x38] sm:$0xff]  }
 0x112   :  { %v856_v44 = vadd.f32 %v8875_v17, %v833_v8  ;;  %v831_v9 = vmax.f32 %v637_v41, %v806_v12  ;;  %v869_v39 = vmax.f32 %v853_v2, 0.0  ;;  %v864_v24 = vmax.f32 %v848_v40, 0.0  ;;  %v8313_v8 = vld [vmem:[%s10162_s3 + $0x48] sm:$0xff]   ;;  %v8316_v41 = vld [vmem:[%s10162_s3 + $0x10] sm:$0xff]   ;;  %v8318_v12 = vld [vmem:[%s10162_s3 + $0x18] sm:$0xff]  }
 0x113   :  { %v866_v23 = vmax.f32 %v850_v16, 0.0  ;;  %v846_v27 = vadd.f32 %v8875_v17, %v823_v19  ;;  %v10189_v48 = vmax.f32 %v8826_v42, %v8828_v43  ;;  %v863_v29 = vmax.f32 %v847_v53, 0.0  ;;  %v8320_v2 = vld [vmem:[%s10162_s3 + $0x20] sm:$0xff]  }
 0x114   :  { %v872_v45 = vmax.f32 %v856_v44, 0.0  ;;  %v854_v46 = vadd.f32 %v8875_v17, %v831_v9  ;;  %v845_v31 = vadd.f32 %v8875_v17, %v822_v26  ;;  %v819_v21 = vmax.f32 %v625_v36, %v8879_v22  ;;  %v8321_v44 = vld [vmem:[%s10162_s3 + $0x60] sm:$0xff]   ;;  %v8322_v9 = vld [vmem:[%s10162_s3 + $0x28] sm:$0xff]  }
 0x115   :  { %v8949_v30 = vpack.c.bf16 %v866_v23, %v865_v28  ;;  %v624_v49 = vmax.f32 %v10189_v48, %v8868_v14  ;;  %v8961_v3 = vpack.c.bf16 %v864_v24, %v863_v29  ;;  %v862_v63 = vmax.f32 %v846_v27, 0.0 }
 0x116   :  { %v8917_v13 = vpack.c.bf16 %v872_v45, %v871_v15  ;;  %v870_v50 = vmax.f32 %v854_v46, 0.0  ;;  %v861_v42 = vmax.f32 %v845_v31, 0.0  ;;  %v842_v43 = vadd.f32 %v8875_v17, %v819_v21  ;;  %v8327_v15 = vld [vmem:[%s10162_s3 + $0x78] sm:$0xff]   ;;  %v8328_v45 = vld [vmem:[%s10163_s4 + $0x8] sm:$0xff]   ;;  %v8329_v46 = vld [vmem:[%s10163_s4] sm:$0xff]  }
 0x117   :  { %v818_v4 = vmax.f32 %v624_v49, %v10190_v0 }
 0x118   :  { %v8921_v18 = vpack.c.bf16 %v870_v50, %v869_v39  ;;  %7598 = vmatprep.subr.bf16.mxu0 %v8917_v13  ;;  %7630 = vmatprep.subr.bf16.mxu1 %v8917_v13  ;;  %v8969_v14 = vpack.c.bf16 %v862_v63, %v861_v42  ;;  %v858_v5 = vmax.f32 %v842_v43, 0.0 }
 0x119   :  { %7599 = vmatpush3.bf16.msra.mxu0 %v8917_v13  ;;  %7631 = vmatpush3.bf16.msra.mxu1 %v8917_v13  ;;  %v841_v22 = vadd.f32 %v8875_v17, %v818_v4  ;;  %v8314_v17 = vld [vmem:[%s10163_s4 + $0x18] sm:$0xff]  }
 0x11a   :  { %7600 = vmatprep.subr.bf16.mxu0 %v8921_v18  ;;  %7632 = vmatprep.subr.bf16.mxu1 %v8921_v18 }
 0x11b   :  { %v857_v59 = vmax.f32 %v841_v22, 0.0 }
 0x11d   :  { %7601 = vmatpush3.bf16.msra.mxu0 %v8921_v18  ;;  %7633 = vmatpush3.bf16.msra.mxu1 %v8921_v18  ;;  %v8980_v6 = vpack.c.bf16 %v858_v5, %v857_v59 }
 0x11e   :  { %7602 = vmatprep.subr.bf16.mxu0 %v8937_v20  ;;  %7634 = vmatprep.subr.bf16.mxu1 %v8937_v20 }
 0x121   :  { %7603 = vmatpush3.bf16.msra.mxu0 %v8937_v20  ;;  %7635 = vmatpush3.bf16.msra.mxu1 %v8937_v20 }
 0x122   :  { %7604 = vmatprep.subr.bf16.mxu0 %v8949_v30  ;;  %7636 = vmatprep.subr.bf16.mxu1 %v8949_v30 }
 0x125   :  { %7605 = vmatpush3.bf16.msra.mxu0 %v8949_v30  ;;  %7637 = vmatpush3.bf16.msra.mxu1 %v8949_v30 }
 0x126   :  { %7606 = vmatprep.subr.bf16.mxu0 %v8961_v3  ;;  %7638 = vmatprep.subr.bf16.mxu1 %v8961_v3 }
 0x129   :  { %7607 = vmatpush3.bf16.msra.mxu0 %v8961_v3  ;;  %7639 = vmatpush3.bf16.msra.mxu1 %v8961_v3 }
 0x12a   :  { %7608 = vmatprep.subr.bf16.mxu0 %v8969_v14  ;;  %7640 = vmatprep.subr.bf16.mxu1 %v8969_v14 }
 0x12d   :  { %7609 = vmatpush3.bf16.msra.mxu0 %v8969_v14  ;;  %7641 = vmatpush3.bf16.msra.mxu1 %v8969_v14 }
 0x12e   :  { %7610 = vmatprep.subr.bf16.mxu0 %v10191_v60  ;;  %7642 = vmatprep.subr.bf16.mxu1 %v10191_v60 }
 0x131   :  { %7611 = vmatpush3.bf16.msra.mxu0 %v10191_v60  ;;  %7643 = vmatpush3.bf16.msra.mxu1 %v10191_v60 }
 0x132   :  { %7612 = vmatprep.subr.bf16.mxu0 %v8980_v6  ;;  %7644 = vmatprep.subr.bf16.mxu1 %v8980_v6 }
 0x135   :  { %7613 = vmatpush3.bf16.msra.mxu0 %v8980_v6  ;;  %7645 = vmatpush3.bf16.msra.mxu1 %v8980_v6 }
 0x136   :  { %7662 = vmatprep.subr.bf16.mxu0 %v8314_v17  ;;  %7682 = vmatprep.subr.bf16.mxu1 %v8328_v45 }
 0x138   :  { %7615 = vmatmul.mubr.bf16.vlgmr.msra.gmra.mxu0 %v8312_v7  ;;  %7647 = vmatmul.mubr.bf16.vlgmr.msra.gmra.mxu1 %v8313_v8 }
 0x139   :  { %7663 = vmatpush3.bf16.msra.mxu0 %v8314_v17  ;;  %7618 = vmatprep.mubr.bf16.mxu0 %v8316_v41 }
 0x13a   :  { %7664 = vmatprep.subr.bf16.mxu0 %v8315_v37  ;;  %7650 = vmatprep.mubr.bf16.mxu1 %v8317_v11 }
 0x13b   :  { %7683 = vmatpush3.bf16.msra.mxu1 %v8328_v45  ;;  %v8336_v45 = vld [vmem:[%s10162_s3 + $0xb0] sm:$0xff]  }
 0x13c   :  { %7684 = vmatprep.subr.bf16.mxu1 %v8329_v46 }
 0x13d   :  { %7665 = vmatpush3.bf16.msra.mxu0 %v8315_v37 }
 0x13e   :  { %7702 = vmatprep.subr.bf16.mxu0 %v8917_v13 }
 0x13f   :  { %7685 = vmatpush3.bf16.msra.mxu1 %v8329_v46  ;;  %v8337_v46 = vld [vmem:[%s10162_s3 + $0xb8] sm:$0xff]  }
 0x140   :  { %7619 = vmatmul.mubr.bf16.gmra.mxu0 %v8318_v12  ;;  %7651 = vmatmul.mubr.bf16.gmra.mxu1 %v8319_v1 }
 0x141   :  { %7622 = vmatprep.mubr.bf16.mxu0 %v8320_v2  ;;  %7654 = vmatprep.mubr.bf16.mxu1 %v8321_v44  ;;  %v8330_v44 = vld [vmem:[%s10162_s3 + $0x80] sm:$0xff]  }
 0x148   :  { %7623 = vmatmul.mubr.bf16.gmra.mxu0 %v8322_v9  ;;  %7655 = vmatmul.mubr.bf16.gmra.mxu1 %v8323_v61  ;;  %v8331_v61 = vld [vmem:[%s10162_s3 + $0x88] sm:$0xff]  }
 0x149   :  { %7626 = vmatprep.mubr.bf16.mxu0 %v8324_v62  ;;  %7658 = vmatprep.mubr.bf16.mxu1 %v8325_v10  ;;  %v8332_v62 = vld [vmem:[%s10162_s3 + $0x90] sm:$0xff]   ;;  %v8333_v10 = vld [vmem:[%s10162_s3 + $0x98] sm:$0xff]  }
 0x150   :  { %7627 = vmatmul.mubr.bf16.gmra.mxu0 %v8326_v34  ;;  %7659 = vmatmul.mubr.bf16.gmra.mxu1 %v8327_v15  ;;  %v8334_v34 = vld [vmem:[%s10162_s3 + $0xa0] sm:$0xff]   ;;  %v8335_v15 = vld [vmem:[%s10162_s3 + $0xa8] sm:$0xff]  }
 0x1f8   :  { %v7616_v54 = vpop.f32.mrf.mxu0  ;;  %v7648_v55 = vpop.f32.mrf.mxu1 }
 0x1fa   :  { %v979_v56 = vpop.f32.mrf.mxu0  ;;  %v1153_v38 = vpop.f32.mrf.mxu1 }
 0x1fc   :  { %v7617_v39 = vpop.f32.mrf.mxu0  ;;  %v7649_v50 = vpop.f32.mrf.mxu1 }
 0x1fd   :  { %v1043_v51 = vpack.c.bf16 %v7617_v39, %v7616_v54  ;;  %v1217_v58 = vpack.c.bf16 %v7649_v50, %v7648_v55  ;;  %v8338_v54 = vld [vmem:[%s10162_s3 + $0xc0] sm:$0xff]   ;;  %v8339_v55 = vld [vmem:[%s10162_s3 + $0xc8] sm:$0xff]  }
 0x1fe   :  { %v982_v32 = vpop.f32.mrf.mxu0  ;;  %v1156_v47 = vpop.f32.mrf.mxu1  ;;  %v8342_v39 = vld [vmem:[%s10162_s3 + $0xe0] sm:$0xff]   ;;  %v8343_v50 = vld [vmem:[%s10162_s3 + $0xe8] sm:$0xff]  }
 0x1ff   :  { %v1042_v16 = vpack.c.bf16 %v982_v32, %v979_v56  ;;  %v1216_v57 = vpack.c.bf16 %v1156_v47, %v1153_v38  ;;  %v8340_v56 = vld [vmem:[%s10162_s3 + $0xd0] sm:$0xff]   ;;  %v8341_v38 = vld [vmem:[%s10162_s3 + $0xd8] sm:$0xff]   ;;  %v8346_v47 = vld [vmem:[%s10162_s3 + $0x100] sm:$0xff]  }
 0x200   :  { %v7620_v25 = vpop.f32.mrf.mxu0  ;;  %v7652_v33 = vpop.f32.mrf.mxu1  ;;  %v8345_v32 = vld [vmem:[%s10162_s3 + $0xf8] sm:$0xff]  }
 0x201   :  { %7666 = vmatprep.mubr.msk.bf16.mxu0 %vm1241_vm3, %v1216_v57  ;;  %7686 = vmatprep.mubr.msk.bf16.mxu1 %vm1241_vm3, %v1042_v16  ;;  %v8347_v16 = vld [vmem:[%s10162_s3 + $0x108] sm:$0xff]   ;;  %v8348_v57 = vld [vmem:[%s10162_s3 + $0x110] sm:$0xff]  }
 0x202   :  { %v995_v35 = vpop.f32.mrf.mxu0  ;;  %v1169_v40 = vpop.f32.mrf.mxu1  ;;  %7667 = vmatmul.mubr.msk.bf16.vlgmr.msra.gmra.mxu0 %vm1241_vm3, %v1217_v58  ;;  %7687 = vmatmul.mubr.msk.bf16.vlgmr.msra.gmra.mxu1 %vm1241_vm3, %v1043_v51  ;;  %v8344_v51 = vld [vmem:[%s10162_s3 + $0xf0] sm:$0xff]   ;;  %v8380_v58 = vld [vmem:[%s10163_s4 + $0x28] sm:$0xff]  }
 0x203   :  { %7703 = vmatpush3.bf16.msra.mxu0 %v8917_v13  ;;  %7734 = vmatprep.subr.bf16.mxu1 %v8380_v58 }
 0x204   :  { %7704 = vmatprep.subr.bf16.mxu0 %v8921_v18  ;;  %v7621_v19 = vpop.f32.mrf.mxu0  ;;  %v7653_v23 = vpop.f32.mrf.mxu1  ;;  %7735 = vmatpush3.bf16.msra.mxu1 %v8380_v58 }
 0x205   :  { %v1045_v52 = vpack.c.bf16 %v7621_v19, %v7620_v25  ;;  %v1219_v24 = vpack.c.bf16 %v7653_v23, %v7652_v33  ;;  %v8349_v25 = vld [vmem:[%s10162_s3 + $0x118] sm:$0xff]   ;;  %v8350_v33 = vld [vmem:[%s10162_s3 + $0x120] sm:$0xff]   ;;  %v8352_v19 = vld [vmem:[%s10162_s3 + $0x130] sm:$0xff]  }
 0x206   :  { %v998_v53 = vpop.f32.mrf.mxu0  ;;  %v1172_v26 = vpop.f32.mrf.mxu1  ;;  %v8353_v23 = vld [vmem:[%s10162_s3 + $0x138] sm:$0xff]  }
 0x207   :  { %v1044_v28 = vpack.c.bf16 %v998_v53, %v995_v35  ;;  %v1218_v36 = vpack.c.bf16 %v1172_v26, %v1169_v40  ;;  %7705 = vmatpush3.bf16.msra.mxu0 %v8921_v18  ;;  %v8381_v35 = vld [vmem:[%s10163_s4 + $0x20] sm:$0xff]   ;;  %v8351_v40 = vld [vmem:[%s10162_s3 + $0x128] sm:$0xff]   ;;  %v8356_v26 = vld [vmem:[%s10162_s3 + $0x150] sm:$0xff]  }
 0x208   :  { %7706 = vmatprep.subr.bf16.mxu0 %v8937_v20  ;;  %v7624_v27 = vpop.f32.mrf.mxu0  ;;  %v7656_v48 = vpop.f32.mrf.mxu1  ;;  %7736 = vmatprep.subr.bf16.mxu1 %v8381_v35  ;;  %v8355_v53 = vld [vmem:[%s10162_s3 + $0x148] sm:$0xff]  }
 0x209   :  { %7670 = vmatprep.mubr.msk.bf16.mxu0 %vm1241_vm3, %v1218_v36  ;;  %7690 = vmatprep.mubr.msk.bf16.mxu1 %vm1241_vm3, %v1044_v28  ;;  %v9214_v28 = vld [vmem:[%s10163_s4 + $0x38] sm:$0xff]  }
 0x20a   :  { %v1011_v49 = vpop.f32.mrf.mxu0  ;;  %v1185_v29 = vpop.f32.mrf.mxu1  ;;  %7671 = vmatmul.mubr.msk.bf16.gmra.mxu0 %vm1241_vm3, %v1219_v24  ;;  %7691 = vmatmul.mubr.msk.bf16.gmra.mxu1 %vm1241_vm3, %v1045_v52  ;;  %v8354_v52 = vld [vmem:[%s10162_s3 + $0x140] sm:$0xff]   ;;  %v8357_v36 = vld [vmem:[%s10162_s3 + $0x158] sm:$0xff]  }
 0x20b   :  { %7707 = vmatpush3.bf16.msra.mxu0 %v8937_v20  ;;  %7737 = vmatpush3.bf16.msra.mxu1 %v8381_v35  ;;  %v8358_v24 = vld [vmem:[%s10162_s3 + $0x160] sm:$0xff]  }
 0x20c   :  { %7708 = vmatprep.subr.bf16.mxu0 %v8949_v30  ;;  %v7625_v31 = vpop.f32.mrf.mxu0  ;;  %v7657_v21 = vpop.f32.mrf.mxu1  ;;  %7786 = vmatprep.subr.bf16.mxu1 %v9214_v28 }
 0x20d   :  { %v1047_v63 = vpack.c.bf16 %v7625_v31, %v7624_v27  ;;  %v1221_v22 = vpack.c.bf16 %v7657_v21, %v7656_v48  ;;  %v8359_v27 = vld [vmem:[%s10162_s3 + $0x168] sm:$0xff]   ;;  %v8360_v48 = vld [vmem:[%s10162_s3 + $0x170] sm:$0xff]  }
 0x20e   :  { %v1014_v0 = vpop.f32.mrf.mxu0  ;;  %v1188_v4 = vpop.f32.mrf.mxu1  ;;  %v8363_v31 = vld [vmem:[%s10162_s3 + $0x188] sm:$0xff]   ;;  %v8364_v21 = vld [vmem:[%s10162_s3 + $0x190] sm:$0xff]  }
 0x20f   :  { %v1046_v42 = vpack.c.bf16 %v1014_v0, %v1011_v49  ;;  %v1220_v43 = vpack.c.bf16 %v1188_v4, %v1185_v29  ;;  %7709 = vmatpush3.bf16.msra.mxu0 %v8949_v30  ;;  %v8361_v49 = vld [vmem:[%s10162_s3 + $0x178] sm:$0xff]   ;;  %v8362_v29 = vld [vmem:[%s10162_s3 + $0x180] sm:$0xff]   ;;  %v8367_v4 = vld [vmem:[%s10162_s3 + $0x1a8] sm:$0xff]  }
 0x210   :  { %7710 = vmatprep.subr.bf16.mxu0 %v8961_v3  ;;  %v7628_v5 = vpop.f32.mrf.mxu0  ;;  %v7660_v59 = vpop.f32.mrf.mxu1  ;;  %v8366_v0 = vld [vmem:[%s10162_s3 + $0x1a0] sm:$0xff]  }
 0x211   :  { %7674 = vmatprep.mubr.msk.bf16.mxu0 %vm1241_vm3, %v1220_v43  ;;  %7694 = vmatprep.mubr.msk.bf16.mxu1 %vm1241_vm3, %v1046_v42  ;;  %v8368_v42 = vld [vmem:[%s10162_s3 + $0x1b0] sm:$0xff]   ;;  %v8369_v43 = vld [vmem:[%s10162_s3 + $0x1b8] sm:$0xff]  }
 0x212   :  { %v1027_v17 = vpop.f32.mrf.mxu0  ;;  %v1201_v7 = vpop.f32.mrf.mxu1  ;;  %7675 = vmatmul.mubr.msk.bf16.gmra.mxu0 %vm1241_vm3, %v1221_v22  ;;  %7695 = vmatmul.mubr.msk.bf16.gmra.mxu1 %vm1241_vm3, %v1047_v63  ;;  %v8365_v63 = vld [vmem:[%s10162_s3 + $0x198] sm:$0xff]   ;;  %v8370_v22 = vld [vmem:[%s10162_s3 + $0x1c0] sm:$0xff]  }
 0x213   :  { %7711 = vmatpush3.bf16.msra.mxu0 %v8961_v3 }
 0x214   :  { %7712 = vmatprep.subr.bf16.mxu0 %v8969_v14  ;;  %v7629_v8 = vpop.f32.mrf.mxu0  ;;  %v7661_v41 = vpop.f32.mrf.mxu1 }
 0x215   :  { %v1049_v37 = vpack.c.bf16 %v7629_v8, %v7628_v5  ;;  %v1223_v9 = vpack.c.bf16 %v7661_v41, %v7660_v59  ;;  %v8371_v5 = vld [vmem:[%s10162_s3 + $0x1c8] sm:$0xff]   ;;  %v8372_v59 = vld [vmem:[%s10162_s3 + $0x1d0] sm:$0xff]  }
 0x216   :  { %v1030_v11 = vpop.f32.mrf.mxu0  ;;  %v1204_v12 = vpop.f32.mrf.mxu1 }
 0x217   :  { %v1048_v1 = vpack.c.bf16 %v1030_v11, %v1027_v17  ;;  %v1222_v2 = vpack.c.bf16 %v1204_v12, %v1201_v7  ;;  %7713 = vmatpush3.bf16.msra.mxu0 %v8969_v14 }
 0x218   :  { %7714 = vmatprep.subr.bf16.mxu0 %v10191_v60 }
 0x219   :  { %7678 = vmatprep.mubr.msk.bf16.mxu0 %vm1241_vm3, %v1222_v2  ;;  %7698 = vmatprep.mubr.msk.bf16.mxu1 %vm1241_vm3, %v1048_v1  ;;  %v8373_v2 = vld [vmem:[%s10162_s3 + $0x1d8] sm:$0xff]  }
 0x21a   :  { %7679 = vmatmul.mubr.msk.bf16.gmra.mxu0 %vm1241_vm3, %v1223_v9  ;;  %7699 = vmatmul.mubr.msk.bf16.gmra.mxu1 %vm1241_vm3, %v1049_v37 }
 0x21b   :  { %7715 = vmatpush3.bf16.msra.mxu0 %v10191_v60  ;;  %7718 = vmatprep.mubr.bf16.mxu0 %v8330_v44 }
 0x21c   :  { %7716 = vmatprep.subr.bf16.mxu0 %v8980_v6 }
 0x21f   :  { %7717 = vmatpush3.bf16.msra.mxu0 %v8980_v6 }
 0x220   :  { %7754 = vmatprep.subr.bf16.mxu0 %v8917_v13 }
 0x222   :  { %7719 = vmatmul.mubr.bf16.vlgmr.msra.gmra.mxu0 %v8331_v61 }
 0x223   :  { %7755 = vmatpush3.bf16.msra.mxu0 %v8917_v13  ;;  %7722 = vmatprep.mubr.bf16.mxu0 %v8332_v62 }
 0x224   :  { %7756 = vmatprep.subr.bf16.mxu0 %v8921_v18 }
 0x227   :  { %7757 = vmatpush3.bf16.msra.mxu0 %v8921_v18 }
 0x228   :  { %7758 = vmatprep.subr.bf16.mxu0 %v8937_v20 }
 0x22a   :  { %7723 = vmatmul.mubr.bf16.gmra.mxu0 %v8333_v10 }
 0x22b   :  { %7759 = vmatpush3.bf16.msra.mxu0 %v8937_v20  ;;  %7726 = vmatprep.mubr.bf16.mxu0 %v8334_v34 }
 0x22c   :  { %7760 = vmatprep.subr.bf16.mxu0 %v8949_v30 }
 0x22f   :  { %7761 = vmatpush3.bf16.msra.mxu0 %v8949_v30 }
 0x230   :  { %7762 = vmatprep.subr.bf16.mxu0 %v8961_v3 }
 0x232   :  { %7727 = vmatmul.mubr.bf16.gmra.mxu0 %v8335_v15 }
 0x233   :  { %7763 = vmatpush3.bf16.msra.mxu0 %v8961_v3  ;;  %7730 = vmatprep.mubr.bf16.mxu0 %v8336_v45 }
 0x234   :  { %7764 = vmatprep.subr.bf16.mxu0 %v8969_v14 }
 0x237   :  { %7765 = vmatpush3.bf16.msra.mxu0 %v8969_v14 }
 0x238   :  { %7766 = vmatprep.subr.bf16.mxu0 %v10191_v60 }
 0x23a   :  { %7731 = vmatmul.mubr.bf16.gmra.mxu0 %v8337_v46 }
 0x23b   :  { %7767 = vmatpush3.bf16.msra.mxu0 %v10191_v60  ;;  %7770 = vmatprep.mubr.bf16.mxu0 %v8338_v54 }
 0x23c   :  { %7768 = vmatprep.subr.bf16.mxu0 %v8980_v6 }
 0x23f   :  { %7769 = vmatpush3.bf16.msra.mxu0 %v8980_v6 }
 0x240   :  { %7806 = vmatprep.subr.bf16.mxu0 %v8917_v13 }
 0x242   :  { %7771 = vmatmul.mubr.bf16.vlgmr.msra.gmra.mxu0 %v8339_v55  ;;  %v8375_v55 = vld [vmem:[%s10162_s3 + $0x1e8] sm:$0xff]  }
 0x243   :  { %7807 = vmatpush3.bf16.msra.mxu0 %v8917_v13  ;;  %7774 = vmatprep.mubr.bf16.mxu0 %v8340_v56 }
 0x244   :  { %7808 = vmatprep.subr.bf16.mxu0 %v8921_v18 }
 0x247   :  { %7809 = vmatpush3.bf16.msra.mxu0 %v8921_v18 }
 0x248   :  { %7810 = vmatprep.subr.bf16.mxu0 %v8937_v20 }
 0x24a   :  { %7775 = vmatmul.mubr.bf16.gmra.mxu0 %v8341_v38 }
 0x24b   :  { %7811 = vmatpush3.bf16.msra.mxu0 %v8937_v20  ;;  %7778 = vmatprep.mubr.bf16.mxu0 %v8342_v39 }
 0x24c   :  { %7812 = vmatprep.subr.bf16.mxu0 %v8949_v30 }
 0x24f   :  { %7813 = vmatpush3.bf16.msra.mxu0 %v8949_v30 }
 0x250   :  { %7814 = vmatprep.subr.bf16.mxu0 %v8961_v3 }
 0x252   :  { %7779 = vmatmul.mubr.bf16.gmra.mxu0 %v8343_v50 }
 0x253   :  { %7815 = vmatpush3.bf16.msra.mxu0 %v8961_v3  ;;  %7782 = vmatprep.mubr.bf16.mxu0 %v8344_v51 }
 0x254   :  { %7816 = vmatprep.subr.bf16.mxu0 %v8969_v14 }
 0x257   :  { %7817 = vmatpush3.bf16.msra.mxu0 %v8969_v14 }
 0x258   :  { %7818 = vmatprep.subr.bf16.mxu0 %v10191_v60 }
 0x25a   :  { %7783 = vmatmul.mubr.bf16.gmra.mxu0 %v8345_v32 }
 0x25b   :  { %7819 = vmatpush3.bf16.msra.mxu0 %v10191_v60  ;;  %7822 = vmatprep.mubr.bf16.mxu0 %v8346_v47 }
 0x25c   :  { %7820 = vmatprep.subr.bf16.mxu0 %v8980_v6 }
 0x25f   :  { %7821 = vmatpush3.bf16.msra.mxu0 %v8980_v6 }
 0x260   :  { %7858 = vmatprep.subr.bf16.mxu0 %v8917_v13 }
 0x262   :  { %7823 = vmatmul.mubr.bf16.vlgmr.msra.gmra.mxu0 %v8347_v16 }
 0x263   :  { %7859 = vmatpush3.bf16.msra.mxu0 %v8917_v13  ;;  %7826 = vmatprep.mubr.bf16.mxu0 %v8348_v57 }
 0x264   :  { %7860 = vmatprep.subr.bf16.mxu0 %v8921_v18 }
 0x267   :  { %7861 = vmatpush3.bf16.msra.mxu0 %v8921_v18 }
 0x268   :  { %7862 = vmatprep.subr.bf16.mxu0 %v8937_v20 }
 0x26a   :  { %7827 = vmatmul.mubr.bf16.gmra.mxu0 %v8349_v25  ;;  %v8377_v25 = vld [vmem:[%s10162_s3 + $0x1f8] sm:$0xff]  }
 0x26b   :  { %7863 = vmatpush3.bf16.msra.mxu0 %v8937_v20  ;;  %7830 = vmatprep.mubr.bf16.mxu0 %v8350_v33 }
 0x26c   :  { %7864 = vmatprep.subr.bf16.mxu0 %v8949_v30 }
 0x26f   :  { %7865 = vmatpush3.bf16.msra.mxu0 %v8949_v30 }
 0x270   :  { %7866 = vmatprep.subr.bf16.mxu0 %v8961_v3 }
 0x272   :  { %7831 = vmatmul.mubr.bf16.gmra.mxu0 %v8351_v40 }
 0x273   :  { %7867 = vmatpush3.bf16.msra.mxu0 %v8961_v3  ;;  %7834 = vmatprep.mubr.bf16.mxu0 %v8352_v19 }
 0x274   :  { %7868 = vmatprep.subr.bf16.mxu0 %v8969_v14 }
 0x277   :  { %7869 = vmatpush3.bf16.msra.mxu0 %v8969_v14 }
 0x278   :  { %7870 = vmatprep.subr.bf16.mxu0 %v10191_v60 }
 0x27a   :  { %7835 = vmatmul.mubr.bf16.gmra.mxu0 %v8353_v23 }
 0x27b   :  { %7871 = vmatpush3.bf16.msra.mxu0 %v10191_v60  ;;  %7874 = vmatprep.mubr.bf16.mxu0 %v8354_v52 }
 0x27c   :  { %7872 = vmatprep.subr.bf16.mxu0 %v8980_v6 }
 0x27f   :  { %7873 = vmatpush3.bf16.msra.mxu0 %v8980_v6 }
 0x280   :  { %7910 = vmatprep.subr.bf16.mxu0 %v8917_v13 }
 0x282   :  { %7875 = vmatmul.mubr.bf16.vlgmr.msra.gmra.mxu0 %v8355_v53 }
 0x283   :  { %7911 = vmatpush3.bf16.msra.mxu0 %v8917_v13  ;;  %7878 = vmatprep.mubr.bf16.mxu0 %v8356_v26 }
 0x284   :  { %7912 = vmatprep.subr.bf16.mxu0 %v8921_v18 }
 0x287   :  { %7913 = vmatpush3.bf16.msra.mxu0 %v8921_v18 }
 0x288   :  { %7914 = vmatprep.subr.bf16.mxu0 %v8937_v20 }
 0x28a   :  { %7879 = vmatmul.mubr.bf16.gmra.mxu0 %v8357_v36 }
 0x28b   :  { %7915 = vmatpush3.bf16.msra.mxu0 %v8937_v20  ;;  %7882 = vmatprep.mubr.bf16.mxu0 %v8358_v24 }
 0x28c   :  { %7916 = vmatprep.subr.bf16.mxu0 %v8949_v30 }
 0x28f   :  { %7917 = vmatpush3.bf16.msra.mxu0 %v8949_v30 }
 0x290   :  { %7918 = vmatprep.subr.bf16.mxu0 %v8961_v3 }
 0x292   :  { %7883 = vmatmul.mubr.bf16.gmra.mxu0 %v8359_v27  ;;  %v8379_v27 = vld [vmem:[%s10162_s3 + $0x208] sm:$0xff]  }
 0x293   :  { %7919 = vmatpush3.bf16.msra.mxu0 %v8961_v3  ;;  %7886 = vmatprep.mubr.bf16.mxu0 %v8360_v48 }
 0x294   :  { %7920 = vmatprep.subr.bf16.mxu0 %v8969_v14 }
 0x297   :  { %7921 = vmatpush3.bf16.msra.mxu0 %v8969_v14 }
 0x298   :  { %7922 = vmatprep.subr.bf16.mxu0 %v10191_v60 }
 0x29a   :  { %7887 = vmatmul.mubr.bf16.gmra.mxu0 %v8361_v49 }
 0x29b   :  { %7923 = vmatpush3.bf16.msra.mxu0 %v10191_v60  ;;  %7926 = vmatprep.mubr.bf16.mxu0 %v8362_v29 }
 0x29c   :  { %7924 = vmatprep.subr.bf16.mxu0 %v8980_v6 }
 0x29f   :  { %7925 = vmatpush3.bf16.msra.mxu0 %v8980_v6 }
 0x2a0   :  { %7962 = vmatprep.subr.bf16.mxu0 %v8917_v13 }
 0x2a2   :  { %7927 = vmatmul.mubr.bf16.vlgmr.msra.gmra.mxu0 %v8363_v31 }
 0x2a3   :  { %7963 = vmatpush3.bf16.msra.mxu0 %v8917_v13  ;;  %7930 = vmatprep.mubr.bf16.mxu0 %v8364_v21 }
 0x2a4   :  { %7964 = vmatprep.subr.bf16.mxu0 %v8921_v18 }
 0x2a7   :  { %7965 = vmatpush3.bf16.msra.mxu0 %v8921_v18 }
 0x2a8   :  { %7966 = vmatprep.subr.bf16.mxu0 %v8937_v20 }
 0x2aa   :  { %7931 = vmatmul.mubr.bf16.gmra.mxu0 %v8365_v63  ;;  %v8383_v63 = vld [vmem:[%s10162_s3 + $0x218] sm:$0xff]  }
 0x2ab   :  { %7967 = vmatpush3.bf16.msra.mxu0 %v8937_v20  ;;  %7934 = vmatprep.mubr.bf16.mxu0 %v8366_v0  ;;  %v8384_v0 = vld [vmem:[%s10162_s3 + $0x220] sm:$0xff]  }
 0x2ac   :  { %7968 = vmatprep.subr.bf16.mxu0 %v8949_v30 }
 0x2af   :  { %7969 = vmatpush3.bf16.msra.mxu0 %v8949_v30 }
 0x2b0   :  { %7970 = vmatprep.subr.bf16.mxu0 %v8961_v3 }
 0x2b2   :  { %7935 = vmatmul.mubr.bf16.gmra.mxu0 %v8367_v4 }
 0x2b3   :  { %7971 = vmatpush3.bf16.msra.mxu0 %v8961_v3  ;;  %7938 = vmatprep.mubr.bf16.mxu0 %v8368_v42 }
 0x2b4   :  { %7972 = vmatprep.subr.bf16.mxu0 %v8969_v14 }
 0x2b7   :  { %7973 = vmatpush3.bf16.msra.mxu0 %v8969_v14 }
 0x2b8   :  { %7974 = vmatprep.subr.bf16.mxu0 %v10191_v60 }
 0x2ba   :  { %7939 = vmatmul.mubr.bf16.gmra.mxu0 %v8369_v43 }
 0x2bb   :  { %7975 = vmatpush3.bf16.msra.mxu0 %v10191_v60  ;;  %7978 = vmatprep.mubr.bf16.mxu0 %v8370_v22  ;;  %v8389_v22 = vld [vmem:[%s10163_s4 + $0x30] sm:$0xff]  }
 0x2bc   :  { %7976 = vmatprep.subr.bf16.mxu0 %v8980_v6 }
 0x2bf   :  { %7977 = vmatpush3.bf16.msra.mxu0 %v8980_v6 }
 0x2c0   :  { %8014 = vmatprep.subr.bf16.mxu0 %v8917_v13 }
 0x2c2   :  { %v7668_v17 = vpop.f32.mrf.mxu0  ;;  %v7688_v7 = vpop.f32.mrf.mxu1  ;;  %7979 = vmatmul.mubr.bf16.vlgmr.msra.gmra.mxu0 %v8371_v5 }
 0x2c3   :  { %v9296_v8 = vadd.f32 %v7688_v7, %v7668_v17  ;;  %8015 = vmatpush3.bf16.msra.mxu0 %v8917_v13  ;;  %7982 = vmatprep.mubr.bf16.mxu0 %v8372_v59  ;;  %v8374_v13 = vld [vmem:[%s10162_s3 + $0x1e0] sm:$0xff]   ;;  %v8385_v17 = vld [vmem:[%s10162_s3 + $0x228] sm:$0xff]  }
 0x2c4   :  { %8016 = vmatprep.subr.bf16.mxu0 %v8921_v18  ;;  %v1300_v41 = vpop.f32.mrf.mxu0  ;;  %v1433_v37 = vpop.f32.mrf.mxu1  ;;  %v8390_v7 = vld [vmem:[%s10163_s4 + $0x48] sm:$0xff]  }
 0x2c5   :  { %v9300_v11 = vadd.f32 %v1433_v37, %v1300_v41  ;;  %v8386_v41 = vld [vmem:[%s10162_s3 + $0x230] sm:$0xff]  }
 0x2c6   :  { %v7669_v12 = vpop.f32.mrf.mxu0  ;;  %v7689_v1 = vpop.f32.mrf.mxu1 }
 0x2c7   :  { %v9305_v44 = vadd.f32 %v7689_v1, %v7669_v12  ;;  %8017 = vmatpush3.bf16.msra.mxu0 %v8921_v18 }
 0x2c8   :  { %8018 = vmatprep.subr.bf16.mxu0 %v8937_v20  ;;  %v9312_v9 = vpop.f32.mrf.mxu0  ;;  %v9314_v61 = vpop.f32.mrf.mxu1 }
 0x2ca   :  { %v7672_v62 = vpop.f32.mrf.mxu0  ;;  %v7692_v10 = vpop.f32.mrf.mxu1  ;;  %7983 = vmatmul.mubr.bf16.gmra.mxu0 %v8373_v2 }
 0x2cb   :  { %v9316_v34 = vadd.f32 %v7692_v10, %v7672_v62  ;;  %8019 = vmatpush3.bf16.msra.mxu0 %v8937_v20  ;;  %7986 = vmatprep.mubr.bf16.mxu0 %v8374_v13  ;;  %v8376_v20 = vld [vmem:[%s10162_s3 + $0x1f0] sm:$0xff]   ;;  %v8387_v62 = vld [vmem:[%s10162_s3 + $0x238] sm:$0xff]  }
 0x2cc   :  { %8020 = vmatprep.subr.bf16.mxu0 %v8949_v30  ;;  %v1316_v18 = vpop.f32.mrf.mxu0  ;;  %v1449_v15 = vpop.f32.mrf.mxu1 }
 0x2cd   :  { %v9320_v45 = vadd.f32 %v1449_v15, %v1316_v18 }
 0x2ce   :  { %v7673_v46 = vpop.f32.mrf.mxu0  ;;  %v7693_v54 = vpop.f32.mrf.mxu1 }
 0x2cf   :  { %v9325_v56 = vadd.f32 %v7693_v54, %v7673_v46  ;;  %8021 = vmatpush3.bf16.msra.mxu0 %v8949_v30 }
 0x2d0   :  { %8022 = vmatprep.subr.bf16.mxu0 %v8961_v3  ;;  %v9332_v38 = vpop.f32.mrf.mxu0  ;;  %v9334_v39 = vpop.f32.mrf.mxu1 }
 0x2d2   :  { %v7676_v50 = vpop.f32.mrf.mxu0  ;;  %v7696_v51 = vpop.f32.mrf.mxu1  ;;  %7987 = vmatmul.mubr.bf16.gmra.mxu0 %v8375_v55 }
 0x2d3   :  { %v9336_v32 = vadd.f32 %v7696_v51, %v7676_v50  ;;  %8023 = vmatpush3.bf16.msra.mxu0 %v8961_v3  ;;  %7990 = vmatprep.mubr.bf16.mxu0 %v8376_v20  ;;  %v8378_v3 = vld [vmem:[%s10162_s3 + $0x200] sm:$0xff]  }
 0x2d4   :  { %8024 = vmatprep.subr.bf16.mxu0 %v8969_v14  ;;  %v1332_v30 = vpop.f32.mrf.mxu0  ;;  %v1465_v47 = vpop.f32.mrf.mxu1 }
 0x2d5   :  { %v9340_v16 = vadd.f32 %v1465_v47, %v1332_v30 }
 0x2d6   :  { %v7677_v57 = vpop.f32.mrf.mxu0  ;;  %v7697_v58 = vpop.f32.mrf.mxu1 }
 0x2d7   :  { %v9345_v33 = vadd.f32 %v7697_v58, %v7677_v57  ;;  %8025 = vmatpush3.bf16.msra.mxu0 %v8969_v14 }
 0x2d8   :  { %8026 = vmatprep.subr.bf16.mxu0 %v10191_v60  ;;  %v9352_v35 = vpop.f32.mrf.mxu0  ;;  %v9354_v40 = vpop.f32.mrf.mxu1 }
 0x2da   :  { %v7680_v19 = vpop.f32.mrf.mxu0  ;;  %v7700_v23 = vpop.f32.mrf.mxu1  ;;  %7991 = vmatmul.mubr.bf16.gmra.mxu0 %v8377_v25 }
 0x2db   :  { %v9356_v52 = vadd.f32 %v7700_v23, %v7680_v19  ;;  %8027 = vmatpush3.bf16.msra.mxu0 %v10191_v60  ;;  %8030 = vmatprep.mubr.bf16.mxu0 %v8378_v3  ;;  %v8382_v60 = vld [vmem:[%s10162_s3 + $0x210] sm:$0xff]   ;;  %v8391_v23 = vld [vmem:[%s10163_s4 + $0x40] sm:$0xff]  }
 0x2dc   :  { %8028 = vmatprep.subr.bf16.mxu0 %v8980_v6  ;;  %v1348_v14 = vpop.f32.mrf.mxu0  ;;  %v1481_v53 = vpop.f32.mrf.mxu1 }
 0x2dd   :  { %v9360_v26 = vadd.f32 %v1481_v53, %v1348_v14 }
 0x2de   :  { %v7681_v36 = vpop.f32.mrf.mxu0  ;;  %v7701_v24 = vpop.f32.mrf.mxu1 }
 0x2df   :  { %v9365_v48 = vadd.f32 %v7701_v24, %v7681_v36  ;;  %8029 = vmatpush3.bf16.msra.mxu0 %v8980_v6  ;;  %v8392_v36 = vld [vmem:[%s10163_s4 + $0x58] sm:$0xff]  }
 0x2e0   :  { %v9371_v49 = vpop.f32.mrf.mxu0 }
 0x2e2   :  { %v7720_v29 = vpop.f32.mrf.mxu0  ;;  %8031 = vmatmul.mubr.bf16.vlgmr.msra.gmra.mxu0 %v8379_v27 }
 0x2e3   :  { %8034 = vmatprep.mubr.bf16.mxu0 %v8382_v60 }
 0x2e4   :  { %v1595_v31 = vpop.f32.mrf.mxu0 }
 0x2e6   :  { %v7721_v21 = vpop.f32.mrf.mxu0 }
 0x2e7   :  { %v1659_v42 = vpack.c.bf16 %v7721_v21, %v7720_v29 }
 0x2e8   :  { %v1598_v6 = vpop.f32.mrf.mxu0 }
 0x2e9   :  { %v1658_v4 = vpack.c.bf16 %v1598_v6, %v1595_v31 }
 0x2ea   :  { %v7724_v43 = vpop.f32.mrf.mxu0  ;;  %8035 = vmatmul.mubr.bf16.gmra.mxu0 %v8383_v63 }
 0x2eb   :  { %7738 = vmatprep.mubr.msk.bf16.mxu1 %vm1241_vm3, %v1658_v4  ;;  %8038 = vmatprep.mubr.bf16.mxu0 %v8384_v0 }
 0x2ec   :  { %v1611_v5 = vpop.f32.mrf.mxu0  ;;  %7739 = vmatmul.mubr.msk.bf16.vlgmr.msra.gmra.mxu1 %vm1241_vm3, %v1659_v42 }
 0x2ed   :  { %7787 = vmatpush3.bf16.msra.mxu1 %v9214_v28 }
 0x2ee   :  { %v7725_v59 = vpop.f32.mrf.mxu0  ;;  %7788 = vmatprep.subr.bf16.mxu1 %v8389_v22 }
 0x2ef   :  { %v1661_v1 = vpack.c.bf16 %v7725_v59, %v7724_v43 }
 0x2f0   :  { %v1614_v37 = vpop.f32.mrf.mxu0 }
 0x2f1   :  { %v1660_v12 = vpack.c.bf16 %v1614_v37, %v1611_v5  ;;  %7789 = vmatpush3.bf16.msra.mxu1 %v8389_v22 }
 0x2f2   :  { %v7728_v2 = vpop.f32.mrf.mxu0  ;;  %8039 = vmatmul.mubr.bf16.gmra.mxu0 %v8385_v17  ;;  %7838 = vmatprep.subr.bf16.mxu1 %v8390_v7 }
 0x2f3   :  { %7742 = vmatprep.mubr.msk.bf16.mxu1 %vm1241_vm3, %v1660_v12  ;;  %8042 = vmatprep.mubr.bf16.mxu0 %v8386_v41 }
 0x2f4   :  { %v1627_v28 = vpop.f32.mrf.mxu0  ;;  %7743 = vmatmul.mubr.msk.bf16.gmra.mxu1 %vm1241_vm3, %v1661_v1 }
 0x2f6   :  { %v7729_v13 = vpop.f32.mrf.mxu0 }
 0x2f7   :  { %v1663_v15 = vpack.c.bf16 %v7729_v13, %v7728_v2 }
 0x2f8   :  { %v1630_v10 = vpop.f32.mrf.mxu0 }
 0x2f9   :  { %v1662_v18 = vpack.c.bf16 %v1630_v10, %v1627_v28  ;;  %v8393_v28 = vld [vmem:[%s10163_s4 + $0x50] sm:$0xff]   ;;  %v8394_v10 = vld [vmem:[%s10163_s4 + $0x68] sm:$0xff]  }
 0x2fa   :  { %v7732_v46 = vpop.f32.mrf.mxu0  ;;  %8043 = vmatmul.mubr.bf16.gmra.mxu0 %v8387_v62 }
 0x2fb   :  { %7746 = vmatprep.mubr.msk.bf16.mxu1 %vm1241_vm3, %v1662_v18 }
 0x2fc   :  { %v1643_v54 = vpop.f32.mrf.mxu0  ;;  %7747 = vmatmul.mubr.msk.bf16.gmra.mxu1 %vm1241_vm3, %v1663_v15 }
 0x2fe   :  { %v7733_v55 = vpop.f32.mrf.mxu0 }
 0x2ff   :  { %v1665_v51 = vpack.c.bf16 %v7733_v55, %v7732_v46 }
 0x300   :  { %v1646_v20 = vpop.f32.mrf.mxu0 }
 0x301   :  { %v1664_v50 = vpack.c.bf16 %v1646_v20, %v1643_v54 }
 0x302   :  { %v7772_v30 = vpop.f32.mrf.mxu0 }
 0x303   :  { %7750 = vmatprep.mubr.msk.bf16.mxu1 %vm1241_vm3, %v1664_v50 }
 0x304   :  { %7751 = vmatmul.mubr.msk.bf16.gmra.mxu1 %vm1241_vm3, %v1665_v51  ;;  %v1919_v47 = vpop.f32.mrf.mxu0 }
 0x306   :  { %v7773_v57 = vpop.f32.mrf.mxu0 }
 0x307   :  { %v1983_v3 = vpack.c.bf16 %v7773_v57, %v7772_v30 }
 0x308   :  { %v1922_v58 = vpop.f32.mrf.mxu0 }
 0x309   :  { %v1982_v25 = vpack.c.bf16 %v1922_v58, %v1919_v47 }
 0x30a   :  { %v7776_v19 = vpop.f32.mrf.mxu0 }
 0x30b   :  { %7790 = vmatprep.mubr.msk.bf16.mxu1 %vm1241_vm3, %v1982_v25 }
 0x30c   :  { %v1935_v14 = vpop.f32.mrf.mxu0  ;;  %7791 = vmatmul.mubr.msk.bf16.vlgmr.msra.gmra.mxu1 %vm1241_vm3, %v1983_v3 }
 0x30d   :  { %7839 = vmatpush3.bf16.msra.mxu1 %v8390_v7 }
 0x30e   :  { %v7777_v53 = vpop.f32.mrf.mxu0  ;;  %7840 = vmatprep.subr.bf16.mxu1 %v8391_v23 }
 0x30f   :  { %v1985_v60 = vpack.c.bf16 %v7777_v53, %v7776_v19 }
 0x310   :  { %v1938_v24 = vpop.f32.mrf.mxu0 }
 0x311   :  { %v1984_v27 = vpack.c.bf16 %v1938_v24, %v1935_v14  ;;  %7841 = vmatpush3.bf16.msra.mxu1 %v8391_v23 }
 0x312   :  { %v7780_v29 = vpop.f32.mrf.mxu0  ;;  %7890 = vmatprep.subr.bf16.mxu1 %v8392_v36 }
 0x313   :  { %7794 = vmatprep.mubr.msk.bf16.mxu1 %vm1241_vm3, %v1984_v27 }
 0x314   :  { %v1951_v31 = vpop.f32.mrf.mxu0  ;;  %7795 = vmatmul.mubr.msk.bf16.gmra.mxu1 %vm1241_vm3, %v1985_v60 }
 0x316   :  { %v7781_v21 = vpop.f32.mrf.mxu0 }
 0x317   :  { %v1987_v6 = vpack.c.bf16 %v7781_v21, %v7780_v29  ;;  %v8395_v29 = vld [vmem:[%s10163_s4 + $0x60] sm:$0xff]  }
 0x318   :  { %v1954_v63 = vpop.f32.mrf.mxu0 }
 0x319   :  { %v1986_v0 = vpack.c.bf16 %v1954_v63, %v1951_v31  ;;  %v8396_v63 = vld [vmem:[%s10163_s4 + $0x78] sm:$0xff]  }
 0x31a   :  { %v7784_v4 = vpop.f32.mrf.mxu0 }
 0x31b   :  { %7798 = vmatprep.mubr.msk.bf16.mxu1 %vm1241_vm3, %v1986_v0 }
 0x31c   :  { %v1967_v42 = vpop.f32.mrf.mxu0  ;;  %7799 = vmatmul.mubr.msk.bf16.gmra.mxu1 %vm1241_vm3, %v1987_v6 }
 0x31e   :  { %v7785_v43 = vpop.f32.mrf.mxu0 }
 0x31f   :  { %v1989_v59 = vpack.c.bf16 %v7785_v43, %v7784_v4 }
 0x320   :  { %v1970_v22 = vpop.f32.mrf.mxu0 }
 0x321   :  { %v1988_v5 = vpack.c.bf16 %v1970_v22, %v1967_v42 }
 0x322   :  { %v7824_v17 = vpop.f32.mrf.mxu0 }
 0x323   :  { %7802 = vmatprep.mubr.msk.bf16.mxu1 %vm1241_vm3, %v1988_v5 }
 0x324   :  { %7803 = vmatmul.mubr.msk.bf16.gmra.mxu1 %vm1241_vm3, %v1989_v59  ;;  %v2243_v7 = vpop.f32.mrf.mxu0 }
 0x326   :  { %v7825_v41 = vpop.f32.mrf.mxu0 }
 0x327   :  { %v2307_v1 = vpack.c.bf16 %v7825_v41, %v7824_v17 }
 0x328   :  { %v2246_v37 = vpop.f32.mrf.mxu0 }
 0x329   :  { %v2306_v12 = vpack.c.bf16 %v2246_v37, %v2243_v7 }
 0x32a   :  { %v7828_v2 = vpop.f32.mrf.mxu0 }
 0x32b   :  { %7842 = vmatprep.mubr.msk.bf16.mxu1 %vm1241_vm3, %v2306_v12 }
 0x32c   :  { %v2259_v13 = vpop.f32.mrf.mxu0  ;;  %7843 = vmatmul.mubr.msk.bf16.vlgmr.msra.gmra.mxu1 %vm1241_vm3, %v2307_v1 }
 0x32d   :  { %7891 = vmatpush3.bf16.msra.mxu1 %v8392_v36 }
 0x32e   :  { %v7829_v62 = vpop.f32.mrf.mxu0  ;;  %7892 = vmatprep.subr.bf16.mxu1 %v8393_v28 }
 0x32f   :  { %v2309_v46 = vpack.c.bf16 %v7829_v62, %v7828_v2 }
 0x330   :  { %v2262_v18 = vpop.f32.mrf.mxu0 }
 0x331   :  { %v2308_v15 = vpack.c.bf16 %v2262_v18, %v2259_v13  ;;  %7893 = vmatpush3.bf16.msra.mxu1 %v8393_v28 }
 0x332   :  { %v7832_v54 = vpop.f32.mrf.mxu0  ;;  %7942 = vmatprep.subr.bf16.mxu1 %v8394_v10 }
 0x333   :  { %7846 = vmatprep.mubr.msk.bf16.mxu1 %vm1241_vm3, %v2308_v15 }
 0x334   :  { %v2275_v55 = vpop.f32.mrf.mxu0  ;;  %7847 = vmatmul.mubr.msk.bf16.gmra.mxu1 %vm1241_vm3, %v2309_v46 }
 0x336   :  { %v7833_v20 = vpop.f32.mrf.mxu0 }
 0x337   :  { %v2311_v30 = vpack.c.bf16 %v7833_v20, %v7832_v54  ;;  %v8397_v54 = vld [vmem:[%s10163_s4 + $0x70] sm:$0xff]  }
 0x338   :  { %v2278_v50 = vpop.f32.mrf.mxu0 }
 0x339   :  { %v2310_v51 = vpack.c.bf16 %v2278_v50, %v2275_v55  ;;  %v8398_v50 = vld [vmem:[%s10163_s4 + $0x88] sm:$0xff]  }
 0x33a   :  { %v7836_v47 = vpop.f32.mrf.mxu0 }
 0x33b   :  { %7850 = vmatprep.mubr.msk.bf16.mxu1 %vm1241_vm3, %v2310_v51 }
 0x33c   :  { %v2291_v57 = vpop.f32.mrf.mxu0  ;;  %7851 = vmatmul.mubr.msk.bf16.gmra.mxu1 %vm1241_vm3, %v2311_v30 }
 0x33e   :  { %v7837_v58 = vpop.f32.mrf.mxu0 }
 0x33f   :  { %v2313_v19 = vpack.c.bf16 %v7837_v58, %v7836_v47 }
 0x340   :  { %v2294_v25 = vpop.f32.mrf.mxu0 }
 0x341   :  { %v2312_v3 = vpack.c.bf16 %v2294_v25, %v2291_v57 }
 0x342   :  { %v7876_v23 = vpop.f32.mrf.mxu0 }
 0x343   :  { %7854 = vmatprep.mubr.msk.bf16.mxu1 %vm1241_vm3, %v2312_v3 }
 0x344   :  { %7855 = vmatmul.mubr.msk.bf16.gmra.mxu1 %vm1241_vm3, %v2313_v19  ;;  %v2567_v14 = vpop.f32.mrf.mxu0 }
 0x346   :  { %v7877_v53 = vpop.f32.mrf.mxu0 }
 0x347   :  { %v2631_v27 = vpack.c.bf16 %v7877_v53, %v7876_v23 }
 0x348   :  { %v2570_v36 = vpop.f32.mrf.mxu0 }
 0x349   :  { %v2630_v24 = vpack.c.bf16 %v2570_v36, %v2567_v14 }
 0x34a   :  { %v7880_v60 = vpop.f32.mrf.mxu0 }
 0x34b   :  { %7894 = vmatprep.mubr.msk.bf16.mxu1 %vm1241_vm3, %v2630_v24 }
 0x34c   :  { %v2583_v31 = vpop.f32.mrf.mxu0  ;;  %7895 = vmatmul.mubr.msk.bf16.vlgmr.msra.gmra.mxu1 %vm1241_vm3, %v2631_v27 }
 0x34d   :  { %7943 = vmatpush3.bf16.msra.mxu1 %v8394_v10 }
 0x34e   :  { %v7881_v21 = vpop.f32.mrf.mxu0  ;;  %7944 = vmatprep.subr.bf16.mxu1 %v8395_v29 }
 0x34f   :  { %v2633_v4 = vpack.c.bf16 %v7881_v21, %v7880_v60 }
 0x350   :  { %v2586_v0 = vpop.f32.mrf.mxu0 }
 0x351   :  { %v2632_v6 = vpack.c.bf16 %v2586_v0, %v2583_v31  ;;  %7945 = vmatpush3.bf16.msra.mxu1 %v8395_v29 }
 0x352   :  { %v7884_v42 = vpop.f32.mrf.mxu0  ;;  %7994 = vmatprep.subr.bf16.mxu1 %v8396_v63 }
 0x353   :  { %7898 = vmatprep.mubr.msk.bf16.mxu1 %vm1241_vm3, %v2632_v6 }
 0x354   :  { %v2599_v43 = vpop.f32.mrf.mxu0  ;;  %7899 = vmatmul.mubr.msk.bf16.gmra.mxu1 %vm1241_vm3, %v2633_v4 }
 0x356   :  { %v7885_v22 = vpop.f32.mrf.mxu0 }
 0x357   :  { %v2635_v17 = vpack.c.bf16 %v7885_v22, %v7884_v42  ;;  %v8399_v42 = vld [vmem:[%s10163_s4 + $0x80] sm:$0xff]  }
 0x358   :  { %v2602_v5 = vpop.f32.mrf.mxu0 }
 0x359   :  { %v2634_v59 = vpack.c.bf16 %v2602_v5, %v2599_v43 }
 0x35a   :  { %v7888_v7 = vpop.f32.mrf.mxu0 }
 0x35b   :  { %7902 = vmatprep.mubr.msk.bf16.mxu1 %vm1241_vm3, %v2634_v59 }
 0x35c   :  { %v2615_v41 = vpop.f32.mrf.mxu0  ;;  %7903 = vmatmul.mubr.msk.bf16.gmra.mxu1 %vm1241_vm3, %v2635_v17 }
 0x35e   :  { %v7889_v37 = vpop.f32.mrf.mxu0 }
 0x35f   :  { %v2637_v2 = vpack.c.bf16 %v7889_v37, %v7888_v7 }
 0x360   :  { %v2618_v12 = vpop.f32.mrf.mxu0 }
 0x361   :  { %v2636_v1 = vpack.c.bf16 %v2618_v12, %v2615_v41 }
 0x362   :  { %v7928_v28 = vpop.f32.mrf.mxu0 }
 0x363   :  { %7906 = vmatprep.mubr.msk.bf16.mxu1 %vm1241_vm3, %v2636_v1 }
 0x364   :  { %7907 = vmatmul.mubr.msk.bf16.gmra.mxu1 %vm1241_vm3, %v2637_v2  ;;  %v2891_v13 = vpop.f32.mrf.mxu0 }
 0x366   :  { %v7929_v62 = vpop.f32.mrf.mxu0 }
 0x367   :  { %v2955_v15 = vpack.c.bf16 %v7929_v62, %v7928_v28 }
 0x368   :  { %v2894_v10 = vpop.f32.mrf.mxu0 }
 0x369   :  { %v2954_v18 = vpack.c.bf16 %v2894_v10, %v2891_v13 }
 0x36a   :  { %v7932_v46 = vpop.f32.mrf.mxu0 }
 0x36b   :  { %7946 = vmatprep.mubr.msk.bf16.mxu1 %vm1241_vm3, %v2954_v18 }
 0x36c   :  { %v2907_v55 = vpop.f32.mrf.mxu0  ;;  %7947 = vmatmul.mubr.msk.bf16.vlgmr.msra.gmra.mxu1 %vm1241_vm3, %v2955_v15 }
 0x36d   :  { %7995 = vmatpush3.bf16.msra.mxu1 %v8396_v63 }
 0x36e   :  { %v7933_v20 = vpop.f32.mrf.mxu0  ;;  %7996 = vmatprep.subr.bf16.mxu1 %v8397_v54 }
 0x36f   :  { %v2957_v47 = vpack.c.bf16 %v7933_v20, %v7932_v46 }
 0x370   :  { %v2910_v51 = vpop.f32.mrf.mxu0 }
 0x371   :  { %v2956_v30 = vpack.c.bf16 %v2910_v51, %v2907_v55  ;;  %7997 = vmatpush3.bf16.msra.mxu1 %v8397_v54  ;;  %v9470_v51 = vpop.f32.mrf.mxu1 }
 0x372   :  { %v7936_v57 = vpop.f32.mrf.mxu0  ;;  %8046 = vmatprep.subr.bf16.mxu1 %v8398_v50 }
 0x373   :  { %7950 = vmatprep.mubr.msk.bf16.mxu1 %vm1241_vm3, %v2956_v30 }
 0x374   :  { %v2923_v58 = vpop.f32.mrf.mxu0  ;;  %7951 = vmatmul.mubr.msk.bf16.gmra.mxu1 %vm1241_vm3, %v2957_v47 }
 0x376   :  { %v7937_v25 = vpop.f32.mrf.mxu0 }
 0x377   :  { %v2959_v23 = vpack.c.bf16 %v7937_v25, %v7936_v57 }
 0x378   :  { %v2926_v3 = vpop.f32.mrf.mxu0 }
 0x379   :  { %v2958_v19 = vpack.c.bf16 %v2926_v3, %v2923_v58 }
 0x37a   :  { %v7940_v14 = vpop.f32.mrf.mxu0 }
 0x37b   :  { %7954 = vmatprep.mubr.msk.bf16.mxu1 %vm1241_vm3, %v2958_v19 }
 0x37c   :  { %v2939_v53 = vpop.f32.mrf.mxu0  ;;  %7955 = vmatmul.mubr.msk.bf16.gmra.mxu1 %vm1241_vm3, %v2959_v23 }
 0x37e   :  { %v7941_v36 = vpop.f32.mrf.mxu0 }
 0x37f   :  { %v2961_v60 = vpack.c.bf16 %v7941_v36, %v7940_v14 }
 0x380   :  { %v2942_v24 = vpop.f32.mrf.mxu0 }
 0x381   :  { %v2960_v27 = vpack.c.bf16 %v2942_v24, %v2939_v53 }
 0x382   :  { %v7980_v29 = vpop.f32.mrf.mxu0 }
 0x383   :  { %7958 = vmatprep.mubr.msk.bf16.mxu1 %vm1241_vm3, %v2960_v27 }
 0x384   :  { %7959 = vmatmul.mubr.msk.bf16.gmra.mxu1 %vm1241_vm3, %v2961_v60  ;;  %v3215_v31 = vpop.f32.mrf.mxu0 }
 0x386   :  { %v7981_v21 = vpop.f32.mrf.mxu0 }
 0x387   :  { %v3279_v6 = vpack.c.bf16 %v7981_v21, %v7980_v29 }
 0x388   :  { %v3218_v63 = vpop.f32.mrf.mxu0 }
 0x389   :  { %v3278_v0 = vpack.c.bf16 %v3218_v63, %v3215_v31 }
 0x38a   :  { %v7984_v4 = vpop.f32.mrf.mxu0 }
 0x38b   :  { %7998 = vmatprep.mubr.msk.bf16.mxu1 %vm1241_vm3, %v3278_v0 }
 0x38c   :  { %v3231_v43 = vpop.f32.mrf.mxu0  ;;  %7999 = vmatmul.mubr.msk.bf16.vlgmr.msra.gmra.mxu1 %vm1241_vm3, %v3279_v6 }
 0x38d   :  { %8047 = vmatpush3.bf16.msra.mxu1 %v8398_v50 }
 0x38e   :  { %v7985_v22 = vpop.f32.mrf.mxu0  ;;  %8048 = vmatprep.subr.bf16.mxu1 %v8399_v42 }
 0x38f   :  { %v3281_v17 = vpack.c.bf16 %v7985_v22, %v7984_v4 }
 0x390   :  { %v3234_v5 = vpop.f32.mrf.mxu0 }
 0x391   :  { %v3280_v59 = vpack.c.bf16 %v3234_v5, %v3231_v43  ;;  %8049 = vmatpush3.bf16.msra.mxu1 %v8399_v42 }
 0x392   :  { %v7988_v7 = vpop.f32.mrf.mxu0 }
 0x393   :  { %8002 = vmatprep.mubr.msk.bf16.mxu1 %vm1241_vm3, %v3280_v59 }
 0x394   :  { %v3247_v41 = vpop.f32.mrf.mxu0  ;;  %8003 = vmatmul.mubr.msk.bf16.gmra.mxu1 %vm1241_vm3, %v3281_v17 }
 0x396   :  { %v7989_v37 = vpop.f32.mrf.mxu0 }
 0x397   :  { %v3283_v2 = vpack.c.bf16 %v7989_v37, %v7988_v7 }
 0x398   :  { %v3250_v12 = vpop.f32.mrf.mxu0 }
 0x399   :  { %v3282_v1 = vpack.c.bf16 %v3250_v12, %v3247_v41 }
 0x39a   :  { %v7992_v28 = vpop.f32.mrf.mxu0 }
 0x39b   :  { %8006 = vmatprep.mubr.msk.bf16.mxu1 %vm1241_vm3, %v3282_v1 }
 0x39c   :  { %v3263_v13 = vpop.f32.mrf.mxu0  ;;  %8007 = vmatmul.mubr.msk.bf16.gmra.mxu1 %vm1241_vm3, %v3283_v2 }
 0x39e   :  { %v7993_v62 = vpop.f32.mrf.mxu0 }
 0x39f   :  { %v3285_v15 = vpack.c.bf16 %v7993_v62, %v7992_v28 }
 0x3a0   :  { %v3266_v10 = vpop.f32.mrf.mxu0 }
 0x3a1   :  { %v3284_v18 = vpack.c.bf16 %v3266_v10, %v3263_v13 }
 0x3a2   :  { %v8032_v46 = vpop.f32.mrf.mxu0 }
 0x3a3   :  { %8010 = vmatprep.mubr.msk.bf16.mxu1 %vm1241_vm3, %v3284_v18 }
 0x3a4   :  { %8011 = vmatmul.mubr.msk.bf16.gmra.mxu1 %vm1241_vm3, %v3285_v15  ;;  %v3539_v54 = vpop.f32.mrf.mxu0 }
 0x3a6   :  { %v8033_v55 = vpop.f32.mrf.mxu0 }
 0x3a7   :  { %v3603_v30 = vpack.c.bf16 %v8033_v55, %v8032_v46 }
 0x3a8   :  { %v3542_v20 = vpop.f32.mrf.mxu0 }
 0x3a9   :  { %v3602_v50 = vpack.c.bf16 %v3542_v20, %v3539_v54 }
 0x3aa   :  { %v8036_v47 = vpop.f32.mrf.mxu0 }
 0x3ab   :  { %8050 = vmatprep.mubr.msk.bf16.mxu1 %vm1241_vm3, %v3602_v50 }
 0x3ac   :  { %v7740_v57 = vpop.f32.mrf.mxu1  ;;  %v3555_v58 = vpop.f32.mrf.mxu0  ;;  %8051 = vmatmul.mubr.msk.bf16.vlgmr.msra.gmra.mxu1 %vm1241_vm3, %v3603_v30 }
 0x3ad   :  { %v1806_v25 = vadd.f32 %v7740_v57, %v9296_v8 }
 0x3ae   :  { %v1741_v3 = vpop.f32.mrf.mxu1  ;;  %v8037_v19 = vpop.f32.mrf.mxu0 }
 0x3af   :  { %v1804_v23 = vadd.f32 %v1741_v3, %v9300_v11  ;;  %v3605_v27 = vpack.c.bf16 %v8037_v19, %v8036_v47 }
 0x3b0   :  { %v7741_v14 = vpop.f32.mrf.mxu1  ;;  %v3558_v53 = vpop.f32.mrf.mxu0 }
 0x3b1   :  { %v1807_v36 = vadd.f32 %v7741_v14, %v9305_v44  ;;  %v3604_v24 = vpack.c.bf16 %v3558_v53, %v3555_v58 }
 0x3b2   :  { %v9477_v60 = vpop.f32.mrf.mxu1  ;;  %v8040_v29 = vpop.f32.mrf.mxu0 }
 0x3b3   :  { %8054 = vmatprep.mubr.msk.bf16.mxu1 %vm1241_vm3, %v3604_v24 }
 0x3b4   :  { %v7744_v31 = vpop.f32.mrf.mxu1  ;;  %v3571_v21 = vpop.f32.mrf.mxu0  ;;  %8055 = vmatmul.mubr.msk.bf16.gmra.mxu1 %vm1241_vm3, %v3605_v27 }
 0x3b5   :  { %v1810_v8 = vadd.f32 %v7744_v31, %v9316_v34 }
 0x3b6   :  { %v1757_v63 = vpop.f32.mrf.mxu1  ;;  %v8041_v0 = vpop.f32.mrf.mxu0 }
 0x3b7   :  { %v1808_v11 = vadd.f32 %v1757_v63, %v9320_v45  ;;  %v3607_v43 = vpack.c.bf16 %v8041_v0, %v8040_v29 }
 0x3b8   :  { %v7745_v6 = vpop.f32.mrf.mxu1  ;;  %v3574_v4 = vpop.f32.mrf.mxu0 }
 0x3b9   :  { %v1811_v44 = vadd.f32 %v7745_v6, %v9325_v56  ;;  %v3606_v42 = vpack.c.bf16 %v3574_v4, %v3571_v21 }
 0x3ba   :  { %v9484_v22 = vpop.f32.mrf.mxu1  ;;  %v8044_v5 = vpop.f32.mrf.mxu0 }
 0x3bb   :  { %8058 = vmatprep.mubr.msk.bf16.mxu1 %vm1241_vm3, %v3606_v42 }
 0x3bc   :  { %v7748_v59 = vpop.f32.mrf.mxu1  ;;  %v3587_v17 = vpop.f32.mrf.mxu0  ;;  %8059 = vmatmul.mubr.msk.bf16.gmra.mxu1 %vm1241_vm3, %v3607_v43 }
 0x3bd   :  { %v1814_v34 = vadd.f32 %v7748_v59, %v9336_v32 }
 0x3be   :  { %v1773_v7 = vpop.f32.mrf.mxu1  ;;  %v8045_v41 = vpop.f32.mrf.mxu0 }
 0x3bf   :  { %v1812_v45 = vadd.f32 %v1773_v7, %v9340_v16  ;;  %v3609_v2 = vpack.c.bf16 %v8045_v41, %v8044_v5 }
 0x3c0   :  { %v7749_v37 = vpop.f32.mrf.mxu1  ;;  %v3590_v12 = vpop.f32.mrf.mxu0 }
 0x3c1   :  { %v1815_v56 = vadd.f32 %v7749_v37, %v9345_v33  ;;  %v3608_v1 = vpack.c.bf16 %v3590_v12, %v3587_v17 }
 0x3c2   :  { %v9491_v28 = vpop.f32.mrf.mxu1 }
 0x3c3   :  { %8062 = vmatprep.mubr.msk.bf16.mxu1 %vm1241_vm3, %v3608_v1 }
 0x3c4   :  { %v7752_v13 = vpop.f32.mrf.mxu1  ;;  %8063 = vmatmul.mubr.msk.bf16.gmra.mxu1 %vm1241_vm3, %v3609_v2 }
 0x3c5   :  { %v1818_v62 = vadd.f32 %v7752_v13, %v9356_v52 }
 0x3c6   :  { %v1789_v32 = vpop.f32.mrf.mxu1 }
 0x3c7   :  { %v1816_v10 = vadd.f32 %v1789_v32, %v9360_v26 }
 0x3c8   :  { %v7753_v18 = vpop.f32.mrf.mxu1 }
 0x3c9   :  { %v1819_v16 = vadd.f32 %v7753_v18, %v9365_v48 }
 0x3ca   :  { %v9498_v15 = vpop.f32.mrf.mxu1 }
 0x3cc   :  { %v7792_v33 = vpop.f32.mrf.mxu1 }
 0x3cd   :  { %v2130_v46 = vadd.f32 %v7792_v33, %v1806_v25 }
 0x3ce   :  { %v2065_v54 = vpop.f32.mrf.mxu1 }
 0x3cf   :  { %v2128_v55 = vadd.f32 %v2065_v54, %v1804_v23 }
 0x3d0   :  { %v7793_v20 = vpop.f32.mrf.mxu1 }
 0x3d1   :  { %v2131_v50 = vadd.f32 %v7793_v20, %v1807_v36 }
 0x3d2   :  { %v9500_v30 = vpop.f32.mrf.mxu1 }
 0x3d4   :  { %v7796_v47 = vpop.f32.mrf.mxu1 }
 0x3d5   :  { %v2134_v57 = vadd.f32 %v7796_v47, %v1810_v8 }
 0x3d6   :  { %v2081_v58 = vpop.f32.mrf.mxu1 }
 0x3d7   :  { %v2132_v52 = vadd.f32 %v2081_v58, %v1808_v11 }
 0x3d8   :  { %v7797_v3 = vpop.f32.mrf.mxu1 }
 0x3d9   :  { %v2135_v19 = vadd.f32 %v7797_v3, %v1811_v44 }
 0x3da   :  { %v9502_v26 = vpop.f32.mrf.mxu1 }
 0x3dc   :  { %v7800_v14 = vpop.f32.mrf.mxu1 }
 0x3dd   :  { %v2138_v48 = vadd.f32 %v7800_v14, %v1814_v34 }
 0x3de   :  { %v2097_v53 = vpop.f32.mrf.mxu1 }
 0x3df   :  { %v2136_v24 = vadd.f32 %v2097_v53, %v1812_v45 }
 0x3e0   :  { %v7801_v27 = vpop.f32.mrf.mxu1 }
 0x3e1   :  { %v2139_v25 = vadd.f32 %v7801_v27, %v1815_v56 }
 0x3e2   :  { %v2100_v29 = vpop.f32.mrf.mxu1 }
 0x3e4   :  { %v7804_v23 = vpop.f32.mrf.mxu1 }
 0x3e5   :  { %v2142_v31 = vadd.f32 %v7804_v23, %v1818_v62  ;;  %v8400_v23 = vld [vmem:[%s10165_s6] sm:$0xff]  }
 0x3e6   :  { %v2113_v36 = vpop.f32.mrf.mxu1  ;;  %8070 = vmatprep.mubr.msk.bf16.mxu0 %vm1241_vm3, %v8400_v23 }
 0x3e7   :  { %v2140_v21 = vadd.f32 %v2113_v36, %v1816_v10  ;;  %v1469_v36 = vadd.f32 %v9354_v40, %v9352_v35 }
 0x3e8   :  { %v7805_v63 = vpop.f32.mrf.mxu1 }
 0x3e9   :  { %v2143_v0 = vadd.f32 %v7805_v63, %v1819_v16  ;;  %v1813_v63 = vadd.f32 %v9491_v28, %v1469_v36 }
 0x3ea   :  { %v9504_v8 = vpop.f32.mrf.mxu1 }
 0x3ec   :  { %v7844_v11 = vpop.f32.mrf.mxu1 }
 0x3ed   :  { %v2454_v6 = vadd.f32 %v7844_v11, %v2130_v46 }
 0x3ee   :  { %v2389_v4 = vpop.f32.mrf.mxu1 }
 0x3ef   :  { %v2452_v44 = vadd.f32 %v2389_v4, %v2128_v55 }
 0x3f0   :  { %v7845_v42 = vpop.f32.mrf.mxu1 }
 0x3f1   :  { %v2455_v43 = vadd.f32 %v7845_v42, %v2131_v50 }
 0x3f2   :  { %v9506_v5 = vpop.f32.mrf.mxu1 }
 0x3f4   :  { %v7848_v59 = vpop.f32.mrf.mxu1 }
 0x3f5   :  { %v2458_v17 = vadd.f32 %v7848_v59, %v2134_v57 }
 0x3f6   :  { %v2405_v34 = vpop.f32.mrf.mxu1 }
 0x3f7   :  { %v2456_v7 = vadd.f32 %v2405_v34, %v2132_v52 }
 0x3f8   :  { %v7849_v41 = vpop.f32.mrf.mxu1 }
 0x3f9   :  { %v2459_v45 = vadd.f32 %v7849_v41, %v2135_v19 }
 0x3fa   :  { %v9508_v37 = vpop.f32.mrf.mxu1 }
 0x3fc   :  { %v7852_v12 = vpop.f32.mrf.mxu1 }
 0x3fd   :  { %v2462_v56 = vadd.f32 %v7852_v12, %v2138_v48 }
 0x3fe   :  { %v2421_v1 = vpop.f32.mrf.mxu1 }
 0x3ff   :  { %v2460_v2 = vadd.f32 %v2421_v1, %v2136_v24 }
 0x400   :  { %v7853_v13 = vpop.f32.mrf.mxu1 }
 0x401   :  { %v2463_v62 = vadd.f32 %v7853_v13, %v2139_v25 }
 0x402   :  { %v2424_v32 = vpop.f32.mrf.mxu1 }
 0x404   :  { %v7856_v10 = vpop.f32.mrf.mxu1 }
 0x405   :  { %v2466_v18 = vadd.f32 %v7856_v10, %v2142_v31  ;;  %v8401_v31 = vld [vmem:[%s10165_s6 + $0x10] sm:$0xff]  }
 0x406   :  { %v2437_v16 = vpop.f32.mrf.mxu1  ;;  %8078 = vmatprep.mubr.msk.bf16.mxu1 %vm1241_vm3, %v8401_v31 }
 0x407   :  { %v2464_v33 = vadd.f32 %v2437_v16, %v2140_v21 }
 0x408   :  { %v7857_v46 = vpop.f32.mrf.mxu1 }
 0x409   :  { %v2467_v54 = vadd.f32 %v7857_v46, %v2143_v0 }
 0x40a   :  { %v2440_v55 = vpop.f32.mrf.mxu1 }
 0x40c   :  { %v7896_v20 = vpop.f32.mrf.mxu1 }
 0x40d   :  { %v2778_v50 = vadd.f32 %v7896_v20, %v2454_v6  ;;  %v2137_v6 = vadd.f32 %v2100_v29, %v1813_v63  ;;  %v1437_v29 = vadd.f32 %v9314_v61, %v9312_v9  ;;  %v1453_v9 = vadd.f32 %v9334_v39, %v9332_v38 }
 0x40e   :  { %v2713_v47 = vpop.f32.mrf.mxu1 }
 0x40f   :  { %v2776_v57 = vadd.f32 %v2713_v47, %v2452_v44  ;;  %v2461_v42 = vadd.f32 %v2424_v32, %v2137_v6  ;;  %v1805_v13 = vadd.f32 %v9477_v60, %v1437_v29  ;;  %v1809_v46 = vadd.f32 %v9484_v22, %v1453_v9 }
 0x410   :  { %v7897_v58 = vpop.f32.mrf.mxu1 }
 0x411   :  { %v2779_v52 = vadd.f32 %v7897_v58, %v2455_v43 }
 0x412   :  { %v2716_v3 = vpop.f32.mrf.mxu1 }
 0x414   :  { %v7900_v19 = vpop.f32.mrf.mxu1 }
 0x415   :  { %v2782_v14 = vadd.f32 %v7900_v19, %v2458_v17  ;;  %v1485_v17 = vadd.f32 %v9470_v51, %v9371_v49 }
 0x416   :  { %v2729_v48 = vpop.f32.mrf.mxu1 }
 0x417   :  { %v2780_v53 = vadd.f32 %v2729_v48, %v2456_v7  ;;  %v1817_v40 = vadd.f32 %v9498_v15, %v1485_v17  ;;  %v2129_v15 = vadd.f32 %v9500_v30, %v1805_v13 }
 0x418   :  { %v7901_v24 = vpop.f32.mrf.mxu1 }
 0x419   :  { %v2783_v27 = vadd.f32 %v7901_v24, %v2459_v45  ;;  %v2141_v45 = vadd.f32 %v9504_v8, %v1817_v40  ;;  %v2453_v8 = vadd.f32 %v9506_v5, %v2129_v15 }
 0x41a   :  { %v2732_v25 = vpop.f32.mrf.mxu1 }
 0x41b   :  { %v2777_v61 = vadd.f32 %v2716_v3, %v2453_v8 }
 0x41c   :  { %v7904_v21 = vpop.f32.mrf.mxu1 }
 0x41d   :  { %v2786_v0 = vadd.f32 %v7904_v21, %v2462_v56  ;;  %v2465_v56 = vadd.f32 %v2440_v55, %v2141_v45  ;;  %v2133_v55 = vadd.f32 %v9502_v26, %v1809_v46 }
 0x41e   :  { %v2745_v11 = vpop.f32.mrf.mxu1 }
 0x41f   :  { %v2784_v4 = vadd.f32 %v2745_v11, %v2460_v2 }
 0x420   :  { %v7905_v44 = vpop.f32.mrf.mxu1 }
 0x421   :  { %v2787_v43 = vadd.f32 %v7905_v44, %v2463_v62 }
 0x422   :  { %v2748_v59 = vpop.f32.mrf.mxu1 }
 0x423   :  { %v2785_v34 = vadd.f32 %v2748_v59, %v2461_v42 }
 0x424   :  { %v7908_v35 = vpop.f32.mrf.mxu1 }
 0x425   :  { %v2790_v7 = vadd.f32 %v7908_v35, %v2466_v18 }
 0x426   :  { %v2761_v41 = vpop.f32.mrf.mxu1 }
 0x427   :  { %v2788_v28 = vadd.f32 %v2761_v41, %v2464_v33 }
 0x428   :  { %v7909_v12 = vpop.f32.mrf.mxu1 }
 0x429   :  { %v9527_v1 = vadd.f32 %v7909_v12, %v2467_v54 }
 0x42a   :  { %v2764_v2 = vpop.f32.mrf.mxu1 }
 0x42b   :  { %v9530_v49 = vadd.f32 %v2764_v2, %v2465_v56 }
 0x42c   :  { %v7948_v51 = vpop.f32.mrf.mxu1 }
 0x42d   :  { %v3102_v62 = vadd.f32 %v7948_v51, %v2778_v50  ;;  %v2457_v50 = vadd.f32 %v9508_v37, %v2133_v55 }
 0x42e   :  { %v3037_v32 = vpop.f32.mrf.mxu1 }
 0x42f   :  { %v3100_v10 = vadd.f32 %v3037_v32, %v2776_v57  ;;  %v2781_v57 = vadd.f32 %v2732_v25, %v2457_v50 }
 0x430   :  { %v7949_v18 = vpop.f32.mrf.mxu1 }
 0x431   :  { %v3103_v16 = vadd.f32 %v7949_v18, %v2779_v52 }
 0x432   :  { %v3040_v33 = vpop.f32.mrf.mxu1 }
 0x433   :  { %v3101_v60 = vadd.f32 %v3040_v33, %v2777_v61 }
 0x434   :  { %v7952_v54 = vpop.f32.mrf.mxu1 }
 0x435   :  { %v3106_v20 = vadd.f32 %v7952_v54, %v2782_v14 }
 0x436   :  { %v3053_v30 = vpop.f32.mrf.mxu1 }
 0x437   :  { %v3104_v47 = vadd.f32 %v3053_v30, %v2780_v53 }
 0x438   :  { %v7953_v5 = vpop.f32.mrf.mxu1 }
 0x439   :  { %v3107_v58 = vadd.f32 %v7953_v5, %v2783_v27 }
 0x43a   :  { %v3056_v19 = vpop.f32.mrf.mxu1 }
 0x43b   :  { %v3105_v48 = vadd.f32 %v3056_v19, %v2781_v57 }
 0x43c   :  { %v7956_v38 = vpop.f32.mrf.mxu1 }
 0x43d   :  { %v3110_v39 = vadd.f32 %v7956_v38, %v2786_v0 }
 0x43e   :  { %v3069_v52 = vpop.f32.mrf.mxu1 }
 0x43f   :  { %v9539_v3 = vadd.f32 %v3069_v52, %v2784_v4 }
 0x440   :  { %v7957_v22 = vpop.f32.mrf.mxu1 }
 0x441   :  { %v9541_v24 = vadd.f32 %v7957_v22, %v2787_v43 }
 0x442   :  { %v3072_v23 = vpop.f32.mrf.mxu1 }
 0x443   :  { %v9543_v26 = vadd.f32 %v3072_v23, %v2785_v34 }
 0x444   :  { %v7960_v14 = vpop.f32.mrf.mxu1 }
 0x445   :  { %v3114_v31 = vadd.f32 %v7960_v14, %v2790_v7 }
 0x446   :  { %v3085_v37 = vpop.f32.mrf.mxu1 }
 0x447   :  { %v3112_v53 = vadd.f32 %v3085_v37, %v2788_v28 }
 0x448   :  { %v7961_v36 = vpop.f32.mrf.mxu1 }
 0x449   :  { %v3115_v14 = vadd.f32 %v7961_v36, %v9527_v1 }
 0x44a   :  { %v3088_v25 = vpop.f32.mrf.mxu1 }
 0x44c   :  { %v8000_v27 = vpop.f32.mrf.mxu1 }
 0x44d   :  { %v3426_v29 = vadd.f32 %v8000_v27, %v3102_v62 }
 0x44e   :  { %v3361_v21 = vpop.f32.mrf.mxu1 }
 0x44f   :  { %v3424_v13 = vadd.f32 %v3361_v21, %v3100_v10 }
 0x450   :  { %v8001_v63 = vpop.f32.mrf.mxu1 }
 0x451   :  { %v3427_v8 = vadd.f32 %v8001_v63, %v3103_v16  ;;  %v3113_v63 = vadd.f32 %v3088_v25, %v9530_v49 }
 0x452   :  { %v3364_v11 = vpop.f32.mrf.mxu1 }
 0x453   :  { %v3425_v54 = vadd.f32 %v3364_v11, %v3101_v60 }
 0x454   :  { %v8004_v0 = vpop.f32.mrf.mxu1 }
 0x455   :  { %v3430_v56 = vadd.f32 %v8004_v0, %v3106_v20 }
 0x456   :  { %v3377_v6 = vpop.f32.mrf.mxu1 }
 0x457   :  { %v3428_v51 = vadd.f32 %v3377_v6, %v3104_v47 }
 0x458   :  { %v8005_v4 = vpop.f32.mrf.mxu1 }
 0x459   :  { %v3431_v9 = vadd.f32 %v8005_v4, %v3107_v58 }
 0x45a   :  { %v3380_v44 = vpop.f32.mrf.mxu1 }
 0x45b   :  { %v3429_v30 = vadd.f32 %v3380_v44, %v3105_v48 }
 0x45c   :  { %v8008_v42 = vpop.f32.mrf.mxu1 }
 0x45d   :  { %v3434_v23 = vadd.f32 %v8008_v42, %v3110_v39 }
 0x45e   :  { %v3393_v43 = vpop.f32.mrf.mxu1 }
 0x45f   :  { %v3432_v60 = vadd.f32 %v3393_v43, %v9539_v3 }
 0x460   :  { %v8009_v59 = vpop.f32.mrf.mxu1 }
 0x461   :  { %v3435_v11 = vadd.f32 %v8009_v59, %v9541_v24 }
 0x462   :  { %v3396_v17 = vpop.f32.mrf.mxu1 }
 0x463   :  { %v3433_v39 = vadd.f32 %v3396_v17, %v9543_v26 }
 0x464   :  { %v8012_v34 = vpop.f32.mrf.mxu1 }
 0x465   :  { %v3438_v58 = vadd.f32 %v8012_v34, %v3114_v31 }
 0x466   :  { %v3409_v35 = vpop.f32.mrf.mxu1 }
 0x467   :  { %v3436_v48 = vadd.f32 %v3409_v35, %v3112_v53  ;;  %v6820_v53 = vld [vmem:[%s10164_s5] ss:$0 sm:$0xff] }
 0x468   :  { %v8013_v40 = vpop.f32.mrf.mxu1 }
 0x469   :  { %v3439_v6 = vadd.f32 %v8013_v40, %v3115_v14  ;;  %v8415_v14 = vld [vmem:[%s10166_s7 + $0x48] sm:$0xff]  }
 0x46a   :  { %v3412_v7 = vpop.f32.mrf.mxu1 }
 0x46b   :  { %v3437_v31 = vadd.f32 %v3412_v7, %v3113_v63  ;;  %v8421_v63 = vld [vmem:[%s10166_s7 + $0x70] sm:$0xff]  }
 0x46c   :  { %v8052_v41 = vpop.f32.mrf.mxu1 }
 0x46d   :  { %v3750_v15 = vadd.f32 %v8052_v41, %v3426_v29 }
 0x46e   :  { %v3685_v45 = vpop.f32.mrf.mxu1 }
 0x46f   :  { %v3748_v61 = vadd.f32 %v3685_v45, %v3424_v13 }
 0x470   :  { %v8053_v28 = vpop.f32.mrf.mxu1 }
 0x471   :  { %v3751_v50 = vadd.f32 %v8053_v28, %v3427_v8  ;;  %v8402_v8 = vld [vmem:[%s10165_s6 + $0x8] sm:$0xff]  }
 0x472   :  { %v3688_v12 = vpop.f32.mrf.mxu1 }
 0x473   :  { %v3749_v62 = vadd.f32 %v3688_v12, %v3425_v54  ;;  %v8410_v54 = vld [vmem:[%s10166_s7 + $0x8] sm:$0xff]  }
 0x474   :  { %v8056_v2 = vpop.f32.mrf.mxu1 }
 0x475   :  { %v3754_v32 = vadd.f32 %v8056_v2, %v3430_v56 }
 0x476   :  { %v3701_v18 = vpop.f32.mrf.mxu1 }
 0x477   :  { %v3766_v33 = vmax.f32 %v3750_v15, %v3754_v32  ;;  %v3752_v46 = vadd.f32 %v3701_v18, %v3428_v51  ;;  %v8404_v15 = vld [vmem:[%s10166_s7 + $0x38] sm:$0xff]  }
 0x478   :  { %v8057_v55 = vpop.f32.mrf.mxu1  ;;  %v8408_v32 = vld [vmem:[%s10166_s7 + $0x18] sm:$0xff]  }
 0x479   :  { %v3764_v5 = vmax.f32 %v3748_v61, %v3752_v46  ;;  %v3755_v57 = vadd.f32 %v8057_v55, %v3431_v9  ;;  %v8403_v18 = vld [vmem:[%s10165_s6 + $0x18] sm:$0xff]   ;;  %v8405_v9 = vld [vmem:[%s10166_s7 + $0x30] sm:$0xff]   ;;  %v8407_v46 = vld [vmem:[%s10166_s7 + $0x20] sm:$0xff]  }
 0x47a   :  { %v3704_v19 = vpop.f32.mrf.mxu1  ;;  %v8409_v61 = vld [vmem:[%s10166_s7 + $0x10] sm:$0xff]   ;;  %v8411_v55 = vld [vmem:[%s10166_s7] sm:$0xff]  }
 0x47b   :  { %v3767_v20 = vmax.f32 %v3751_v50, %v3755_v57  ;;  %v3753_v38 = vadd.f32 %v3704_v19, %v3429_v30  ;;  %v8412_v30 = vld [vmem:[%s10166_s7 + $0x58] sm:$0xff]  }
 0x47c   :  { %v8060_v10 = vpop.f32.mrf.mxu1 }
 0x47d   :  { %v3765_v47 = vmax.f32 %v3749_v62, %v3753_v38  ;;  %v3758_v27 = vadd.f32 %v8060_v10, %v3434_v23  ;;  %v8413_v23 = vld [vmem:[%s10166_s7 + $0x50] sm:$0xff]  }
 0x47e   :  { %v3717_v52 = vpop.f32.mrf.mxu1 }
 0x47f   :  { %v3756_v4 = vadd.f32 %v3717_v52, %v3432_v60  ;;  %v8417_v60 = vld [vmem:[%s10166_s7 + $0x40] sm:$0xff]  }
 0x480   :  { %v8061_v22 = vpop.f32.mrf.mxu1 }
 0x481   :  { %v3759_v1 = vadd.f32 %v8061_v22, %v3435_v11  ;;  %v8422_v11 = vld [vmem:[%s10166_s7 + $0x68] sm:$0xff]  }
 0x482   :  { %v3720_v16 = vpop.f32.mrf.mxu1 }
 0x483   :  { %v3757_v25 = vadd.f32 %v3720_v16, %v3433_v39 }
 0x484   :  { %v8064_v37 = vpop.f32.mrf.mxu1 }
 0x485   :  { %v3762_v21 = vadd.f32 %v8064_v37, %v3438_v58  ;;  %v8414_v58 = vld [vmem:[%s10165_s6 + $0x20] sm:$0xff]   ;;  %v8416_v37 = vld [vmem:[%s10165_s6 + $0x28] sm:$0xff]  }
 0x486   :  { %v3733_v0 = vpop.f32.mrf.mxu1 }
 0x487   :  { %v3770_v44 = vmax.f32 %v3758_v27, %v3762_v21  ;;  %v3760_v41 = vadd.f32 %v3733_v0, %v3436_v48  ;;  %v8418_v48 = vld [vmem:[%s10165_s6 + $0x30] sm:$0xff]   ;;  %v8419_v27 = vld [vmem:[%s10166_s7 + $0x78] sm:$0xff]   ;;  %v8423_v0 = vld [vmem:[%s10166_s7 + $0x60] sm:$0xff]  }
 0x488   :  { %v8065_v42 = vpop.f32.mrf.mxu1  ;;  %v8420_v21 = vld [vmem:[%s10165_s6 + $0x38] sm:$0xff]  }
 0x489   :  { %v3774_v36 = vmax.f32 %v3766_v33, %v3770_v44  ;;  %v3768_v34 = vmax.f32 %v3756_v4, %v3760_v41  ;;  %v3763_v3 = vadd.f32 %v8065_v42, %v3439_v6  ;;  %v8406_v33 = vld [vmem:[%s10166_s7 + $0x28] sm:$0xff]  }
 0x48a   :  { %v3736_v49 = vpop.f32.mrf.mxu1 }
 0x48b   :  { %v3772_v24 = vmax.f32 %v3764_v5, %v3768_v34  ;;  %v3771_v43 = vmax.f32 %v3759_v1, %v3763_v3  ;;  %v3761_v59 = vadd.f32 %v3736_v49, %v3437_v31  ;;  %v3785_v35 = vadd.f32 %v6820_v53, %v3774_v36 }
 0x48d   :  { %v3775_v40 = vmax.f32 %v3767_v20, %v3771_v43  ;;  %v3769_v45 = vmax.f32 %v3757_v25, %v3761_v59  ;;  %v3783_v28 = vadd.f32 %v6820_v53, %v3772_v24  ;;  %v3789_v7 = vmax.f32 %v3785_v35, 0.0  ;;  %v8424_v43 = vld [vmem:[%s10165_s6 + $0x40] sm:$0xff]  }
 0x48f   :  { %v3786_v26 = vadd.f32 %v6820_v53, %v3775_v40  ;;  %v3773_v17 = vmax.f32 %v3765_v47, %v3769_v45  ;;  %v3787_v56 = vmax.f32 %v3783_v28, 0.0  ;;  %v8425_v28 = vld [vmem:[%s10166_s7 + $0x98] sm:$0xff]  }
 0x491   :  { %v3790_v12 = vmax.f32 %v3786_v26, 0.0  ;;  %v3784_v29 = vadd.f32 %v6820_v53, %v3773_v17 }
 0x493   :  { %v9553_v2 = vpack.c.bf16 %v3790_v12, %v3789_v7  ;;  %v3788_v13 = vmax.f32 %v3784_v29, 0.0  ;;  %v8426_v7 = vld [vmem:[%s10165_s6 + $0x48] sm:$0xff]   ;;  %v8427_v29 = vld [vmem:[%s10166_s7 + $0x90] sm:$0xff]  }
 0x495   :  { %v9555_v51 = vpack.c.bf16 %v3788_v13, %v3787_v56  ;;  %8066 = vmatprep.subr.bf16.mxu0 %v9553_v2  ;;  %8074 = vmatprep.subr.bf16.mxu1 %v9553_v2  ;;  %v8429_v56 = vld [vmem:[%s10165_s6 + $0x50] sm:$0xff]   ;;  %v8428_v13 = vld [vmem:[%s10166_s7 + $0x88] sm:$0xff]  }
 0x496   :  { %8067 = vmatpush3.bf16.msra.mxu0 %v9553_v2  ;;  %8075 = vmatpush3.bf16.msra.mxu1 %v9553_v2 }
 0x497   :  { %8068 = vmatprep.subr.bf16.mxu0 %v9555_v51  ;;  %8076 = vmatprep.subr.bf16.mxu1 %v9555_v51 }
 0x49a   :  { %8069 = vmatpush3.bf16.msra.mxu0 %v9555_v51  ;;  %8077 = vmatpush3.bf16.msra.mxu1 %v9555_v51 }
 0x49b   :  { %8082 = vmatprep.subr.bf16.mxu0 %v8404_v15  ;;  %8094 = vmatprep.subr.bf16.mxu1 %v8408_v32 }
 0x49d   :  { %8071 = vmatmul.mubr.msk.bf16.vlgmr.msra.gmra.mxu0 %vm1241_vm3, %v8402_v8  ;;  %8079 = vmatmul.mubr.msk.bf16.vlgmr.msra.gmra.mxu1 %vm1241_vm3, %v8403_v18  ;;  %v8432_v8 = vld [vmem:[%s10166_s7 + $0x80] sm:$0xff]   ;;  %v8433_v18 = vld [vmem:[%s10166_s7 + $0xb0] sm:$0xff]  }
 0x49e   :  { %8083 = vmatpush3.bf16.msra.mxu0 %v8404_v15  ;;  %8095 = vmatpush3.bf16.msra.mxu1 %v8408_v32  ;;  %v8430_v15 = vld [vmem:[%s10166_s7 + $0xb8] sm:$0xff]  }
 0x49f   :  { %8084 = vmatprep.subr.bf16.mxu0 %v8405_v9  ;;  %8096 = vmatprep.subr.bf16.mxu1 %v8409_v61  ;;  %v8431_v32 = vld [vmem:[%s10165_s6 + $0x58] sm:$0xff]  }
 0x4a2   :  { %8085 = vmatpush3.bf16.msra.mxu0 %v8405_v9  ;;  %8097 = vmatpush3.bf16.msra.mxu1 %v8409_v61  ;;  %v8434_v9 = vld [vmem:[%s10166_s7 + $0xa8] sm:$0xff]   ;;  %v8435_v61 = vld [vmem:[%s10166_s7 + $0xa0] sm:$0xff]  }
 0x4a3   :  { %8086 = vmatprep.subr.bf16.mxu0 %v8406_v33  ;;  %8098 = vmatprep.subr.bf16.mxu1 %v8410_v54 }
 0x4a6   :  { %8087 = vmatpush3.bf16.msra.mxu0 %v8406_v33  ;;  %8099 = vmatpush3.bf16.msra.mxu1 %v8410_v54 }
 0x4a7   :  { %8088 = vmatprep.subr.bf16.mxu0 %v8407_v46  ;;  %8100 = vmatprep.subr.bf16.mxu1 %v8411_v55 }
 0x4aa   :  { %8089 = vmatpush3.bf16.msra.mxu0 %v8407_v46  ;;  %8101 = vmatpush3.bf16.msra.mxu1 %v8411_v55 }
 0x4ab   :  { %8106 = vmatprep.subr.bf16.mxu0 %v9553_v2  ;;  %8114 = vmatprep.subr.bf16.mxu1 %v8412_v30 }
 0x55d   :  { %v8072_v50 = vpop.f32.mrf.mxu0  ;;  %v8080_v5 = vpop.f32.mrf.mxu1 }
 0x55f   :  { %v3847_v57 = vpop.f32.mrf.mxu0  ;;  %v3927_v19 = vpop.f32.mrf.mxu1 }
 0x561   :  { %v8073_v62 = vpop.f32.mrf.mxu0  ;;  %v8081_v20 = vpop.f32.mrf.mxu1 }
 0x562   :  { %v3863_v38 = vpack.c.bf16 %v8073_v62, %v8072_v50  ;;  %v3943_v16 = vpack.c.bf16 %v8081_v20, %v8080_v5 }
 0x563   :  { %v3850_v10 = vpop.f32.mrf.mxu0  ;;  %v3930_v47 = vpop.f32.mrf.mxu1 }
 0x564   :  { %v3862_v52 = vpack.c.bf16 %v3850_v10, %v3847_v57  ;;  %v3942_v22 = vpack.c.bf16 %v3930_v47, %v3927_v19 }
 0x566   :  { %8090 = vmatprep.mubr.msk.bf16.mxu0 %vm3977_vm4, %v3942_v22  ;;  %8102 = vmatprep.mubr.msk.bf16.mxu1 %vm3977_vm4, %v3862_v52 }
 0x567   :  { %8091 = vmatmul.mubr.msk.bf16.vlgmr.msra.gmra.mxu0 %vm3977_vm4, %v3943_v16  ;;  %8103 = vmatmul.mubr.msk.bf16.vlgmr.msra.gmra.mxu1 %vm3977_vm4, %v3863_v38 }
 0x568   :  { %8107 = vmatpush3.bf16.msra.mxu0 %v9553_v2  ;;  %8115 = vmatpush3.bf16.msra.mxu1 %v8412_v30 }
 0x569   :  { %8108 = vmatprep.subr.bf16.mxu0 %v9555_v51  ;;  %8116 = vmatprep.subr.bf16.mxu1 %v8413_v23 }
 0x56a   :  { %8110 = vmatprep.mubr.msk.bf16.mxu0 %vm1241_vm3, %v8414_v58 }
 0x56c   :  { %8109 = vmatpush3.bf16.msra.mxu0 %v9555_v51  ;;  %8117 = vmatpush3.bf16.msra.mxu1 %v8413_v23 }
 0x56d   :  { %8126 = vmatprep.subr.bf16.mxu0 %v9553_v2  ;;  %8118 = vmatprep.subr.bf16.mxu1 %v8415_v14 }
 0x56f   :  { %8111 = vmatmul.mubr.msk.bf16.vlgmr.msra.gmra.mxu0 %vm1241_vm3, %v8416_v37 }
 0x570   :  { %8119 = vmatpush3.bf16.msra.mxu1 %v8415_v14  ;;  %8127 = vmatpush3.bf16.msra.mxu0 %v9553_v2 }
 0x571   :  { %8128 = vmatprep.subr.bf16.mxu0 %v9555_v51  ;;  %8120 = vmatprep.subr.bf16.mxu1 %v8417_v60 }
 0x572   :  { %8130 = vmatprep.mubr.msk.bf16.mxu0 %vm1241_vm3, %v8418_v48 }
 0x574   :  { %8121 = vmatpush3.bf16.msra.mxu1 %v8417_v60  ;;  %8129 = vmatpush3.bf16.msra.mxu0 %v9555_v51 }
 0x575   :  { %8146 = vmatprep.subr.bf16.mxu1 %v9553_v2  ;;  %8134 = vmatprep.subr.bf16.mxu0 %v8419_v27 }
 0x577   :  { %8131 = vmatmul.mubr.msk.bf16.vlgmr.msra.gmra.mxu0 %vm1241_vm3, %v8420_v21 }
 0x578   :  { %8135 = vmatpush3.bf16.msra.mxu0 %v8419_v27  ;;  %v8436_v27 = vld [vmem:[%s10165_s6 + $0x60] sm:$0xff]  }
 0x579   :  { %8136 = vmatprep.subr.bf16.mxu0 %v8421_v63 }
 0x57c   :  { %8137 = vmatpush3.bf16.msra.mxu0 %v8421_v63 }
 0x57d   :  { %8138 = vmatprep.subr.bf16.mxu0 %v8422_v11 }
 0x580   :  { %8139 = vmatpush3.bf16.msra.mxu0 %v8422_v11 }
 0x581   :  { %8140 = vmatprep.subr.bf16.mxu0 %v8423_v0 }
 0x584   :  { %8141 = vmatpush3.bf16.msra.mxu0 %v8423_v0 }
 0x585   :  { %8166 = vmatprep.subr.bf16.mxu0 %v9553_v2 }
 0x627   :  { %v8092_v6 = vpop.f32.mrf.mxu0  ;;  %v8104_v4 = vpop.f32.mrf.mxu1 }
 0x628   :  { %v9651_v44 = vadd.f32 %v8104_v4, %v8092_v6  ;;  %v8437_v6 = vld [vmem:[%s10166_s7 + $0xd8] sm:$0xff]  }
 0x629   :  { %v4018_v41 = vpop.f32.mrf.mxu0  ;;  %v4097_v39 = vpop.f32.mrf.mxu1 }
 0x62a   :  { %v9653_v31 = vadd.f32 %v4097_v39, %v4018_v41  ;;  %v8438_v41 = vld [vmem:[%s10165_s6 + $0x68] sm:$0xff]  }
 0x62b   :  { %v8093_v42 = vpop.f32.mrf.mxu0  ;;  %v8105_v1 = vpop.f32.mrf.mxu1 }
 0x62c   :  { %v9655_v36 = vadd.f32 %v8105_v1, %v8093_v42  ;;  %v8441_v42 = vld [vmem:[%s10165_s6 + $0x70] sm:$0xff]   ;;  %v8440_v1 = vld [vmem:[%s10166_s7 + $0xc8] sm:$0xff]  }
 0x62d   :  { %v9657_v34 = vpop.f32.mrf.mxu0  ;;  %v4100_v33 = vpop.f32.mrf.mxu1 }
 0x62e   :  { %v4101_v5 = vadd.f32 %v4100_v33, %v9657_v34  ;;  %v8443_v34 = vld [vmem:[%s10166_s7 + $0xc0] sm:$0xff]  }
 0x62f   :  { %v8112_v3 = vpop.f32.mrf.mxu0 }
 0x631   :  { %v4167_v53 = vpop.f32.mrf.mxu0 }
 0x633   :  { %v8113_v49 = vpop.f32.mrf.mxu0 }
 0x634   :  { %v4183_v59 = vpack.c.bf16 %v8113_v49, %v8112_v3  ;;  %v8444_v3 = vld [vmem:[%s10166_s7 + $0xf8] sm:$0xff]   ;;  %v8446_v49 = vld [vmem:[%s10166_s7 + $0xe8] sm:$0xff]  }
 0x635   :  { %v4170_v25 = vpop.f32.mrf.mxu0 }
 0x636   :  { %v4182_v24 = vpack.c.bf16 %v4170_v25, %v4167_v53  ;;  %v8445_v53 = vld [vmem:[%s10166_s7 + $0xf0] sm:$0xff]   ;;  %v8447_v25 = vld [vmem:[%s10166_s7 + $0xe0] sm:$0xff]  }
 0x637   :  { %v8132_v35 = vpop.f32.mrf.mxu0 }
 0x638   :  { %8122 = vmatprep.mubr.msk.bf16.mxu1 %vm3977_vm4, %v4182_v24 }
 0x639   :  { %8123 = vmatmul.mubr.msk.bf16.vlgmr.msra.gmra.mxu1 %vm3977_vm4, %v4183_v59  ;;  %v4331_v40 = vpop.f32.mrf.mxu0 }
 0x63a   :  { %8147 = vmatpush3.bf16.msra.mxu1 %v9553_v2  ;;  %8150 = vmatprep.mubr.msk.bf16.mxu1 %vm1241_vm3, %v8424_v43 }
 0x63b   :  { %8148 = vmatprep.subr.bf16.mxu1 %v9555_v51  ;;  %v8133_v45 = vpop.f32.mrf.mxu0 }
 0x63c   :  { %v4347_v26 = vpack.c.bf16 %v8133_v45, %v8132_v35 }
 0x63d   :  { %v4334_v17 = vpop.f32.mrf.mxu0 }
 0x63e   :  { %v4346_v12 = vpack.c.bf16 %v4334_v17, %v4331_v40  ;;  %8149 = vmatpush3.bf16.msra.mxu1 %v9555_v51 }
 0x63f   :  { %8154 = vmatprep.subr.bf16.mxu1 %v8425_v28 }
 0x640   :  { %8142 = vmatprep.mubr.msk.bf16.mxu0 %vm3977_vm4, %v4346_v12 }
 0x641   :  { %8143 = vmatmul.mubr.msk.bf16.vlgmr.msra.gmra.mxu0 %vm3977_vm4, %v4347_v26  ;;  %8151 = vmatmul.mubr.msk.bf16.vlgmr.msra.gmra.mxu1 %vm1241_vm3, %v8426_v7 }
 0x642   :  { %8155 = vmatpush3.bf16.msra.mxu1 %v8425_v28  ;;  %8167 = vmatpush3.bf16.msra.mxu0 %v9553_v2 }
 0x643   :  { %8168 = vmatprep.subr.bf16.mxu0 %v9555_v51  ;;  %8156 = vmatprep.subr.bf16.mxu1 %v8427_v29 }
 0x644   :  { %8170 = vmatprep.mubr.msk.bf16.mxu0 %vm1241_vm3, %v8429_v56 }
 0x646   :  { %8157 = vmatpush3.bf16.msra.mxu1 %v8427_v29  ;;  %8169 = vmatpush3.bf16.msra.mxu0 %v9555_v51 }
 0x647   :  { %8158 = vmatprep.subr.bf16.mxu1 %v8428_v13  ;;  %8174 = vmatprep.subr.bf16.mxu0 %v8430_v15 }
 0x649   :  { %8171 = vmatmul.mubr.msk.bf16.vlgmr.msra.gmra.mxu0 %vm1241_vm3, %v8431_v32 }
 0x64a   :  { %8159 = vmatpush3.bf16.msra.mxu1 %v8428_v13  ;;  %8175 = vmatpush3.bf16.msra.mxu0 %v8430_v15 }
 0x64b   :  { %8160 = vmatprep.subr.bf16.mxu1 %v8432_v8  ;;  %8176 = vmatprep.subr.bf16.mxu0 %v8433_v18 }
 0x64e   :  { %8161 = vmatpush3.bf16.msra.mxu1 %v8432_v8  ;;  %8177 = vmatpush3.bf16.msra.mxu0 %v8433_v18 }
 0x64f   :  { %8186 = vmatprep.subr.bf16.mxu1 %v9553_v2  ;;  %8178 = vmatprep.subr.bf16.mxu0 %v8434_v9 }
 0x652   :  { %8179 = vmatpush3.bf16.msra.mxu0 %v8434_v9 }
 0x653   :  { %8180 = vmatprep.subr.bf16.mxu0 %v8435_v61 }
 0x656   :  { %8181 = vmatpush3.bf16.msra.mxu0 %v8435_v61 }
 0x657   :  { %8206 = vmatprep.subr.bf16.mxu0 %v9553_v2 }
 0x6f9   :  { %v8124_v46 = vpop.f32.mrf.mxu1 }
 0x6fa   :  { %v4274_v54 = vadd.f32 %v8124_v46, %v9651_v44  ;;  %v8448_v46 = vld [vmem:[%s10165_s6 + $0x80] sm:$0xff]  }
 0x6fb   :  { %v4257_v55 = vpop.f32.mrf.mxu1 }
 0x6fc   :  { %v4272_v30 = vadd.f32 %v4257_v55, %v9653_v31  ;;  %v8439_v31 = vld [vmem:[%s10166_s7 + $0xd0] sm:$0xff]  }
 0x6fd   :  { %v8125_v50 = vpop.f32.mrf.mxu1 }
 0x6fe   :  { %v4275_v57 = vadd.f32 %v8125_v50, %v9655_v36  ;;  %v8442_v36 = vld [vmem:[%s10165_s6 + $0x78] sm:$0xff]  }
 0x6ff   :  { %v4260_v19 = vpop.f32.mrf.mxu1 }
 0x700   :  { %v4273_v62 = vadd.f32 %v4260_v19, %v4101_v5  ;;  %v8449_v19 = vld [vmem:[%s10165_s6 + $0x88] sm:$0xff]  }
 0x701   :  { %v8144_v20 = vpop.f32.mrf.mxu0  ;;  %v8152_v38 = vpop.f32.mrf.mxu1 }
 0x702   :  { %v4438_v10 = vadd.f32 %v8144_v20, %v4274_v54  ;;  %v8451_v20 = vld [vmem:[%s10166_s7 + $0x110] sm:$0xff]  }
 0x703   :  { %v4421_v47 = vpop.f32.mrf.mxu0  ;;  %v4495_v52 = vpop.f32.mrf.mxu1 }
 0x704   :  { %v4436_v22 = vadd.f32 %v4421_v47, %v4272_v30 }
 0x705   :  { %v8145_v16 = vpop.f32.mrf.mxu0  ;;  %v8153_v23 = vpop.f32.mrf.mxu1 }
 0x706   :  { %v4439_v58 = vadd.f32 %v8145_v16, %v4275_v57  ;;  %v4511_v21 = vpack.c.bf16 %v8153_v23, %v8152_v38  ;;  %v8453_v38 = vld [vmem:[%s10166_s7 + $0x100] sm:$0xff]  }
 0x707   :  { %v4424_v14 = vpop.f32.mrf.mxu0  ;;  %v4498_v37 = vpop.f32.mrf.mxu1 }
 0x708   :  { %v4437_v60 = vadd.f32 %v4424_v14, %v4273_v62  ;;  %v4510_v48 = vpack.c.bf16 %v4498_v37, %v4495_v52 }
 0x709   :  { %v8172_v63 = vpop.f32.mrf.mxu0 }
 0x70a   :  { %8162 = vmatprep.mubr.msk.bf16.mxu1 %vm3977_vm4, %v4510_v48 }
 0x70b   :  { %8163 = vmatmul.mubr.msk.bf16.vlgmr.msra.gmra.mxu1 %vm3977_vm4, %v4511_v21  ;;  %v4659_v11 = vpop.f32.mrf.mxu0 }
 0x70c   :  { %8187 = vmatpush3.bf16.msra.mxu1 %v9553_v2  ;;  %8190 = vmatprep.mubr.msk.bf16.mxu1 %vm1241_vm3, %v8436_v27 }
 0x70d   :  { %8188 = vmatprep.subr.bf16.mxu1 %v9555_v51  ;;  %v8173_v0 = vpop.f32.mrf.mxu0 }
 0x70e   :  { %v4675_v4 = vpack.c.bf16 %v8173_v0, %v8172_v63  ;;  %v8454_v0 = vld [vmem:[%s10169_s10 + $0xf0] ss:$8 sps:$4 sm:$0xff]  }
 0x70f   :  { %v4662_v44 = vpop.f32.mrf.mxu0 }
 0x710   :  { %v4674_v39 = vpack.c.bf16 %v4662_v44, %v4659_v11  ;;  %8189 = vmatpush3.bf16.msra.mxu1 %v9555_v51  ;;  %v8589_v11 = vmov 0.0   ;;  %v8457_v44 = vld [vmem:[%s10169_s10 + $0xe0] ss:$8 sps:$4 sm:$0xff]  }
 0x711   :  { %8194 = vmatprep.subr.bf16.mxu1 %v8437_v6 }
 0x712   :  { %8182 = vmatprep.mubr.msk.bf16.mxu0 %vm3977_vm4, %v4674_v39  ;;  %v8460_v39 = vld [vmem:[%s10169_s10 + $0xd0] ss:$8 sps:$4 sm:$0xff]  }
 0x713   :  { %8183 = vmatmul.mubr.msk.bf16.vlgmr.msra.gmra.mxu0 %vm3977_vm4, %v4675_v4  ;;  %8191 = vmatmul.mubr.msk.bf16.vlgmr.msra.gmra.mxu1 %vm1241_vm3, %v8438_v41  ;;  %v8459_v4 = vld [vmem:[%s10169_s10 + $0xe4] ss:$8 sps:$4 sm:$0xff]   ;;  %v8462_v41 = vld [vmem:[%s10169_s10 + $0xd4] ss:$8 sps:$4 sm:$0xff]  }
 0x714   :  { %8195 = vmatpush3.bf16.msra.mxu1 %v8437_v6  ;;  %8207 = vmatpush3.bf16.msra.mxu0 %v9553_v2  ;;  %v8456_v6 = vld [vmem:[%s10169_s10 + $0xf4] ss:$8 sps:$4 sm:$0xff]  }
 0x715   :  { %8208 = vmatprep.subr.bf16.mxu0 %v9555_v51  ;;  %8196 = vmatprep.subr.bf16.mxu1 %v8439_v31 }
 0x716   :  { %8210 = vmatprep.mubr.msk.bf16.mxu0 %vm1241_vm3, %v8441_v42  ;;  %v8463_v42 = vld [vmem:[%s10169_s10 + $0xc0] ss:$8 sps:$4 sm:$0xff]  }
 0x718   :  { %8197 = vmatpush3.bf16.msra.mxu1 %v8439_v31  ;;  %8209 = vmatpush3.bf16.msra.mxu0 %v9555_v51  ;;  %v8465_v31 = vld [vmem:[%s10169_s10 + $0xc4] ss:$8 sps:$4 sm:$0xff]  }
 0x719   :  { %8198 = vmatprep.subr.bf16.mxu1 %v8440_v1  ;;  %8214 = vmatprep.subr.bf16.mxu0 %v8444_v3 }
 0x71b   :  { %8211 = vmatmul.mubr.msk.bf16.vlgmr.msra.gmra.mxu0 %vm1241_vm3, %v8442_v36  ;;  %v8469_v36 = vld [vmem:[%s10169_s10 + $0xb0] ss:$8 sps:$4 sm:$0xff]  }
 0x71c   :  { %8199 = vmatpush3.bf16.msra.mxu1 %v8440_v1  ;;  %8215 = vmatpush3.bf16.msra.mxu0 %v8444_v3  ;;  %v8471_v1 = vld [vmem:[%s10169_s10 + $0xb4] ss:$8 sps:$4 sm:$0xff]   ;;  %v8475_v3 = vld [vmem:[%s10169_s10 + $0xa0] ss:$8 sps:$4 sm:$0xff]  }
 0x71d   :  { %8200 = vmatprep.subr.bf16.mxu1 %v8443_v34  ;;  %8216 = vmatprep.subr.bf16.mxu0 %v8445_v53 }
 0x720   :  { %8201 = vmatpush3.bf16.msra.mxu1 %v8443_v34  ;;  %8217 = vmatpush3.bf16.msra.mxu0 %v8445_v53  ;;  %v8477_v34 = vld [vmem:[%s10169_s10 + $0xa4] ss:$8 sps:$4 sm:$0xff]  }
 0x721   :  { %8226 = vmatprep.subr.bf16.mxu1 %v9553_v2  ;;  %8218 = vmatprep.subr.bf16.mxu0 %v8446_v49 }
 0x724   :  { %8219 = vmatpush3.bf16.msra.mxu0 %v8446_v49 }
 0x725   :  { %8220 = vmatprep.subr.bf16.mxu0 %v8447_v25 }
 0x728   :  { %8221 = vmatpush3.bf16.msra.mxu0 %v8447_v25 }
 0x729   :  { %8246 = vmatprep.subr.bf16.mxu0 %v8589_v11 }
 0x7cb   :  { %v8164_v24 = vpop.f32.mrf.mxu1 }
 0x7cc   :  { %v4602_v43 = vadd.f32 %v8164_v24, %v4438_v10 }
 0x7cd   :  { %v4585_v59 = vpop.f32.mrf.mxu1 }
 0x7ce   :  { %v4600_v35 = vadd.f32 %v4585_v59, %v4436_v22 }
 0x7cf   :  { %v8165_v40 = vpop.f32.mrf.mxu1 }
 0x7d0   :  { %v4603_v45 = vadd.f32 %v8165_v40, %v4439_v58 }
 0x7d1   :  { %v4588_v28 = vpop.f32.mrf.mxu1 }
 0x7d2   :  { %v4601_v26 = vadd.f32 %v4588_v28, %v4437_v60 }
 0x7d3   :  { %v8184_v17 = vpop.f32.mrf.mxu0  ;;  %v8192_v7 = vpop.f32.mrf.mxu1 }
 0x7d4   :  { %v4766_v12 = vadd.f32 %v8184_v17, %v4602_v43 }
 0x7d5   :  { %v4749_v29 = vpop.f32.mrf.mxu0  ;;  %v4823_v56 = vpop.f32.mrf.mxu1 }
 0x7d6   :  { %v4764_v13 = vadd.f32 %v4749_v29, %v4600_v35 }
 0x7d7   :  { %v8185_v15 = vpop.f32.mrf.mxu0  ;;  %v8193_v32 = vpop.f32.mrf.mxu1 }
 0x7d8   :  { %v4767_v8 = vadd.f32 %v8185_v15, %v4603_v45  ;;  %v4839_v54 = vpack.c.bf16 %v8193_v32, %v8192_v7  ;;  %v7007_v32 = vld [vmem:[%s10167_s8] ss:$0 sm:$0xff] }
 0x7d9   :  { %v4752_v18 = vpop.f32.mrf.mxu0  ;;  %v4826_v9 = vpop.f32.mrf.mxu1 }
 0x7da   :  { %v4765_v61 = vadd.f32 %v4752_v18, %v4601_v26  ;;  %v4838_v33 = vpack.c.bf16 %v4826_v9, %v4823_v56 }
 0x7db   :  { %v8212_v55 = vpop.f32.mrf.mxu0 }
 0x7dc   :  { %8202 = vmatprep.mubr.msk.bf16.mxu1 %vm3977_vm4, %v4838_v33 }
 0x7dd   :  { %8203 = vmatmul.mubr.msk.bf16.vlgmr.msra.gmra.mxu1 %vm3977_vm4, %v4839_v54  ;;  %v4987_v30 = vpop.f32.mrf.mxu0  ;;  %v8468_v54 = vld [vmem:[%s10169_s10 + $0x74] ss:$8 sps:$4 sm:$0xff]  }
 0x7de   :  { %8227 = vmatpush3.bf16.msra.mxu1 %v9553_v2  ;;  %8230 = vmatprep.mubr.msk.bf16.mxu1 %vm1241_vm3, %v8448_v46  ;;  %v8450_v2 = vld [vmem:[%s10166_s7 + $0x118] sm:$0xff]   ;;  %v5273_v46 = vld [vmem:[%s10168_s9] sm:$0xf] }
 0x7df   :  { %8228 = vmatprep.subr.bf16.mxu1 %v9555_v51  ;;  %v8213_v50 = vpop.f32.mrf.mxu0 }
 0x7e0   :  { %v5003_v5 = vpack.c.bf16 %v8213_v50, %v8212_v55  ;;  %v7009_v55 = vld [vmem:[%s10168_s9 + $0x4] sm:$0xf] }
 0x7e1   :  { %v4990_v57 = vpop.f32.mrf.mxu0  ;;  %v8474_v50 = vld [vmem:[%s10169_s10 + $0x64] ss:$8 sps:$4 sm:$0xff]  }
 0x7e2   :  { %v5002_v62 = vpack.c.bf16 %v4990_v57, %v4987_v30  ;;  %8229 = vmatpush3.bf16.msra.mxu1 %v9555_v51  ;;  %v8452_v51 = vld [vmem:[%s10166_s7 + $0x108] sm:$0xff]   ;;  %v8466_v30 = vld [vmem:[%s10169_s10 + $0x70] ss:$8 sps:$4 sm:$0xff]   ;;  %v8480_v57 = vld [vmem:[%s10169_s10 + $0x54] ss:$8 sps:$4 sm:$0xff]  }
 0x7e3   :  { %8234 = vmatprep.subr.bf16.mxu1 %v8450_v2 }
 0x7e4   :  { %8222 = vmatprep.mubr.msk.bf16.mxu0 %vm3977_vm4, %v5002_v62  ;;  %v8486_v62 = vld [vmem:[%s10169_s10 + $0x44] ss:$8 sps:$4 sm:$0xff]  }
 0x7e5   :  { %8223 = vmatmul.mubr.msk.bf16.vlgmr.msra.gmra.mxu0 %vm3977_vm4, %v5003_v5  ;;  %8231 = vmatmul.mubr.msk.bf16.vlgmr.msra.gmra.mxu1 %vm1241_vm3, %v8449_v19  ;;  %v8472_v5 = vld [vmem:[%s10169_s10 + $0x60] ss:$8 sps:$4 sm:$0xff]   ;;  %v8478_v19 = vld [vmem:[%s10169_s10 + $0x50] ss:$8 sps:$4 sm:$0xff]  }
 0x7e6   :  { %8235 = vmatpush3.bf16.msra.mxu1 %v8450_v2  ;;  %8248 = vmatprep.mubr.msk.bf16.mxu0 %vm8590_vm5, %v8589_v11  ;;  %v8484_v2 = vld [vmem:[%s10169_s10 + $0x40] ss:$8 sps:$4 sm:$0xff]  }
 0x7e7   :  { %8236 = vmatprep.subr.bf16.mxu1 %v8451_v20 }
 0x7ea   :  { %8237 = vmatpush3.bf16.msra.mxu1 %v8451_v20  ;;  %v8492_v20 = vld [vmem:[%s10169_s10 + $0x34] ss:$8 sps:$4 sm:$0xff]  }
 0x7eb   :  { %8238 = vmatprep.subr.bf16.mxu1 %v8452_v51 }
 0x7ee   :  { %8239 = vmatpush3.bf16.msra.mxu1 %v8452_v51  ;;  %v8490_v51 = vld [vmem:[%s10169_s10 + $0x30] ss:$8 sps:$4 sm:$0xff]  }
 0x7ef   :  { %8240 = vmatprep.subr.bf16.mxu1 %v8453_v38 }
 0x7f2   :  { %8241 = vmatpush3.bf16.msra.mxu1 %v8453_v38  ;;  %v8495_v38 = vld [vmem:[%s10169_s10 + $0x24] ss:$8 sps:$4 sm:$0xff]  }
 0x7f3   :  { %5481 = vmatprep.subr.bf16.mxu1 %v8456_v6 }
 0x89d   :  { %v8204_v10 = vpop.f32.mrf.mxu1 }
 0x89e   :  { %v4930_v47 = vadd.f32 %v8204_v10, %v4766_v12  ;;  %v8493_v10 = vld [vmem:[%s10169_s10 + $0x20] ss:$8 sps:$4 sm:$0xff]  }
 0x89f   :  { %v4913_v52 = vpop.f32.mrf.mxu1 }
 0x8a0   :  { %v4928_v22 = vadd.f32 %v4913_v52, %v4764_v13  ;;  %v8496_v52 = vld [vmem:[%s10169_s10 + $0x10] ss:$8 sps:$4 sm:$0xff]  }
 0x8a1   :  { %v8205_v16 = vpop.f32.mrf.mxu1 }
 0x8a2   :  { %v4931_v23 = vadd.f32 %v8205_v16, %v4767_v8  ;;  %v8499_v16 = vld [vmem:[%s10169_s10] ss:$8 sps:$4 sm:$0xff]  }
 0x8a3   :  { %v4916_v58 = vpop.f32.mrf.mxu1 }
 0x8a4   :  { %v4929_v14 = vadd.f32 %v4916_v58, %v4765_v61  ;;  %v8481_v58 = vld [vmem:[%s10169_s10 + $0x90] ss:$8 sps:$4 sm:$0xff]  }
 0x8a5   :  { %v8232_v37 = vpop.f32.mrf.mxu1  ;;  %v8224_v53 = vpop.f32.mrf.mxu0 }
 0x8a6   :  { %v5094_v35 = vadd.f32 %v8224_v53, %v4930_v47  ;;  %v8498_v47 = vld [vmem:[%s10169_s10 + $0x14] ss:$8 sps:$4 sm:$0xff]   ;;  %v8514_v53 = vld [vmem:[%s10169_s10 + $0x140] ss:$8 sps:$4 sm:$0xff]  }
 0x8a7   :  { %v5151_v60 = vpop.f32.mrf.mxu1  ;;  %v5077_v49 = vpop.f32.mrf.mxu0 }
 0x8a8   :  { %v5092_v28 = vadd.f32 %v5077_v49, %v4928_v22  ;;  %v8501_v22 = vld [vmem:[%s10169_s10 + $0x4] ss:$8 sps:$4 sm:$0xff]  }
 0x8a9   :  { %v8233_v48 = vpop.f32.mrf.mxu1  ;;  %v8225_v25 = vpop.f32.mrf.mxu0 }
 0x8aa   :  { %v5167_v63 = vpack.c.bf16 %v8233_v48, %v8232_v37  ;;  %v5095_v40 = vadd.f32 %v8225_v25, %v4931_v23  ;;  %v8483_v23 = vld [vmem:[%s10169_s10 + $0x94] ss:$8 sps:$4 sm:$0xff]   ;;  %v8489_v37 = vld [vmem:[%s10169_s10 + $0x84] ss:$8 sps:$4 sm:$0xff]  }
 0x8ab   :  { %v5154_v27 = vpop.f32.mrf.mxu1  ;;  %v5080_v43 = vpop.f32.mrf.mxu0  ;;  %v8504_v48 = vld [vmem:[%s10169_s10 + $0x174] ss:$8 sps:$4 sm:$0xff]  }
 0x8ac   :  { %v5166_v21 = vpack.c.bf16 %v5154_v27, %v5151_v60  ;;  %v5093_v26 = vadd.f32 %v5080_v43, %v4929_v14  ;;  %v8591_v14 = vmov 0   ;;  %v8487_v60 = vld [vmem:[%s10169_s10 + $0x80] ss:$8 sps:$4 sm:$0xff]   ;;  %v8522_v25 = vld [vmem:[%s10169_s10 + $0x134] ss:$8 sps:$4 sm:$0xff]  }
 0x8ad   :  { %v8513_v43 = vld [vmem:[%s10169_s10 + $0x1f4] ss:$8 sps:$4 sm:$0xff]  }
 0x8ae   :  { %8242 = vmatprep.mubr.msk.bf16.mxu1 %vm3977_vm4, %v5166_v21  ;;  %v8502_v21 = vld [vmem:[%s10169_s10 + $0x170] ss:$8 sps:$4 sm:$0xff]  }
 0x8af   :  { %8243 = vmatmul.mubr.msk.bf16.vlgmr.msra.gmra.mxu1 %vm3977_vm4, %v5167_v63 }
 0x8b0   :  { %5482 = vmatpush1.bf16.msra.mxu1 %v8454_v0  ;;  %5513 = vmatprep.mubr.bf16.mxu1 %v8591_v14  ;;  %v8507_v0 = vld [vmem:[%s10169_s10 + $0x164] ss:$8 sps:$4 sm:$0xff]  }
 0x8b1   :  { %5483 = vmatprep.subr.bf16.mxu1 %v8459_v4 }
 0x8b4   :  { %5484 = vmatpush1.bf16.msra.mxu1 %v8457_v44  ;;  %v8505_v44 = vld [vmem:[%s10169_s10 + $0x160] ss:$8 sps:$4 sm:$0xff]  }
 0x8b5   :  { %5485 = vmatprep.subr.bf16.mxu1 %v8462_v41  ;;  %v8510_v41 = vld [vmem:[%s10169_s10 + $0x154] ss:$8 sps:$4 sm:$0xff]  }
 0x8b8   :  { %5486 = vmatpush1.bf16.msra.mxu1 %v8460_v39 }
 0x8b9   :  { %5487 = vmatprep.subr.bf16.mxu1 %v8465_v31 }
 0x8bc   :  { %5488 = vmatpush1.bf16.msra.mxu1 %v8463_v42 }
 0x8bd   :  { %5489 = vmatprep.subr.bf16.mxu1 %v8471_v1  ;;  %v8508_v1 = vld [vmem:[%s10169_s10 + $0x150] ss:$8 sps:$4 sm:$0xff]  }
 0x8c0   :  { %5490 = vmatpush1.bf16.msra.mxu1 %v8469_v36 }
 0x8c1   :  { %5491 = vmatprep.subr.bf16.mxu1 %v8477_v34  ;;  %v8516_v34 = vld [vmem:[%s10169_s10 + $0x144] ss:$8 sps:$4 sm:$0xff]  }
 0x8c4   :  { %5492 = vmatpush1.bf16.msra.mxu1 %v8475_v3 }
 0x8c5   :  { %5493 = vmatprep.subr.bf16.mxu1 %v8483_v23  ;;  %v8552_v23 = vld [vmem:[%s10171_s12 + $0x30] sm:$0xff]  }
 0x8c8   :  { %5494 = vmatpush1.bf16.msra.mxu1 %v8481_v58 }
 0x8c9   :  { %5495 = vmatprep.subr.bf16.mxu1 %v8489_v37 }
 0x8cc   :  { %5496 = vmatpush1.bf16.msra.mxu1 %v8487_v60  ;;  %v8551_v60 = vld [vmem:[%s10173_s14 + $0x38] sm:$0xff]  }
 0x8cd   :  { %8258 = vmatprep.subr.bf16.mxu1 %v8589_v11 }
 0x96f   :  { %v8244_v24 = vpop.f32.mrf.mxu1 }
 0x970   :  { %v5258_v17 = vadd.f32 %v8244_v24, %v5094_v35  ;;  %v7059_v24 = vld [vmem:[%s10168_s9 + $0x8] sm:$0xf]  ;;  %v8528_v35 = vld [vmem:[%s10169_s10 + $0x124] ss:$8 sps:$4 sm:$0xff]  }
 0x971   :  { %v5241_v59 = vpop.f32.mrf.mxu1 }
 0x972   :  { %v5256_v29 = vadd.f32 %v5241_v59, %v5092_v28  ;;  %v8520_v59 = vld [vmem:[%s10169_s10 + $0x130] ss:$8 sps:$4 sm:$0xff]  }
 0x973   :  { %v8245_v45 = vpop.f32.mrf.mxu1  ;;  %v8511_v28 = vld [vmem:[%s10169_s10 + $0x1f0] ss:$8 sps:$4 sm:$0xff]  }
 0x974   :  { %v5259_v7 = vadd.f32 %v8245_v45, %v5095_v40  ;;  %v8526_v40 = vld [vmem:[%s10169_s10 + $0x120] ss:$8 sps:$4 sm:$0xff]   ;;  %v7093_v45 = vld [vmem:[%s10168_s9 + $0xc] sm:$0xf] }
 0x975   :  { %v5244_v12 = vpop.f32.mrf.mxu1 }
 0x976   :  { %v5261_v56 = vmax.f32 %v5258_v17, %v5259_v7  ;;  %v5257_v13 = vadd.f32 %v5244_v12, %v5093_v26  ;;  %v8519_v26 = vld [vmem:[%s10169_s10 + $0x1e4] ss:$8 sps:$4 sm:$0xff]   ;;  %v8525_v17 = vld [vmem:[%s10169_s10 + $0x1d4] ss:$8 sps:$4 sm:$0xff]   ;;  %v8523_v7 = vld [vmem:[%s10169_s10 + $0x1d0] ss:$8 sps:$4 sm:$0xff]  }
 0x977   :  { %v8531_v12 = vld [vmem:[%s10169_s10 + $0x1c4] ss:$8 sps:$4 sm:$0xff]  }
 0x978   :  { %v5260_v15 = vmax.f32 %v5256_v29, %v5257_v13  ;;  %v8529_v29 = vld [vmem:[%s10169_s10 + $0x1c0] ss:$8 sps:$4 sm:$0xff]   ;;  %v8534_v13 = vld [vmem:[%s10169_s10 + $0x114] ss:$8 sps:$4 sm:$0xff]  }
 0x97a   :  { %v5262_v8 = vmax.f32 %v5260_v15, %v5261_v56  ;;  %v8532_v56 = vld [vmem:[%s10169_s10 + $0x110] ss:$8 sps:$4 sm:$0xff]  }
 0x97b   :  { %v8535_v15 = vld [vmem:[%s10169_s10 + $0x1b0] ss:$8 sps:$4 sm:$0xff]  }
 0x97c   :  { %v5270_v18 = vadd.f32 %v7007_v32, %v5262_v8  ;;  %v8537_v32 = vld [vmem:[%s10169_s10 + $0x1b4] ss:$8 sps:$4 sm:$0xff]   ;;  %v8538_v8 = vld [vmem:[%s10169_s10 + $0x100] ss:$8 sps:$4 sm:$0xff]  }
 0x97e   :  { %v5271_v9 = vmax.f32 %v5270_v18, 0.0  ;;  %v8540_v18 = vld [vmem:[%s10169_s10 + $0x104] ss:$8 sps:$4 sm:$0xff]  }
 0x980   :  { %v5272_v61 = vpack.c.bf16 %v5271_v9, %v5271_v9  ;;  %v8541_v9 = vld [vmem:[%s10169_s10 + $0x1a0] ss:$8 sps:$4 sm:$0xff]  }
 0x982   :  { %v9838_v33 = vsel %vm148_vm0, %v5272_v61, 0  ;;  %v8543_v61 = vld [vmem:[%s10169_s10 + $0x1a4] ss:$8 sps:$4 sm:$0xff]  }
 0x983   :  { %8247 = vmatpush3.bf16.msra.mxu0 %v9838_v33 }
 0x984   :  { %8252 = vmatprep.subr.bf16.mxu0 %v8589_v11 }
 0x986   :  { %8249 = vmatmul.mubr.msk.bf16.vlgmr.msra.gmra.mxu0 %vm5274_vm6, %v5273_v46  ;;  %v8544_v46 = vld [vmem:[%s10169_s10 + $0x190] ss:$8 sps:$4 sm:$0xff]  }
 0x987   :  { %8253 = vmatpush3.bf16.msra.mxu0 %v9838_v33  ;;  %8254 = vmatprep.mubr.msk.bf16.mxu0 %vm8590_vm5, %v8589_v11 }
 0x988   :  { %5602 = vmatprep.subr.bf16.mxu0 %v8468_v54  ;;  %v8547_v54 = vld [vmem:[%s10169_s10 + $0x180] ss:$8 sps:$4 sm:$0xff]  }
 0x98e   :  { %8255 = vmatmul.mubr.msk.bf16.vlgmr.msra.gmra.mxu0 %vm5274_vm6, %v7009_v55  ;;  %v8549_v55 = vld [vmem:[%s10169_s10 + $0x184] ss:$8 sps:$4 sm:$0xff]  }
 0x98f   :  { %5603 = vmatpush1.bf16.msra.mxu0 %v8466_v30  ;;  %5634 = vmatprep.mubr.bf16.mxu0 %v8591_v14 }
 0x990   :  { %5604 = vmatprep.subr.bf16.mxu0 %v8474_v50 }
 0x993   :  { %5605 = vmatpush1.bf16.msra.mxu0 %v8472_v5 }
 0x994   :  { %5606 = vmatprep.subr.bf16.mxu0 %v8480_v57 }
 0x997   :  { %5607 = vmatpush1.bf16.msra.mxu0 %v8478_v19 }
 0x998   :  { %5608 = vmatprep.subr.bf16.mxu0 %v8486_v62 }
 0x99b   :  { %5609 = vmatpush1.bf16.msra.mxu0 %v8484_v2 }
 0x99c   :  { %5610 = vmatprep.subr.bf16.mxu0 %v8492_v20 }
 0x99f   :  { %5611 = vmatpush1.bf16.msra.mxu0 %v8490_v51 }
 0x9a0   :  { %5612 = vmatprep.subr.bf16.mxu0 %v8495_v38 }
 0x9a3   :  { %5613 = vmatpush1.bf16.msra.mxu0 %v8493_v10 }
 0x9a4   :  { %5614 = vmatprep.subr.bf16.mxu0 %v8498_v47  ;;  %v8550_v47 = vld [vmem:[%s10171_s12 + $0x38] sm:$0xff]  }
 0x9a7   :  { %5615 = vmatpush1.bf16.msra.mxu0 %v8496_v52 }
 0x9a8   :  { %5616 = vmatprep.subr.bf16.mxu0 %v8501_v22 }
 0x9ab   :  { %5617 = vmatpush1.bf16.msra.mxu0 %v8499_v16 }
 0x9ac   :  { %5786 = vmatprep.subr.bf16.mxu0 %v8504_v48  ;;  %v8554_v48 = vld [vmem:[%s10171_s12 + $0x28] sm:$0xff]  }
 0xa46   :  { %v5315_v27 = vpop.f32.mrf.mxu0 }
 0xa47   :  { %v5321_v63 = vpack.c.bf16 %v5315_v27, %v5315_v27 }
 0xa48   :  { %v8250_v6 = vpop.f32.mrf.mxu0 }
 0xa49   :  { %5635 = vmatmul.mubr.bf16.vlgmr.msra.gmra.mxu0 %v5321_v63  ;;  %v8556_v6 = vld [vmem:[%s10171_s12 + $0x20] sm:$0xff]  }
 0xa4a   :  { %v5318_v4 = vpop.f32.mrf.mxu0  ;;  %5787 = vmatpush1.bf16.msra.mxu0 %v8502_v21  ;;  %5818 = vmatprep.mubr.bf16.mxu0 %v8591_v14 }
 0xa4b   :  { %5788 = vmatprep.subr.bf16.mxu0 %v8507_v0  ;;  %v8553_v0 = vld [vmem:[%s10173_s14 + $0x30] sm:$0xff]  }
 0xa4c   :  { %v8251_v39 = vpop.f32.mrf.mxu0 }
 0xa4d   :  { %v8557_v39 = vld [vmem:[%s10173_s14 + $0x20] sm:$0xff]  }
 0xa4e   :  { %v5377_v31 = vpop.f32.mrf.mxu0  ;;  %5789 = vmatpush1.bf16.msra.mxu0 %v8505_v44  ;;  %v8555_v44 = vld [vmem:[%s10173_s14 + $0x28] sm:$0xff]  }
 0xa4f   :  { %v5383_v42 = vpack.c.bf16 %v5377_v31, %v5377_v31  ;;  %5790 = vmatprep.subr.bf16.mxu0 %v8510_v41  ;;  %v8558_v41 = vld [vmem:[%s10171_s12 + $0x18] sm:$0xff]   ;;  %v8560_v31 = vld [vmem:[%s10171_s12 + $0x10] sm:$0xff]  }
 0xa50   :  { %v8256_v36 = vpop.f32.mrf.mxu0 }
 0xa51   :  { %5514 = vmatmul.mubr.bf16.vlgmr.msra.gmra.mxu1 %v5383_v42  ;;  %v8559_v42 = vld [vmem:[%s10173_s14 + $0x18] sm:$0xff]   ;;  %v8561_v36 = vld [vmem:[%s10173_s14 + $0x10] sm:$0xff]  }
 0xa52   :  { %8259 = vmatpush3.bf16.msra.mxu1 %v9838_v33  ;;  %8260 = vmatprep.mubr.msk.bf16.mxu1 %vm8590_vm5, %v8589_v11  ;;  %v5380_v3 = vpop.f32.mrf.mxu0 }
 0xa53   :  { %8264 = vmatprep.subr.bf16.mxu1 %v8589_v11  ;;  %5791 = vmatpush1.bf16.msra.mxu0 %v8508_v1  ;;  %v8562_v1 = vld [vmem:[%s10171_s12 + $0x8] sm:$0xff]  }
 0xa54   :  { %v8257_v49 = vpop.f32.mrf.mxu0  ;;  %5792 = vmatprep.subr.bf16.mxu0 %v8516_v34  ;;  %v8564_v34 = vld [vmem:[%s10171_s12] sm:$0xff]   ;;  %v8563_v3 = vld [vmem:[%s10173_s14 + $0x8] sm:$0xff]  }
 0xa55   :  { %v8566_v49 = vld [vmem:[%s10171_s12 + $0x60] ss:$0 sps:$4 sm:$0xff]  }
 0xa57   :  { %5793 = vmatpush1.bf16.msra.mxu0 %v8514_v53  ;;  %v8565_v53 = vld [vmem:[%s10173_s14] sm:$0xff]  }
 0xa58   :  { %5794 = vmatprep.subr.bf16.mxu0 %v8522_v25  ;;  %v8567_v25 = vld [vmem:[%s10173_s14 + $0x60] ss:$0 sps:$4 sm:$0xff]  }
 0xa59   :  { %8261 = vmatmul.mubr.msk.bf16.vlgmr.msra.gmra.mxu1 %vm5274_vm6, %v7059_v24  ;;  %v6145_v24 = vsel %vm148_vm0, %v8566_v49, 0 }
 0xa5a   :  { %8265 = vmatpush3.bf16.msra.mxu1 %v9838_v33  ;;  %8266 = vmatprep.mubr.msk.bf16.mxu1 %vm8590_vm5, %v8589_v11  ;;  %v8517_v11 = vld [vmem:[%s10169_s10 + $0x1e0] ss:$8 sps:$4 sm:$0xff]   ;;  %v8546_v33 = vld [vmem:[%s10169_s10 + $0x194] ss:$8 sps:$4 sm:$0xff]  }
 0xa5b   :  { %5972 = vmatprep.subr.bf16.mxu1 %v8513_v43  ;;  %5795 = vmatpush1.bf16.msra.mxu0 %v8520_v59  ;;  %v6295_v43 = vsel %vm148_vm0, %v8567_v25, 0  ;;  %v8568_v59 = vld [vmem:[%s10171_s12 + $0x58] sm:$0xff]  }
 0xa5c   :  { %5796 = vmatprep.subr.bf16.mxu0 %v8528_v35  ;;  %v8569_v35 = vld [vmem:[%s10173_s14 + $0x58] sm:$0xff]  }
 0xa5f   :  { %5797 = vmatpush1.bf16.msra.mxu0 %v8526_v40  ;;  %v8570_v40 = vld [vmem:[%s10171_s12 + $0x50] sm:$0xff]  }
 0xa60   :  { %5798 = vmatprep.subr.bf16.mxu0 %v8534_v13 }
 0xa61   :  { %8267 = vmatmul.mubr.msk.bf16.vlgmr.msra.gmra.mxu1 %vm5274_vm6, %v7093_v45  ;;  %v8571_v45 = vld [vmem:[%s10173_s14 + $0x50] sm:$0xff]  }
 0xa62   :  { %5973 = vmatpush1.bf16.msra.mxu1 %v8511_v28  ;;  %6004 = vmatprep.mubr.bf16.mxu1 %v8591_v14  ;;  %v8572_v28 = vld [vmem:[%s10171_s12 + $0x48] sm:$0xff]  }
 0xa63   :  { %5974 = vmatprep.subr.bf16.mxu1 %v8519_v26  ;;  %5799 = vmatpush1.bf16.msra.mxu0 %v8532_v56  ;;  %v8573_v26 = vld [vmem:[%s10173_s14 + $0x48] sm:$0xff]  }
 0xa64   :  { %5800 = vmatprep.subr.bf16.mxu0 %v8540_v18 }
 0xa66   :  { %5975 = vmatpush1.bf16.msra.mxu1 %v8517_v11  ;;  %v8574_v11 = vld [vmem:[%s10171_s12 + $0x40] sm:$0xff]  }
 0xa67   :  { %5976 = vmatprep.subr.bf16.mxu1 %v8525_v17  ;;  %5801 = vmatpush1.bf16.msra.mxu0 %v8538_v8  ;;  %v8575_v17 = vld [vmem:[%s10173_s14 + $0x40] sm:$0xff]  }
 0xa68   :  { %6147 = vmatprep.subr.bf16.mxu0 %v8591_v14 }
 0xa6a   :  { %5977 = vmatpush1.bf16.msra.mxu1 %v8523_v7  ;;  %v6017_v7 = vlaneseq }
 0xa6b   :  { %5978 = vmatprep.subr.bf16.mxu1 %v8531_v12 }
 0xa6c   :  { %v6018_v12 = vshrl.u32 %v6017_v7, 7 }
 0xa6e   :  { %5979 = vmatpush1.bf16.msra.mxu1 %v8529_v29  ;;  %v6019_v13 = vsub.s32 0, %v6018_v12  ;;  %vm6347_vm8 = vcmp.lt.s32.totalorder %v6018_v12, 2 }
 0xa6f   :  { %5980 = vmatprep.subr.bf16.mxu1 %v8537_v32  ;;  %v6023_v32 = vsub.s32 1, %v6018_v12 }
 0xa72   :  { %5981 = vmatpush1.bf16.msra.mxu1 %v8535_v15  ;;  %v6015_v15 = vld [vmem:[%s10170_s11] sm:$0x3] }
 0xa73   :  { %5982 = vmatprep.subr.bf16.mxu1 %v8543_v61 }
 0xa76   :  { %5983 = vmatpush1.bf16.msra.mxu1 %v8541_v9  ;;  %v6020_v9 = vrot.slane %v6015_v15, %v6019_v13 }
 0xa77   :  { %5984 = vmatprep.subr.bf16.mxu1 %v8546_v33 }
 0xa7a   :  { %5985 = vmatpush1.bf16.msra.mxu1 %v8544_v46 }
 0xa7b   :  { %5986 = vmatprep.subr.bf16.mxu1 %v8549_v55 }
 0xa7e   :  { %5987 = vmatpush1.bf16.msra.mxu1 %v8547_v54  ;;  %v6024_v54 = vrot.slane %v6015_v15, %v6023_v32 }
 0xa7f   :  { %6297 = vmatprep.subr.bf16.mxu1 %v8591_v14 }
 0xb09   :  { %v5636_v30 = vpop.f32.mrf.mxu0 }
 0xb0b   :  { %v5638_v50 = vpop.f32.mrf.mxu0 }
 0xb0d   :  { %v5640_v5 = vpop.f32.mrf.mxu0 }
 0xb0f   :  { %v5641_v57 = vpop.f32.mrf.mxu0 }
 0xb11   :  { %v5515_v19 = vpop.f32.mrf.mxu1 }
 0xb12   :  { %v10031_v62 = vadd.f32 %v5636_v30, %v5515_v19 }
 0xb13   :  { %v5517_v2 = vpop.f32.mrf.mxu1 }
 0xb14   :  { %v10033_v20 = vadd.f32 %v5638_v50, %v5517_v2 }
 0xb15   :  { %v5519_v51 = vpop.f32.mrf.mxu1 }
 0xb17   :  { %v5520_v38 = vpop.f32.mrf.mxu1 }
 0xb19   :  { %v5682_v10 = vpop.f32.mrf.mxu1 }
 0xb1a   :  { %v5688_v52 = vpack.c.bf16 %v5682_v10, %v5682_v10 }
 0xb1b   :  { %v8262_v22 = vpop.f32.mrf.mxu1 }
 0xb1c   :  { %5819 = vmatmul.mubr.bf16.vlgmr.msra.gmra.mxu0 %v5688_v52 }
 0xb1d   :  { %v5685_v16 = vpop.f32.mrf.mxu1  ;;  %6148 = vmatpush1.bf16.msra.mxu0 %v8550_v47 }
 0xb1e   :  { %6149 = vmatprep.subr.bf16.mxu0 %v8591_v14 }
 0xb1f   :  { %v8263_v58 = vpop.f32.mrf.mxu1 }
 0xb21   :  { %v5868_v37 = vpop.f32.mrf.mxu1  ;;  %6150 = vmatpush1.bf16.msra.mxu0 %v8552_v23 }
 0xb22   :  { %v5874_v27 = vpack.c.bf16 %v5868_v37, %v5868_v37  ;;  %6151 = vmatprep.subr.bf16.mxu0 %v8591_v14 }
 0xb23   :  { %v8268_v21 = vpop.f32.mrf.mxu1 }
 0xb24   :  { %6005 = vmatmul.mubr.bf16.vlgmr.msra.gmra.mxu1 %v5874_v27  ;;  %v7127_v27 = vld [vmem:[%s10172_s13] ss:$0 sm:$0xff] }
 0xb25   :  { %v5871_v63 = vpop.f32.mrf.mxu1  ;;  %6298 = vmatpush1.bf16.msra.mxu1 %v8551_v60  ;;  %6152 = vmatpush1.bf16.msra.mxu0 %v8554_v48 }
 0xb26   :  { %6299 = vmatprep.subr.bf16.mxu1 %v8591_v14  ;;  %6153 = vmatprep.subr.bf16.mxu0 %v8591_v14  ;;  %v6339_v63 = vld [vmem:[%s10175_s16] sm:$0xff]  ;;  %s8592_s16 = smov [#allocation2]  }
 0xb27   :  { %v8269_v4 = vpop.f32.mrf.mxu1 }
 0xb29   :  { %6300 = vmatpush1.bf16.msra.mxu1 %v8553_v0  ;;  %6154 = vmatpush1.bf16.msra.mxu0 %v8556_v6  ;;  %v6346_v0 = vand.u32 127, %v6017_v7 }
 0xb2a   :  { %6301 = vmatprep.subr.bf16.mxu1 %v8591_v14  ;;  %6155 = vmatprep.subr.bf16.mxu0 %v8591_v14 }
 0xb2b   :  { %vm6348_vm9 = vcmp.lt.s32.totalorder %v6346_v0, 8 }
 0xb2c   :  { %vm6349_vm10 = vmand %vm6347_vm8, %vm6348_vm9 }
 0xb2d   :  { %6302 = vmatpush1.bf16.msra.mxu1 %v8555_v44  ;;  %6156 = vmatpush1.bf16.msra.mxu0 %v8558_v41 }
 0xb2e   :  { %6303 = vmatprep.subr.bf16.mxu1 %v8591_v14  ;;  %6157 = vmatprep.subr.bf16.mxu0 %v8591_v14 }
 0xb31   :  { %6304 = vmatpush1.bf16.msra.mxu1 %v8557_v39  ;;  %6158 = vmatpush1.bf16.msra.mxu0 %v8560_v31 }
 0xb32   :  { %6305 = vmatprep.subr.bf16.mxu1 %v8591_v14  ;;  %6159 = vmatprep.subr.bf16.mxu0 %v8591_v14 }
 0xb35   :  { %6306 = vmatpush1.bf16.msra.mxu1 %v8559_v42  ;;  %6160 = vmatpush1.bf16.msra.mxu0 %v8562_v1 }
 0xb36   :  { %6307 = vmatprep.subr.bf16.mxu1 %v8591_v14  ;;  %6161 = vmatprep.subr.bf16.mxu0 %v8591_v14 }
 0xb39   :  { %6308 = vmatpush1.bf16.msra.mxu1 %v8561_v36  ;;  %6162 = vmatpush1.bf16.msra.mxu0 %v8564_v34 }
 0xb3a   :  { %6309 = vmatprep.subr.bf16.mxu1 %v8591_v14  ;;  %6169 = vmatprep.subr.bf16.mxu0 %v8591_v14 }
 0xb3d   :  { %6310 = vmatpush1.bf16.msra.mxu1 %v8563_v3  ;;  %6170 = vmatpush2.bf16.msra.mxu0 %v6145_v24 }
 0xb3e   :  { %6311 = vmatprep.subr.bf16.mxu1 %v8591_v14  ;;  %6171 = vmatprep.subr.bf16.mxu0 %v8591_v14 }
 0xb41   :  { %6312 = vmatpush1.bf16.msra.mxu1 %v8565_v53  ;;  %6172 = vmatpush2.bf16.msra.mxu0 %v8568_v59 }
 0xb42   :  { %6319 = vmatprep.subr.bf16.mxu1 %v8591_v14  ;;  %6173 = vmatprep.subr.bf16.mxu0 %v8591_v14 }
 0xb45   :  { %6320 = vmatpush2.bf16.msra.mxu1 %v6295_v43  ;;  %6174 = vmatpush2.bf16.msra.mxu0 %v8570_v40 }
 0xb46   :  { %6321 = vmatprep.subr.bf16.mxu1 %v8591_v14  ;;  %6175 = vmatprep.subr.bf16.mxu0 %v8591_v14 }
 0xb49   :  { %6322 = vmatpush2.bf16.msra.mxu1 %v8569_v35  ;;  %6176 = vmatpush2.bf16.msra.mxu0 %v8572_v28 }
 0xb4a   :  { %6323 = vmatprep.subr.bf16.mxu1 %v8591_v14  ;;  %6177 = vmatprep.subr.bf16.mxu0 %v8591_v14 }
 0xb4d   :  { %6324 = vmatpush2.bf16.msra.mxu1 %v8571_v45  ;;  %6178 = vmatpush2.bf16.msra.mxu0 %v8574_v11 }
 0xb4e   :  { %6325 = vmatprep.subr.bf16.mxu1 %v8591_v14 }
 0xb51   :  { %6326 = vmatpush2.bf16.msra.mxu1 %v8573_v26 }
 0xb52   :  { %6327 = vmatprep.subr.bf16.mxu1 %v8591_v14 }
 0xb55   :  { %6328 = vmatpush2.bf16.msra.mxu1 %v8575_v17 }
 0xbdc   :  { %v5820_v29 = vpop.f32.mrf.mxu0 }
 0xbdd   :  { %v5827_v18 = vadd.f32 %v5820_v29, %v10031_v62  ;;  %v7142_v62 = vld [vmem:[%s10174_s15] ss:$0 sm:$0xff] }
 0xbde   :  { %v5822_v56 = vpop.f32.mrf.mxu0 }
 0xbdf   :  { %v5828_v33 = vadd.f32 %v5822_v56, %v10033_v20 }
 0xbe0   :  { %v5824_v14 = vpop.f32.mrf.mxu0 }
 0xbe2   :  { %v5825_v8 = vpop.f32.mrf.mxu0 }
 0xbe4   :  { %v6006_v61 = vpop.f32.mrf.mxu1 }
 0xbe5   :  { %v6013_v46 = vadd.f32 %v6006_v61, %v5827_v18 }
 0xbe6   :  { %v6008_v55 = vpop.f32.mrf.mxu1 }
 0xbe7   :  { %v6027_v30 = vadd.f32 %v6020_v9, %v6013_v46  ;;  %v6014_v50 = vadd.f32 %v6008_v55, %v5828_v33 }
 0xbe8   :  { %v6010_v5 = vpop.f32.mrf.mxu1 }
 0xbe9   :  { %v6028_v57 = vadd.f32 %v6024_v54, %v6014_v50  ;;  %v6029_v19 = vmax.f32 %v6027_v30, 0.0 }
 0xbea   :  { %v6011_v2 = vpop.f32.mrf.mxu1 }
 0xbeb   :  { %v6030_v51 = vmax.f32 %v6028_v57, 0.0  ;;  %v6031_v10 = vpack.c.bf16 %v6029_v19, %v6029_v19 }
 0xbed   :  { %v6032_v38 = vpack.c.bf16 %v6030_v51, %v6030_v51 }
 0xbef   :  { %7141 = vmatprep.mubr.msk.bf16.mxu0 %vm6140_vm7, %v6032_v38  ;;  %7156 = vmatprep.mubr.msk.bf16.mxu1 %vm6140_vm7, %v6032_v38 }
 0xbf0   :  { %6180 = vmatmul.mubr.bf16.vlgmr.msra.gmra.mxu0 %v6031_v10  ;;  %6330 = vmatmul.mubr.bf16.vlgmr.msra.gmra.mxu1 %v6031_v10 }
 0xcb0   :  { %v6181_v20 = vpop.f32.mrf.mxu0  ;;  %v6331_v47 = vpop.f32.mrf.mxu1 }
 0xcb1   :  { %v6332_v52 = vadd.f32 %v7142_v62, %v6331_v47  ;;  %v6182_v21 = vadd.f32 %v7127_v27, %v6181_v20 }
 0xcb2   :  { %v6183_v22 = vpop.f32.mrf.mxu0  ;;  %v6333_v16 = vpop.f32.mrf.mxu1 }
 0xcb3   :  { %v6337_v23 = vmul.f32 1.442695, %v6332_v52  ;;  %v6351_v4 = vmul.f32 %v6182_v21, %v6182_v21 }
 0xcb4   :  { %v6184_v58 = vpop.f32.mrf.mxu0  ;;  %v6334_v37 = vpop.f32.mrf.mxu1 }
 0xcb5   :  { %8576 = vpow2.f32 %v6337_v23 }
 0xcb6   :  { %v6185_v60 = vpop.f32.mrf.mxu0  ;;  %v6335_v48 = vpop.f32.mrf.mxu1 }
 0xcc2   :  { %v8577_v6 = vpop.eup %8576 }
 0xcc3   :  { %v6340_v44 = vmul.f32 %v8577_v6, %v6339_v63  ;;  %v6350_v41 = vmul.f32 %v8577_v6, %v8577_v6 }
 0xcc5   :  { %v6341_v39 = vadd.f32 %v6340_v44, %v6182_v21  ;;  %v6352_v31 = vadd.f32 %v6351_v4, %v6350_v41 }
 0xcc7   :  { %6342 = vst [vmem:[%s10176_s17] sm:$0xff] %v6341_v39  ;;  %v6353_v42 = vsub.f32 %v6352_v31, %v6332_v52 }
 0xcc9   :  { %v7157_v1 = vadd.f32 -0.5, %v6353_v42 }
 0xccb   :  { %v6355_v36 = vsel %vm6349_vm10, %v7157_v1, 0.0 }
 0xccc   :  { %6356 = vadd.xlane.f32.xlu0 %v6355_v36 }
 0xd55   :  { %v6357_v34 = vpop.xlane.xlu0 %6356 }
 0xd56   :  { %v6358_v3 = vrot.slane %v6357_v34, 4 }
 0xd58   :  { %v6359_v53 = vadd.f32 %v6358_v3, %v6357_v34 }
 0xd5a   :  { %v6360_v49 = vrot.slane %v6359_v53, 2 }
 0xd5c   :  { %v6361_v25 = vadd.f32 %v6360_v49, %v6359_v53 }
 0xd5e   :  { %v6362_v24 = vrot.slane %v6361_v25, 1 }
 0xd60   :  { %v6363_v43 = vadd.f32 %v6362_v24, %v6361_v25 }
 0xd62   :  { %8270 = vpush %v6363_v43 }
 0xd93   :  { %s8271_s13 = spop %8270 }
 0xd94   :  { %6366 = sst [smem:[#allocation2]] %s8271_s13 }
 0xd95   :  { %6376 = dma.smem_to_hbm %s8592_s16, 16, %s10177_s18, [#allocation3]  }
 0xd96   :  { %8586 = dma.done.wait [#allocation3], 16  }
 0xd97   :  { %8587 = vsyncadd [#allocation3], 4294967280 }
 0xd98   :  { %6382 = sfence }
 0xd99   :  { %6383 = vsyncpa [#allocation3], 1 }

</bundles_post_ra>
